<compile_context>
chip_gen: v6e
topology: v6e:2x2x1
jax: 0.10.0
libtpu: 0.0.40
codegen_flags: <defaults>
</compile_context>

<pallas_src>
import math
import functools

import numpy as np
import jax
import jax.numpy as jnp
from jax import lax
from jax.experimental import pallas as pl
from jax.experimental.pallas import tpu as pltpu


# ---------------------------------------------------------------------------
# Pallas kernel: one full DecoderLayer for one block of batch rows.
# ---------------------------------------------------------------------------
def _decoder_layer_kernel(
    # inputs
    x_ref, y_ref, sm_ref, cm_ref,
    wqkv_ref, bqkv_ref, wo_ref, bo_ref, g1_ref, be1_ref,
    wkv_ref, bkv_ref, wq_ref, bq_ref, wco_ref, bco_ref, g2_ref, be2_ref,
    w1_ref, bf1_ref, w2_ref, bf2_ref, g3_ref, be3_ref,
    # output
    out_ref,
    *, num_heads, head_dim, eps,
):
    BB, S, D = y_ref.shape
    H, dh = num_heads, head_dim
    N = BB * S
    scale = 1.0 / math.sqrt(dh)
    f32, bf16 = jnp.float32, jnp.bfloat16

    # Residual stream kept as a 2-D (BB*S, D) slab: batch folded into the
    # sublane axis so every projection is one big MXU matmul.
    y0 = y_ref[...].reshape(N, D).astype(f32)
    x0 = x_ref[...].reshape(N, D).astype(f32)
    smask = sm_ref[...]          # (BB, S, S) f32, broadcast over heads
    cmask = cm_ref[...]

    def layer_norm(v, gamma, beta):
        mean = jnp.mean(v, axis=-1, keepdims=True)
        var = jnp.mean(jnp.square(v - mean), axis=-1, keepdims=True)
        # rsqrt goes to the EUP slot instead of a VPU divide.
        return gamma * ((v - mean) * lax.rsqrt(var + eps)) + beta

    def split_heads(m):
        # (BB*S, D) head-major columns -> (BB*H, S, dh), bf16 for the MXU.
        return (m.reshape(BB, S, H, dh).swapaxes(1, 2)
                 .reshape(BB * H, S, dh).astype(bf16))

    def merge_heads(m):
        # (BB*H, S, dh) -> (BB*S, D)
        return m.reshape(BB, H, S, dh).swapaxes(1, 2).reshape(N, D)

    def mha(qh, kh, vh, mask):
        # Batched over (batch*head); scores + softmax stay in f32.
        sc = jnp.einsum("bqd,bkd->bqk", qh, kh, preferred_element_type=f32)
        sc = sc.reshape(BB, H, S, S) * scale + mask[:, None, :, :]
        m = jnp.max(sc, axis=-1, keepdims=True)
        e = jnp.exp(sc - m)
        p = e * pl.reciprocal(jnp.sum(e, axis=-1, keepdims=True), approx=True)
        p = p.reshape(BB * H, S, S).astype(bf16)
        o = jnp.einsum("bqk,bkd->bqd", p, vh, preferred_element_type=f32)
        return merge_heads(o)

    # ---------------- self attention ----------------
    qkv = (jnp.dot(y0.astype(bf16), wqkv_ref[...], preferred_element_type=f32)
           + bqkv_ref[...])
    q = split_heads(qkv[:, :D])          # contiguous head-major Q block
    k = split_heads(qkv[:, D:2 * D])     # contiguous head-major K block
    v = split_heads(qkv[:, 2 * D:3 * D])
    sa = mha(q, k, v, smask)
    sa = (jnp.dot(sa.astype(bf16), wo_ref[...], preferred_element_type=f32)
          + bo_ref[...])
    y1 = layer_norm(sa + y0, g1_ref[...], be1_ref[...])

    # ---------------- cross attention (kv from x, q from y) ----------------
    kv = (jnp.dot(x0.astype(bf16), wkv_ref[...], preferred_element_type=f32)
          + bkv_ref[...])
    qc = (jnp.dot(y1.astype(bf16), wq_ref[...], preferred_element_type=f32)
          + bq_ref[...])
    kc = split_heads(kv[:, :D])
    vc = split_heads(kv[:, D:2 * D])
    qh = split_heads(qc)
    ca = mha(qh, kc, vc, cmask)
    ca = (jnp.dot(ca.astype(bf16), wco_ref[...], preferred_element_type=f32)
          + bco_ref[...])
    y2 = layer_norm(ca + y1, g2_ref[...], be2_ref[...])

    # ---------------- position-wise feed forward ----------------
    hdn = jnp.maximum(
        jnp.dot(y2.astype(bf16), w1_ref[...], preferred_element_type=f32)
        + bf1_ref[...], 0.0)
    ff = (jnp.dot(hdn.astype(bf16), w2_ref[...], preferred_element_type=f32)
          + bf2_ref[...])
    y3 = layer_norm(ff + y2, g3_ref[...], be3_ref[...])

    out_ref[...] = y3.reshape(BB, S, D).astype(out_ref.dtype)


def decoder_layer_pallas(x, y, self_mask, cross_mask, p, *, num_heads,
                         eps=1e-5, block_b=None):
    B, S, D = y.shape
    H = num_heads
    dh = D // H
    if block_b is None:
        # Whole batch per grid step -> one large lane/sublane-dense block.
        # For v7x megacore at large B, pick block_b = B // (2 * n_chips_cores)
        # so the "parallel" batch axis feeds both TensorCores.
        block_b = B
    assert B % block_b == 0

    # Permute fused-projection columns to head-major [Q|K|V] / [K|V] so the
    # kernel slices are contiguous (no per-head interleaved strided slices).
    perm3 = np.arange(3 * D).reshape(H, 3, dh).transpose(1, 0, 2).reshape(-1)
    perm2 = np.arange(2 * D).reshape(H, 2, dh).transpose(1, 0, 2).reshape(-1)

    bf16 = jnp.bfloat16
    weights = [
        p["wqkv"][:, perm3].astype(bf16), p["bqkv"][:, perm3],
        p["wo"].astype(bf16), p["bo"], p["g1"], p["be1"],
        p["wkv"][:, perm2].astype(bf16), p["bkv"][:, perm2],
        p["wq"].astype(bf16), p["bq"],
        p["wco"].astype(bf16), p["bco"], p["g2"], p["be2"],
        p["w1"].astype(bf16), p["bf1"],
        p["w2"].astype(bf16), p["bf2"], p["g3"], p["be3"],
    ]

    bsd = pl.BlockSpec((block_b, S, D), lambda b: (b, 0, 0))
    bss = pl.BlockSpec((block_b, S, S), lambda b: (b, 0, 0))

    def wspec(arr):
        # Constant block index -> Pallas DMAs each weight only once across the
        # grid. (On v7x at large d_model, additionally single-buffer these and
        # K-tile the FFN to respect the 64 MiB VMEM budget.)
        return pl.BlockSpec(arr.shape, lambda b: (0, 0))

    kernel = functools.partial(
        _decoder_layer_kernel, num_heads=H, head_dim=dh, eps=eps)

    return pl.pallas_call(
        kernel,
        out_shape=jax.ShapeDtypeStruct((B, S, D), jnp.float32),
        grid_spec=pltpu.PrefetchScalarGridSpec(
            num_scalar_prefetch=0,
            grid=(B // block_b,),
            in_specs=[bsd, bsd, bss, bss] + [wspec(w) for w in weights],
            out_specs=bsd,
        ),
        compiler_params=pltpu.CompilerParams(
            dimension_semantics=("parallel",),
            # Above the 32 MiB v6e / 16 MiB v5e defaults, below v7x's 64 MiB
            # physical VMEM.
            vmem_limit_bytes=48 * 1024 * 1024,
        ),
    )(x, y, self_mask, cross_mask, *weights)


# ---------------------------------------------------------------------------
# Glue: sentence embedding (tokenize + embed + positional encoding), params.
# ---------------------------------------------------------------------------
def positional_encoding(d_model, max_seq):
    even_i = jnp.arange(0, d_model, 2, dtype=jnp.float32)
    denom = jnp.power(10000.0, even_i / d_model)
    pos = jnp.arange(max_seq, dtype=jnp.float32).reshape(max_seq, 1)
    even_pe = jnp.sin(pos / denom)
    odd_pe = jnp.cos(pos / denom)
    stacked = jnp.stack([even_pe, odd_pe], axis=2)
    return stacked.reshape(max_seq, d_model)


def batch_tokenize(batch, lang_to_idx, max_seq, start_tok, end_tok, pad_tok,
                   start_token, end_token):
    out = []
    for sentence in batch:
        idx = [lang_to_idx[c] for c in list(sentence)]
        if start_token:
            idx.insert(0, lang_to_idx[start_tok])
        if end_token:
            idx.append(lang_to_idx[end_tok])
        while len(idx) < max_seq:
            idx.append(lang_to_idx[pad_tok])
        out.append(idx[:max_seq])
    return jnp.asarray(out, dtype=jnp.int32)


def init_layer_params(key, d_model, ffn_hidden):
    ks = jax.random.split(key, 6)

    def lin(k, fan_in, fan_out):
        bound = 1.0 / math.sqrt(fan_in)
        kw, kb = jax.random.split(k)
        w = jax.random.uniform(kw, (fan_in, fan_out), jnp.float32, -bound, bound)
        b = jax.random.uniform(kb, (1, fan_out), jnp.float32, -bound, bound)
        return w, b

    wqkv, bqkv = lin(ks[0], d_model, 3 * d_model)
    wo, bo = lin(ks[1], d_model, d_model)
    wkv, bkv = lin(ks[2], d_model, 2 * d_model)
    wq, bq = lin(ks[3], d_model, d_model)
    wco, bco = lin(ks[4], d_model, d_model)
    k1, k2 = jax.random.split(ks[5])
    w1, bf1 = lin(k1, d_model, ffn_hidden)
    w2, bf2 = lin(k2, ffn_hidden, d_model)
    ones = jnp.ones((1, d_model), jnp.float32)
    zeros = jnp.zeros((1, d_model), jnp.float32)
    return dict(
        wqkv=wqkv, bqkv=bqkv, wo=wo, bo=bo, g1=ones, be1=zeros,
        wkv=wkv, bkv=bkv, wq=wq, bq=bq, wco=wco, bco=bco, g2=ones, be2=zeros,
        w1=w1, bf1=bf1, w2=w2, bf2=bf2, g3=ones, be3=zeros,
    )


# ---------------------------------------------------------------------------
# Pure-JAX reference (mirrors the PyTorch forward; matmul operands in bf16 to
# mirror the kernel's MXU precision) for a correctness check.
# ---------------------------------------------------------------------------
def ref_decoder_layer(x, y, sm, cm, p, num_heads, eps=1e-5):
    B, S, D = y.shape
    dh = D // num_heads
    bf = jnp.bfloat16

    def mm(a, w):
        return jnp.dot(a.astype(bf), w.astype(bf),
                       preferred_element_type=jnp.float32)

    def ln(v, g, b):
        mean = v.mean(-1, keepdims=True)
        var = ((v - mean) ** 2).mean(-1, keepdims=True)
        return g[0] * ((v - mean) / jnp.sqrt(var + eps)) + b[0]

    def attn(q, k, v, mask):
        sc = jnp.einsum("bhqd,bhkd->bhqk", q.astype(bf), k.astype(bf),
                        preferred_element_type=jnp.float32) / math.sqrt(dh)
        sc = sc + mask[:, None]
        prob = jax.nn.softmax(sc, -1)
        return jnp.einsum("bhqk,bhkd->bhqd", prob.astype(bf), v.astype(bf),
                          preferred_element_type=jnp.float32)

    qkv = mm(y, p["wqkv"]) + p["bqkv"][0]
    qkv = qkv.reshape(B, S, num_heads, 3 * dh).transpose(0, 2, 1, 3)
    q, k, v = jnp.split(qkv, 3, axis=-1)
    vals = attn(q, k, v, sm).transpose(0, 2, 1, 3).reshape(B, S, D)
    y1 = ln(mm(vals, p["wo"]) + p["bo"][0] + y, p["g1"], p["be1"])

    kv = mm(x, p["wkv"]) + p["bkv"][0]
    kv = kv.reshape(B, S, num_heads, 2 * dh).transpose(0, 2, 1, 3)
    k, v = jnp.split(kv, 2, axis=-1)
    q = (mm(y1, p["wq"]) + p["bq"][0]).reshape(
        B, S, num_heads, dh).transpose(0, 2, 1, 3)
    vals = attn(q, k, v, cm).transpose(0, 2, 1, 3).reshape(B, S, D)
    y2 = ln(mm(vals, p["wco"]) + p["bco"][0] + y1, p["g2"], p["be2"])

    hdn = jnp.maximum(mm(y2, p["w1"]) + p["bf1"][0], 0.0)
    y3 = ln(mm(hdn, p["w2"]) + p["bf2"][0] + y2, p["g3"], p["be3"])
    return y3


# ---------------------------------------------------------------------------
if __name__ == "__main__":
    d_model = 32
    num_heads = 4
    ffn_hidden = 64
    num_layers = 2
    max_seq = 8
    batch = 2

    START, END, PAD = "<s>", "</s>", "<pad>"
    vocab = [START, END, PAD] + list("abcdefghijklmnopqrstuvwxyz ")
    language_to_index = {tok: i for i, tok in enumerate(vocab)}
    vocab_size = len(vocab)

    key = jax.random.PRNGKey(0)
    k_emb, k_x, *k_layers = jax.random.split(key, 2 + num_layers)

    # sentence embedding parameters + glue
    emb_table = jax.random.normal(k_emb, (vocab_size, d_model), jnp.float32) * 0.02
    pe = positional_encoding(d_model, max_seq)

    y_sentences = ["hello", "pallas"]
    tokens = batch_tokenize(y_sentences, language_to_index, max_seq,
                            START, END, PAD, start_token=True, end_token=True)
    y_emb = jnp.take(emb_table, tokens, axis=0) + pe[None]          # (B, S, D)

    # encoder output and masks
    x = jax.random.normal(k_x, (batch, max_seq, d_model), jnp.float32)
    causal = jnp.where(
        jnp.arange(max_seq)[:, None] >= jnp.arange(max_seq)[None, :], 0.0, -1e9)
    self_mask = jnp.broadcast_to(causal, (batch, max_seq, max_seq)).astype(jnp.float32)
    cross_mask = jnp.zeros((batch, max_seq, max_seq), jnp.float32)

    layer_params = [init_layer_params(k_layers[i], d_model, ffn_hidden)
                    for i in range(num_layers)]

    # Pallas decoder stack
    y_pallas = y_emb
    for p in layer_params:
        y_pallas = decoder_layer_pallas(x, y_pallas, self_mask, cross_mask, p,
                                        num_heads=num_heads)
    y_pallas = jax.block_until_ready(y_pallas)

    # pure-JAX reference
    y_ref = y_emb
    for p in layer_params:
        y_ref = ref_decoder_layer(x, y_ref, self_mask, cross_mask, p, num_heads)
    y_ref = jax.block_until_ready(y_ref)

    np.testing.assert_allclose(np.asarray(y_pallas), np.asarray(y_ref),
                               rtol=2e-2, atol=2e-2)
    print("KERNEL_OK")
</pallas_src>

<mosaic_0001>
module attributes {stable_mosaic.version = 11 : i64} {
  func.func @_decoder_layer_kernel(%arg0: i32, %arg1: memref<2x8x32xf32, #tpu.memory_space<vmem>>, %arg2: memref<2x8x32xf32, #tpu.memory_space<vmem>>, %arg3: memref<2x8x8xf32, #tpu.memory_space<vmem>>, %arg4: memref<2x8x8xf32, #tpu.memory_space<vmem>>, %arg5: memref<32x96xbf16, #tpu.memory_space<vmem>>, %arg6: memref<1x96xf32, #tpu.memory_space<vmem>>, %arg7: memref<32x32xbf16, #tpu.memory_space<vmem>>, %arg8: memref<1x32xf32, #tpu.memory_space<vmem>>, %arg9: memref<1x32xf32, #tpu.memory_space<vmem>>, %arg10: memref<1x32xf32, #tpu.memory_space<vmem>>, %arg11: memref<32x64xbf16, #tpu.memory_space<vmem>>, %arg12: memref<1x64xf32, #tpu.memory_space<vmem>>, %arg13: memref<32x32xbf16, #tpu.memory_space<vmem>>, %arg14: memref<1x32xf32, #tpu.memory_space<vmem>>, %arg15: memref<32x32xbf16, #tpu.memory_space<vmem>>, %arg16: memref<1x32xf32, #tpu.memory_space<vmem>>, %arg17: memref<1x32xf32, #tpu.memory_space<vmem>>, %arg18: memref<1x32xf32, #tpu.memory_space<vmem>>, %arg19: memref<32x64xbf16, #tpu.memory_space<vmem>>, %arg20: memref<1x64xf32, #tpu.memory_space<vmem>>, %arg21: memref<64x32xbf16, #tpu.memory_space<vmem>>, %arg22: memref<1x32xf32, #tpu.memory_space<vmem>>, %arg23: memref<1x32xf32, #tpu.memory_space<vmem>>, %arg24: memref<1x32xf32, #tpu.memory_space<vmem>>, %arg25: memref<2x8x32xf32, #tpu.memory_space<vmem>>) attributes {dimension_semantics = [#tpu.dimension_semantics<parallel>], iteration_bounds = array<i64: 1>, scalar_prefetch = 0 : i64, scratch_operands = 0 : i64, tpu.core_type = #tpu.core_type<tc>, window_params = [{transform_indices = @transform_0, window_bounds = array<i64: 2, 8, 32>}, {transform_indices = @transform_1, window_bounds = array<i64: 2, 8, 32>}, {transform_indices = @transform_2, window_bounds = array<i64: 2, 8, 8>}, {transform_indices = @transform_3, window_bounds = array<i64: 2, 8, 8>}, {pipeline_mode = #tpu.pipeline_mode<synchronous>, transform_indices = @transform_4, window_bounds = array<i64: 32, 96>}, {pipeline_mode = #tpu.pipeline_mode<synchronous>, transform_indices = @transform_5, window_bounds = array<i64: 1, 96>}, {pipeline_mode = #tpu.pipeline_mode<synchronous>, transform_indices = @transform_6, window_bounds = array<i64: 32, 32>}, {pipeline_mode = #tpu.pipeline_mode<synchronous>, transform_indices = @transform_7, window_bounds = array<i64: 1, 32>}, {pipeline_mode = #tpu.pipeline_mode<synchronous>, transform_indices = @transform_8, window_bounds = array<i64: 1, 32>}, {pipeline_mode = #tpu.pipeline_mode<synchronous>, transform_indices = @transform_9, window_bounds = array<i64: 1, 32>}, {pipeline_mode = #tpu.pipeline_mode<synchronous>, transform_indices = @transform_10, window_bounds = array<i64: 32, 64>}, {pipeline_mode = #tpu.pipeline_mode<synchronous>, transform_indices = @transform_11, window_bounds = array<i64: 1, 64>}, {pipeline_mode = #tpu.pipeline_mode<synchronous>, transform_indices = @transform_12, window_bounds = array<i64: 32, 32>}, {pipeline_mode = #tpu.pipeline_mode<synchronous>, transform_indices = @transform_13, window_bounds = array<i64: 1, 32>}, {pipeline_mode = #tpu.pipeline_mode<synchronous>, transform_indices = @transform_14, window_bounds = array<i64: 32, 32>}, {pipeline_mode = #tpu.pipeline_mode<synchronous>, transform_indices = @transform_15, window_bounds = array<i64: 1, 32>}, {pipeline_mode = #tpu.pipeline_mode<synchronous>, transform_indices = @transform_16, window_bounds = array<i64: 1, 32>}, {pipeline_mode = #tpu.pipeline_mode<synchronous>, transform_indices = @transform_17, window_bounds = array<i64: 1, 32>}, {pipeline_mode = #tpu.pipeline_mode<synchronous>, transform_indices = @transform_18, window_bounds = array<i64: 32, 64>}, {pipeline_mode = #tpu.pipeline_mode<synchronous>, transform_indices = @transform_19, window_bounds = array<i64: 1, 64>}, {pipeline_mode = #tpu.pipeline_mode<synchronous>, transform_indices = @transform_20, window_bounds = array<i64: 64, 32>}, {pipeline_mode = #tpu.pipeline_mode<synchronous>, transform_indices = @transform_21, window_bounds = array<i64: 1, 32>}, {pipeline_mode = #tpu.pipeline_mode<synchronous>, transform_indices = @transform_22, window_bounds = array<i64: 1, 32>}, {pipeline_mode = #tpu.pipeline_mode<synchronous>, transform_indices = @transform_23, window_bounds = array<i64: 1, 32>}, {transform_indices = @transform_24, window_bounds = array<i64: 2, 8, 32>}]} {
    %c0 = arith.constant 0 : index
    %c0_0 = arith.constant 0 : index
    %c0_1 = arith.constant 0 : index
    %0 = vector.load %arg2[%c0, %c0_0, %c0_1] : memref<2x8x32xf32, #tpu.memory_space<vmem>>, vector<2x8x32xf32>
    %1 = vector.shape_cast %0 : vector<2x8x32xf32> to vector<16x32xf32>
    %c0_2 = arith.constant 0 : index
    %c0_3 = arith.constant 0 : index
    %c0_4 = arith.constant 0 : index
    %2 = vector.load %arg1[%c0_2, %c0_3, %c0_4] : memref<2x8x32xf32, #tpu.memory_space<vmem>>, vector<2x8x32xf32>
    %3 = vector.shape_cast %2 : vector<2x8x32xf32> to vector<16x32xf32>
    %c0_5 = arith.constant 0 : index
    %c0_6 = arith.constant 0 : index
    %c0_7 = arith.constant 0 : index
    %4 = vector.load %arg3[%c0_5, %c0_6, %c0_7] : memref<2x8x8xf32, #tpu.memory_space<vmem>>, vector<2x8x8xf32>
    %c0_8 = arith.constant 0 : index
    %c0_9 = arith.constant 0 : index
    %c0_10 = arith.constant 0 : index
    %5 = vector.load %arg4[%c0_8, %c0_9, %c0_10] : memref<2x8x8xf32, #tpu.memory_space<vmem>>, vector<2x8x8xf32>
    %6 = arith.truncf %1 : vector<16x32xf32> to vector<16x32xbf16>
    %c0_11 = arith.constant 0 : index
    %c0_12 = arith.constant 0 : index
    %7 = vector.load %arg5[%c0_11, %c0_12] : memref<32x96xbf16, #tpu.memory_space<vmem>>, vector<32x96xbf16>
    %cst = arith.constant dense<0.000000e+00> : vector<16x96xf32>
    %8 = tpu.matmul %6, %7, %cst {dimension_numbers = #tpu.dot_dimension_numbers<[1], [0], [0], [1], [0, 0, 1, 1], [], []>} : vector<16x32xbf16>, vector<32x96xbf16>, vector<16x96xf32> -> vector<16x96xf32>
    %c0_13 = arith.constant 0 : index
    %c0_14 = arith.constant 0 : index
    %9 = vector.load %arg6[%c0_13, %c0_14] : memref<1x96xf32, #tpu.memory_space<vmem>>, vector<1x96xf32>
    %10 = vector.broadcast %9 : vector<1x96xf32> to vector<16x96xf32>
    %11 = arith.addf %8, %10 : vector<16x96xf32>
    %12 = vector.extract_strided_slice %11 {offsets = [0, 0], sizes = [16, 32], strides = [1, 1]} : vector<16x96xf32> to vector<16x32xf32>
    %13 = vector.shape_cast %12 : vector<16x32xf32> to vector<2x8x4x8xf32>
    %14 = tpu.transpose %13, [0, 2, 1, 3] : vector<2x8x4x8xf32> -> vector<2x4x8x8xf32>
    %15 = vector.shape_cast %14 : vector<2x4x8x8xf32> to vector<8x8x8xf32>
    %16 = arith.truncf %15 : vector<8x8x8xf32> to vector<8x8x8xbf16>
    %17 = vector.extract_strided_slice %11 {offsets = [0, 32], sizes = [16, 32], strides = [1, 1]} : vector<16x96xf32> to vector<16x32xf32>
    %18 = vector.shape_cast %17 : vector<16x32xf32> to vector<2x8x4x8xf32>
    %19 = tpu.transpose %18, [0, 2, 1, 3] : vector<2x8x4x8xf32> -> vector<2x4x8x8xf32>
    %20 = vector.shape_cast %19 : vector<2x4x8x8xf32> to vector<8x8x8xf32>
    %21 = arith.truncf %20 : vector<8x8x8xf32> to vector<8x8x8xbf16>
    %22 = vector.extract_strided_slice %11 {offsets = [0, 64], sizes = [16, 32], strides = [1, 1]} : vector<16x96xf32> to vector<16x32xf32>
    %23 = vector.shape_cast %22 : vector<16x32xf32> to vector<2x8x4x8xf32>
    %24 = tpu.transpose %23, [0, 2, 1, 3] : vector<2x8x4x8xf32> -> vector<2x4x8x8xf32>
    %25 = vector.shape_cast %24 : vector<2x4x8x8xf32> to vector<8x8x8xf32>
    %26 = arith.truncf %25 : vector<8x8x8xf32> to vector<8x8x8xbf16>
    "tpu.trace_start"() <{level = 10 : i32, message = "bqd,bkd->bqk"}> : () -> ()
    %cst_15 = arith.constant dense<0.000000e+00> : vector<8x8x8xf32>
    %27 = tpu.matmul %16, %21, %cst_15 {dimension_numbers = #tpu.dot_dimension_numbers<[2], [2], [1], [1], [0, 0, 0, 1, 1, 1], [0], [0]>} : vector<8x8x8xbf16>, vector<8x8x8xbf16>, vector<8x8x8xf32> -> vector<8x8x8xf32>
    "tpu.trace_stop"() : () -> ()
    %28 = vector.shape_cast %27 : vector<8x8x8xf32> to vector<2x4x8x8xf32>
    %cst_16 = arith.constant 0.353553385 : f32
    %29 = vector.broadcast %cst_16 : f32 to vector<2x4x8x8xf32>
    %30 = arith.mulf %28, %29 : vector<2x4x8x8xf32>
    %31 = vector.shape_cast %4 : vector<2x8x8xf32> to vector<2x1x8x8xf32>
    %32 = vector.broadcast %31 : vector<2x1x8x8xf32> to vector<2x4x8x8xf32>
    %33 = arith.addf %30, %32 : vector<2x4x8x8xf32>
    %cst_17 = arith.constant dense<0xFF800000> : vector<2x4x8xf32>
    %34 = vector.multi_reduction <maximumf>, %33, %cst_17 [3] : vector<2x4x8x8xf32> to vector<2x4x8xf32>
    %35 = vector.shape_cast %34 : vector<2x4x8xf32> to vector<2x4x8x1xf32>
    %36 = vector.broadcast %35 : vector<2x4x8x1xf32> to vector<2x4x8x8xf32>
    %37 = arith.subf %33, %36 : vector<2x4x8x8xf32>
    %38 = math.exp %37 : vector<2x4x8x8xf32>
    %cst_18 = arith.constant dense<0.000000e+00> : vector<2x4x8xf32>
    %39 = vector.multi_reduction <add>, %38, %cst_18 [3] : vector<2x4x8x8xf32> to vector<2x4x8xf32>
    %40 = vector.shape_cast %39 : vector<2x4x8xf32> to vector<2x4x8x1xf32>
    %41 = tpu.reciprocal %40 {approx = true} : vector<2x4x8x1xf32> -> vector<2x4x8x1xf32>
    %42 = vector.broadcast %41 : vector<2x4x8x1xf32> to vector<2x4x8x8xf32>
    %43 = arith.mulf %38, %42 : vector<2x4x8x8xf32>
    %44 = vector.shape_cast %43 : vector<2x4x8x8xf32> to vector<8x8x8xf32>
    %45 = arith.truncf %44 : vector<8x8x8xf32> to vector<8x8x8xbf16>
    "tpu.trace_start"() <{level = 10 : i32, message = "bqk,bkd->bqd"}> : () -> ()
    %cst_19 = arith.constant dense<0.000000e+00> : vector<8x8x8xf32>
    %46 = tpu.matmul %45, %26, %cst_19 {dimension_numbers = #tpu.dot_dimension_numbers<[2], [1], [1], [2], [0, 0, 0, 1, 1, 2], [0], [0]>} : vector<8x8x8xbf16>, vector<8x8x8xbf16>, vector<8x8x8xf32> -> vector<8x8x8xf32>
    "tpu.trace_stop"() : () -> ()
    %47 = vector.shape_cast %46 : vector<8x8x8xf32> to vector<2x4x8x8xf32>
    %48 = tpu.transpose %47, [0, 2, 1, 3] : vector<2x4x8x8xf32> -> vector<2x8x4x8xf32>
    %49 = vector.shape_cast %48 : vector<2x8x4x8xf32> to vector<16x32xf32>
    %50 = arith.truncf %49 : vector<16x32xf32> to vector<16x32xbf16>
    %c0_20 = arith.constant 0 : index
    %c0_21 = arith.constant 0 : index
    %51 = vector.load %arg7[%c0_20, %c0_21] : memref<32x32xbf16, #tpu.memory_space<vmem>>, vector<32x32xbf16>
    %cst_22 = arith.constant dense<0.000000e+00> : vector<16x32xf32>
    %52 = tpu.matmul %50, %51, %cst_22 {dimension_numbers = #tpu.dot_dimension_numbers<[1], [0], [0], [1], [0, 0, 1, 1], [], []>} : vector<16x32xbf16>, vector<32x32xbf16>, vector<16x32xf32> -> vector<16x32xf32>
    %c0_23 = arith.constant 0 : index
    %c0_24 = arith.constant 0 : index
    %53 = vector.load %arg8[%c0_23, %c0_24] : memref<1x32xf32, #tpu.memory_space<vmem>>, vector<1x32xf32>
    %54 = vector.broadcast %53 : vector<1x32xf32> to vector<16x32xf32>
    %55 = arith.addf %52, %54 : vector<16x32xf32>
    %56 = arith.addf %55, %1 : vector<16x32xf32>
    %c0_25 = arith.constant 0 : index
    %c0_26 = arith.constant 0 : index
    %57 = vector.load %arg9[%c0_25, %c0_26] : memref<1x32xf32, #tpu.memory_space<vmem>>, vector<1x32xf32>
    %c0_27 = arith.constant 0 : index
    %c0_28 = arith.constant 0 : index
    %58 = vector.load %arg10[%c0_27, %c0_28] : memref<1x32xf32, #tpu.memory_space<vmem>>, vector<1x32xf32>
    %cst_29 = arith.constant dense<0.000000e+00> : vector<16xf32>
    %59 = vector.multi_reduction <add>, %56, %cst_29 [1] : vector<16x32xf32> to vector<16xf32>
    %60 = vector.shape_cast %59 : vector<16xf32> to vector<16x1xf32>
    %cst_30 = arith.constant 3.200000e+01 : f32
    %61 = vector.broadcast %cst_30 : f32 to vector<16x1xf32>
    %62 = arith.divf %60, %61 : vector<16x1xf32>
    %63 = vector.broadcast %62 : vector<16x1xf32> to vector<16x32xf32>
    %64 = arith.subf %56, %63 : vector<16x32xf32>
    %65 = arith.mulf %64, %64 : vector<16x32xf32>
    %cst_31 = arith.constant dense<0.000000e+00> : vector<16xf32>
    %66 = vector.multi_reduction <add>, %65, %cst_31 [1] : vector<16x32xf32> to vector<16xf32>
    %67 = vector.shape_cast %66 : vector<16xf32> to vector<16x1xf32>
    %cst_32 = arith.constant 3.200000e+01 : f32
    %68 = vector.broadcast %cst_32 : f32 to vector<16x1xf32>
    %69 = arith.divf %67, %68 : vector<16x1xf32>
    %70 = vector.broadcast %62 : vector<16x1xf32> to vector<16x32xf32>
    %71 = arith.subf %56, %70 : vector<16x32xf32>
    %cst_33 = arith.constant 9.99999974E-6 : f32
    %72 = vector.broadcast %cst_33 : f32 to vector<16x1xf32>
    %73 = arith.addf %69, %72 : vector<16x1xf32>
    %74 = math.rsqrt %73 : vector<16x1xf32>
    %75 = vector.broadcast %74 : vector<16x1xf32> to vector<16x32xf32>
    %76 = arith.mulf %71, %75 : vector<16x32xf32>
    %77 = vector.broadcast %57 : vector<1x32xf32> to vector<16x32xf32>
    %78 = arith.mulf %77, %76 : vector<16x32xf32>
    %79 = vector.broadcast %58 : vector<1x32xf32> to vector<16x32xf32>
    %80 = arith.addf %78, %79 : vector<16x32xf32>
    %81 = arith.truncf %3 : vector<16x32xf32> to vector<16x32xbf16>
    %c0_34 = arith.constant 0 : index
    %c0_35 = arith.constant 0 : index
    %82 = vector.load %arg11[%c0_34, %c0_35] : memref<32x64xbf16, #tpu.memory_space<vmem>>, vector<32x64xbf16>
    %cst_36 = arith.constant dense<0.000000e+00> : vector<16x64xf32>
    %83 = tpu.matmul %81, %82, %cst_36 {dimension_numbers = #tpu.dot_dimension_numbers<[1], [0], [0], [1], [0, 0, 1, 1], [], []>} : vector<16x32xbf16>, vector<32x64xbf16>, vector<16x64xf32> -> vector<16x64xf32>
    %c0_37 = arith.constant 0 : index
    %c0_38 = arith.constant 0 : index
    %84 = vector.load %arg12[%c0_37, %c0_38] : memref<1x64xf32, #tpu.memory_space<vmem>>, vector<1x64xf32>
    %85 = vector.broadcast %84 : vector<1x64xf32> to vector<16x64xf32>
    %86 = arith.addf %83, %85 : vector<16x64xf32>
    %87 = arith.truncf %80 : vector<16x32xf32> to vector<16x32xbf16>
    %c0_39 = arith.constant 0 : index
    %c0_40 = arith.constant 0 : index
    %88 = vector.load %arg13[%c0_39, %c0_40] : memref<32x32xbf16, #tpu.memory_space<vmem>>, vector<32x32xbf16>
    %cst_41 = arith.constant dense<0.000000e+00> : vector<16x32xf32>
    %89 = tpu.matmul %87, %88, %cst_41 {dimension_numbers = #tpu.dot_dimension_numbers<[1], [0], [0], [1], [0, 0, 1, 1], [], []>} : vector<16x32xbf16>, vector<32x32xbf16>, vector<16x32xf32> -> vector<16x32xf32>
    %c0_42 = arith.constant 0 : index
    %c0_43 = arith.constant 0 : index
    %90 = vector.load %arg14[%c0_42, %c0_43] : memref<1x32xf32, #tpu.memory_space<vmem>>, vector<1x32xf32>
    %91 = vector.broadcast %90 : vector<1x32xf32> to vector<16x32xf32>
    %92 = arith.addf %89, %91 : vector<16x32xf32>
    %93 = vector.extract_strided_slice %86 {offsets = [0, 0], sizes = [16, 32], strides = [1, 1]} : vector<16x64xf32> to vector<16x32xf32>
    %94 = vector.shape_cast %93 : vector<16x32xf32> to vector<2x8x4x8xf32>
    %95 = tpu.transpose %94, [0, 2, 1, 3] : vector<2x8x4x8xf32> -> vector<2x4x8x8xf32>
    %96 = vector.shape_cast %95 : vector<2x4x8x8xf32> to vector<8x8x8xf32>
    %97 = arith.truncf %96 : vector<8x8x8xf32> to vector<8x8x8xbf16>
    %98 = vector.extract_strided_slice %86 {offsets = [0, 32], sizes = [16, 32], strides = [1, 1]} : vector<16x64xf32> to vector<16x32xf32>
    %99 = vector.shape_cast %98 : vector<16x32xf32> to vector<2x8x4x8xf32>
    %100 = tpu.transpose %99, [0, 2, 1, 3] : vector<2x8x4x8xf32> -> vector<2x4x8x8xf32>
    %101 = vector.shape_cast %100 : vector<2x4x8x8xf32> to vector<8x8x8xf32>
    %102 = arith.truncf %101 : vector<8x8x8xf32> to vector<8x8x8xbf16>
    %103 = vector.shape_cast %92 : vector<16x32xf32> to vector<2x8x4x8xf32>
    %104 = tpu.transpose %103, [0, 2, 1, 3] : vector<2x8x4x8xf32> -> vector<2x4x8x8xf32>
    %105 = vector.shape_cast %104 : vector<2x4x8x8xf32> to vector<8x8x8xf32>
    %106 = arith.truncf %105 : vector<8x8x8xf32> to vector<8x8x8xbf16>
    "tpu.trace_start"() <{level = 10 : i32, message = "bqd,bkd->bqk"}> : () -> ()
    %cst_44 = arith.constant dense<0.000000e+00> : vector<8x8x8xf32>
    %107 = tpu.matmul %106, %97, %cst_44 {dimension_numbers = #tpu.dot_dimension_numbers<[2], [2], [1], [1], [0, 0, 0, 1, 1, 1], [0], [0]>} : vector<8x8x8xbf16>, vector<8x8x8xbf16>, vector<8x8x8xf32> -> vector<8x8x8xf32>
    "tpu.trace_stop"() : () -> ()
    %108 = vector.shape_cast %107 : vector<8x8x8xf32> to vector<2x4x8x8xf32>
    %cst_45 = arith.constant 0.353553385 : f32
    %109 = vector.broadcast %cst_45 : f32 to vector<2x4x8x8xf32>
    %110 = arith.mulf %108, %109 : vector<2x4x8x8xf32>
    %111 = vector.shape_cast %5 : vector<2x8x8xf32> to vector<2x1x8x8xf32>
    %112 = vector.broadcast %111 : vector<2x1x8x8xf32> to vector<2x4x8x8xf32>
    %113 = arith.addf %110, %112 : vector<2x4x8x8xf32>
    %cst_46 = arith.constant dense<0xFF800000> : vector<2x4x8xf32>
    %114 = vector.multi_reduction <maximumf>, %113, %cst_46 [3] : vector<2x4x8x8xf32> to vector<2x4x8xf32>
    %115 = vector.shape_cast %114 : vector<2x4x8xf32> to vector<2x4x8x1xf32>
    %116 = vector.broadcast %115 : vector<2x4x8x1xf32> to vector<2x4x8x8xf32>
    %117 = arith.subf %113, %116 : vector<2x4x8x8xf32>
    %118 = math.exp %117 : vector<2x4x8x8xf32>
    %cst_47 = arith.constant dense<0.000000e+00> : vector<2x4x8xf32>
    %119 = vector.multi_reduction <add>, %118, %cst_47 [3] : vector<2x4x8x8xf32> to vector<2x4x8xf32>
    %120 = vector.shape_cast %119 : vector<2x4x8xf32> to vector<2x4x8x1xf32>
    %121 = tpu.reciprocal %120 {approx = true} : vector<2x4x8x1xf32> -> vector<2x4x8x1xf32>
    %122 = vector.broadcast %121 : vector<2x4x8x1xf32> to vector<2x4x8x8xf32>
    %123 = arith.mulf %118, %122 : vector<2x4x8x8xf32>
    %124 = vector.shape_cast %123 : vector<2x4x8x8xf32> to vector<8x8x8xf32>
    %125 = arith.truncf %124 : vector<8x8x8xf32> to vector<8x8x8xbf16>
    "tpu.trace_start"() <{level = 10 : i32, message = "bqk,bkd->bqd"}> : () -> ()
    %cst_48 = arith.constant dense<0.000000e+00> : vector<8x8x8xf32>
    %126 = tpu.matmul %125, %102, %cst_48 {dimension_numbers = #tpu.dot_dimension_numbers<[2], [1], [1], [2], [0, 0, 0, 1, 1, 2], [0], [0]>} : vector<8x8x8xbf16>, vector<8x8x8xbf16>, vector<8x8x8xf32> -> vector<8x8x8xf32>
    "tpu.trace_stop"() : () -> ()
    %127 = vector.shape_cast %126 : vector<8x8x8xf32> to vector<2x4x8x8xf32>
    %128 = tpu.transpose %127, [0, 2, 1, 3] : vector<2x4x8x8xf32> -> vector<2x8x4x8xf32>
    %129 = vector.shape_cast %128 : vector<2x8x4x8xf32> to vector<16x32xf32>
    %130 = arith.truncf %129 : vector<16x32xf32> to vector<16x32xbf16>
    %c0_49 = arith.constant 0 : index
    %c0_50 = arith.constant 0 : index
    %131 = vector.load %arg15[%c0_49, %c0_50] : memref<32x32xbf16, #tpu.memory_space<vmem>>, vector<32x32xbf16>
    %cst_51 = arith.constant dense<0.000000e+00> : vector<16x32xf32>
    %132 = tpu.matmul %130, %131, %cst_51 {dimension_numbers = #tpu.dot_dimension_numbers<[1], [0], [0], [1], [0, 0, 1, 1], [], []>} : vector<16x32xbf16>, vector<32x32xbf16>, vector<16x32xf32> -> vector<16x32xf32>
    %c0_52 = arith.constant 0 : index
    %c0_53 = arith.constant 0 : index
    %133 = vector.load %arg16[%c0_52, %c0_53] : memref<1x32xf32, #tpu.memory_space<vmem>>, vector<1x32xf32>
    %134 = vector.broadcast %133 : vector<1x32xf32> to vector<16x32xf32>
    %135 = arith.addf %132, %134 : vector<16x32xf32>
    %136 = arith.addf %135, %80 : vector<16x32xf32>
    %c0_54 = arith.constant 0 : index
    %c0_55 = arith.constant 0 : index
    %137 = vector.load %arg17[%c0_54, %c0_55] : memref<1x32xf32, #tpu.memory_space<vmem>>, vector<1x32xf32>
    %c0_56 = arith.constant 0 : index
    %c0_57 = arith.constant 0 : index
    %138 = vector.load %arg18[%c0_56, %c0_57] : memref<1x32xf32, #tpu.memory_space<vmem>>, vector<1x32xf32>
    %cst_58 = arith.constant dense<0.000000e+00> : vector<16xf32>
    %139 = vector.multi_reduction <add>, %136, %cst_58 [1] : vector<16x32xf32> to vector<16xf32>
    %140 = vector.shape_cast %139 : vector<16xf32> to vector<16x1xf32>
    %cst_59 = arith.constant 3.200000e+01 : f32
    %141 = vector.broadcast %cst_59 : f32 to vector<16x1xf32>
    %142 = arith.divf %140, %141 : vector<16x1xf32>
    %143 = vector.broadcast %142 : vector<16x1xf32> to vector<16x32xf32>
    %144 = arith.subf %136, %143 : vector<16x32xf32>
    %145 = arith.mulf %144, %144 : vector<16x32xf32>
    %cst_60 = arith.constant dense<0.000000e+00> : vector<16xf32>
    %146 = vector.multi_reduction <add>, %145, %cst_60 [1] : vector<16x32xf32> to vector<16xf32>
    %147 = vector.shape_cast %146 : vector<16xf32> to vector<16x1xf32>
    %cst_61 = arith.constant 3.200000e+01 : f32
    %148 = vector.broadcast %cst_61 : f32 to vector<16x1xf32>
    %149 = arith.divf %147, %148 : vector<16x1xf32>
    %150 = vector.broadcast %142 : vector<16x1xf32> to vector<16x32xf32>
    %151 = arith.subf %136, %150 : vector<16x32xf32>
    %cst_62 = arith.constant 9.99999974E-6 : f32
    %152 = vector.broadcast %cst_62 : f32 to vector<16x1xf32>
    %153 = arith.addf %149, %152 : vector<16x1xf32>
    %154 = math.rsqrt %153 : vector<16x1xf32>
    %155 = vector.broadcast %154 : vector<16x1xf32> to vector<16x32xf32>
    %156 = arith.mulf %151, %155 : vector<16x32xf32>
    %157 = vector.broadcast %137 : vector<1x32xf32> to vector<16x32xf32>
    %158 = arith.mulf %157, %156 : vector<16x32xf32>
    %159 = vector.broadcast %138 : vector<1x32xf32> to vector<16x32xf32>
    %160 = arith.addf %158, %159 : vector<16x32xf32>
    %161 = arith.truncf %160 : vector<16x32xf32> to vector<16x32xbf16>
    %c0_63 = arith.constant 0 : index
    %c0_64 = arith.constant 0 : index
    %162 = vector.load %arg19[%c0_63, %c0_64] : memref<32x64xbf16, #tpu.memory_space<vmem>>, vector<32x64xbf16>
    %cst_65 = arith.constant dense<0.000000e+00> : vector<16x64xf32>
    %163 = tpu.matmul %161, %162, %cst_65 {dimension_numbers = #tpu.dot_dimension_numbers<[1], [0], [0], [1], [0, 0, 1, 1], [], []>} : vector<16x32xbf16>, vector<32x64xbf16>, vector<16x64xf32> -> vector<16x64xf32>
    %c0_66 = arith.constant 0 : index
    %c0_67 = arith.constant 0 : index
    %164 = vector.load %arg20[%c0_66, %c0_67] : memref<1x64xf32, #tpu.memory_space<vmem>>, vector<1x64xf32>
    %165 = vector.broadcast %164 : vector<1x64xf32> to vector<16x64xf32>
    %166 = arith.addf %163, %165 : vector<16x64xf32>
    %cst_68 = arith.constant 0.000000e+00 : f32
    %167 = vector.broadcast %cst_68 : f32 to vector<16x64xf32>
    %168 = arith.maximumf %166, %167 : vector<16x64xf32>
    %169 = arith.truncf %168 : vector<16x64xf32> to vector<16x64xbf16>
    %c0_69 = arith.constant 0 : index
    %c0_70 = arith.constant 0 : index
    %170 = vector.load %arg21[%c0_69, %c0_70] : memref<64x32xbf16, #tpu.memory_space<vmem>>, vector<64x32xbf16>
    %cst_71 = arith.constant dense<0.000000e+00> : vector<16x32xf32>
    %171 = tpu.matmul %169, %170, %cst_71 {dimension_numbers = #tpu.dot_dimension_numbers<[1], [0], [0], [1], [0, 0, 1, 1], [], []>} : vector<16x64xbf16>, vector<64x32xbf16>, vector<16x32xf32> -> vector<16x32xf32>
    %c0_72 = arith.constant 0 : index
    %c0_73 = arith.constant 0 : index
    %172 = vector.load %arg22[%c0_72, %c0_73] : memref<1x32xf32, #tpu.memory_space<vmem>>, vector<1x32xf32>
    %173 = vector.broadcast %172 : vector<1x32xf32> to vector<16x32xf32>
    %174 = arith.addf %171, %173 : vector<16x32xf32>
    %175 = arith.addf %174, %160 : vector<16x32xf32>
    %c0_74 = arith.constant 0 : index
    %c0_75 = arith.constant 0 : index
    %176 = vector.load %arg23[%c0_74, %c0_75] : memref<1x32xf32, #tpu.memory_space<vmem>>, vector<1x32xf32>
    %c0_76 = arith.constant 0 : index
    %c0_77 = arith.constant 0 : index
    %177 = vector.load %arg24[%c0_76, %c0_77] : memref<1x32xf32, #tpu.memory_space<vmem>>, vector<1x32xf32>
    %cst_78 = arith.constant dense<0.000000e+00> : vector<16xf32>
    %178 = vector.multi_reduction <add>, %175, %cst_78 [1] : vector<16x32xf32> to vector<16xf32>
    %179 = vector.shape_cast %178 : vector<16xf32> to vector<16x1xf32>
    %cst_79 = arith.constant 3.200000e+01 : f32
    %180 = vector.broadcast %cst_79 : f32 to vector<16x1xf32>
    %181 = arith.divf %179, %180 : vector<16x1xf32>
    %182 = vector.broadcast %181 : vector<16x1xf32> to vector<16x32xf32>
    %183 = arith.subf %175, %182 : vector<16x32xf32>
    %184 = arith.mulf %183, %183 : vector<16x32xf32>
    %cst_80 = arith.constant dense<0.000000e+00> : vector<16xf32>
    %185 = vector.multi_reduction <add>, %184, %cst_80 [1] : vector<16x32xf32> to vector<16xf32>
    %186 = vector.shape_cast %185 : vector<16xf32> to vector<16x1xf32>
    %cst_81 = arith.constant 3.200000e+01 : f32
    %187 = vector.broadcast %cst_81 : f32 to vector<16x1xf32>
    %188 = arith.divf %186, %187 : vector<16x1xf32>
    %189 = vector.broadcast %181 : vector<16x1xf32> to vector<16x32xf32>
    %190 = arith.subf %175, %189 : vector<16x32xf32>
    %cst_82 = arith.constant 9.99999974E-6 : f32
    %191 = vector.broadcast %cst_82 : f32 to vector<16x1xf32>
    %192 = arith.addf %188, %191 : vector<16x1xf32>
    %193 = math.rsqrt %192 : vector<16x1xf32>
    %194 = vector.broadcast %193 : vector<16x1xf32> to vector<16x32xf32>
    %195 = arith.mulf %190, %194 : vector<16x32xf32>
    %196 = vector.broadcast %176 : vector<1x32xf32> to vector<16x32xf32>
    %197 = arith.mulf %196, %195 : vector<16x32xf32>
    %198 = vector.broadcast %177 : vector<1x32xf32> to vector<16x32xf32>
    %199 = arith.addf %197, %198 : vector<16x32xf32>
    %200 = vector.shape_cast %199 : vector<16x32xf32> to vector<2x8x32xf32>
    %c0_83 = arith.constant 0 : index
    %c0_84 = arith.constant 0 : index
    %c0_85 = arith.constant 0 : index
    %201 = vector.load %arg25[%c0_83, %c0_84, %c0_85] : memref<2x8x32xf32, #tpu.memory_space<vmem>>, vector<2x8x32xf32>
    tpu.vector_store %arg25[%c0_83, %c0_84, %c0_85], %200 {strides = array<i32>} : memref<2x8x32xf32, #tpu.memory_space<vmem>>, vector<2x8x32xf32>,
    return
  }
  func.func @transform_0(%arg0: i32) -> (i32, i32, i32) {
    %c0_i32 = arith.constant 0 : i32
    %c0_i32_0 = arith.constant 0 : i32
    %c0_i32_1 = arith.constant 0 : i32
    return %arg0, %c0_i32, %c0_i32_0 : i32, i32, i32
  }
  func.func @transform_1(%arg0: i32) -> (i32, i32, i32) {
    %c0_i32 = arith.constant 0 : i32
    %c0_i32_0 = arith.constant 0 : i32
    %c0_i32_1 = arith.constant 0 : i32
    return %arg0, %c0_i32, %c0_i32_0 : i32, i32, i32
  }
  func.func @transform_2(%arg0: i32) -> (i32, i32, i32) {
    %c0_i32 = arith.constant 0 : i32
    %c0_i32_0 = arith.constant 0 : i32
    %c0_i32_1 = arith.constant 0 : i32
    return %arg0, %c0_i32, %c0_i32_0 : i32, i32, i32
  }
  func.func @transform_3(%arg0: i32) -> (i32, i32, i32) {
    %c0_i32 = arith.constant 0 : i32
    %c0_i32_0 = arith.constant 0 : i32
    %c0_i32_1 = arith.constant 0 : i32
    return %arg0, %c0_i32, %c0_i32_0 : i32, i32, i32
  }
  func.func @transform_4(%arg0: i32) -> (i32, i32) {
    %c0_i32 = arith.constant 0 : i32
    %c0_i32_0 = arith.constant 0 : i32
    %c0_i32_1 = arith.constant 0 : i32
    return %c0_i32, %c0_i32_0 : i32, i32
  }
  func.func @transform_5(%arg0: i32) -> (i32, i32) {
    %c0_i32 = arith.constant 0 : i32
    %c0_i32_0 = arith.constant 0 : i32
    %c0_i32_1 = arith.constant 0 : i32
    return %c0_i32, %c0_i32_0 : i32, i32
  }
  func.func @transform_6(%arg0: i32) -> (i32, i32) {
    %c0_i32 = arith.constant 0 : i32
    %c0_i32_0 = arith.constant 0 : i32
    %c0_i32_1 = arith.constant 0 : i32
    return %c0_i32, %c0_i32_0 : i32, i32
  }
  func.func @transform_7(%arg0: i32) -> (i32, i32) {
    %c0_i32 = arith.constant 0 : i32
    %c0_i32_0 = arith.constant 0 : i32
    %c0_i32_1 = arith.constant 0 : i32
    return %c0_i32, %c0_i32_0 : i32, i32
  }
  func.func @transform_8(%arg0: i32) -> (i32, i32) {
    %c0_i32 = arith.constant 0 : i32
    %c0_i32_0 = arith.constant 0 : i32
    %c0_i32_1 = arith.constant 0 : i32
    return %c0_i32, %c0_i32_0 : i32, i32
  }
  func.func @transform_9(%arg0: i32) -> (i32, i32) {
    %c0_i32 = arith.constant 0 : i32
    %c0_i32_0 = arith.constant 0 : i32
    %c0_i32_1 = arith.constant 0 : i32
    return %c0_i32, %c0_i32_0 : i32, i32
  }
  func.func @transform_10(%arg0: i32) -> (i32, i32) {
    %c0_i32 = arith.constant 0 : i32
    %c0_i32_0 = arith.constant 0 : i32
    %c0_i32_1 = arith.constant 0 : i32
    return %c0_i32, %c0_i32_0 : i32, i32
  }
  func.func @transform_11(%arg0: i32) -> (i32, i32) {
    %c0_i32 = arith.constant 0 : i32
    %c0_i32_0 = arith.constant 0 : i32
    %c0_i32_1 = arith.constant 0 : i32
    return %c0_i32, %c0_i32_0 : i32, i32
  }
  func.func @transform_12(%arg0: i32) -> (i32, i32) {
    %c0_i32 = arith.constant 0 : i32
    %c0_i32_0 = arith.constant 0 : i32
    %c0_i32_1 = arith.constant 0 : i32
    return %c0_i32, %c0_i32_0 : i32, i32
  }
  func.func @transform_13(%arg0: i32) -> (i32, i32) {
    %c0_i32 = arith.constant 0 : i32
    %c0_i32_0 = arith.constant 0 : i32
    %c0_i32_1 = arith.constant 0 : i32
    return %c0_i32, %c0_i32_0 : i32, i32
  }
  func.func @transform_14(%arg0: i32) -> (i32, i32) {
    %c0_i32 = arith.constant 0 : i32
    %c0_i32_0 = arith.constant 0 : i32
    %c0_i32_1 = arith.constant 0 : i32
    return %c0_i32, %c0_i32_0 : i32, i32
  }
  func.func @transform_15(%arg0: i32) -> (i32, i32) {
    %c0_i32 = arith.constant 0 : i32
    %c0_i32_0 = arith.constant 0 : i32
    %c0_i32_1 = arith.constant 0 : i32
    return %c0_i32, %c0_i32_0 : i32, i32
  }
  func.func @transform_16(%arg0: i32) -> (i32, i32) {
    %c0_i32 = arith.constant 0 : i32
    %c0_i32_0 = arith.constant 0 : i32
    %c0_i32_1 = arith.constant 0 : i32
    return %c0_i32, %c0_i32_0 : i32, i32
  }
  func.func @transform_17(%arg0: i32) -> (i32, i32) {
    %c0_i32 = arith.constant 0 : i32
    %c0_i32_0 = arith.constant 0 : i32
    %c0_i32_1 = arith.constant 0 : i32
    return %c0_i32, %c0_i32_0 : i32, i32
  }
  func.func @transform_18(%arg0: i32) -> (i32, i32) {
    %c0_i32 = arith.constant 0 : i32
    %c0_i32_0 = arith.constant 0 : i32
    %c0_i32_1 = arith.constant 0 : i32
    return %c0_i32, %c0_i32_0 : i32, i32
  }
  func.func @transform_19(%arg0: i32) -> (i32, i32) {
    %c0_i32 = arith.constant 0 : i32
    %c0_i32_0 = arith.constant 0 : i32
    %c0_i32_1 = arith.constant 0 : i32
    return %c0_i32, %c0_i32_0 : i32, i32
  }
  func.func @transform_20(%arg0: i32) -> (i32, i32) {
    %c0_i32 = arith.constant 0 : i32
    %c0_i32_0 = arith.constant 0 : i32
    %c0_i32_1 = arith.constant 0 : i32
    return %c0_i32, %c0_i32_0 : i32, i32
  }
  func.func @transform_21(%arg0: i32) -> (i32, i32) {
    %c0_i32 = arith.constant 0 : i32
    %c0_i32_0 = arith.constant 0 : i32
    %c0_i32_1 = arith.constant 0 : i32
    return %c0_i32, %c0_i32_0 : i32, i32
  }
  func.func @transform_22(%arg0: i32) -> (i32, i32) {
    %c0_i32 = arith.constant 0 : i32
    %c0_i32_0 = arith.constant 0 : i32
    %c0_i32_1 = arith.constant 0 : i32
    return %c0_i32, %c0_i32_0 : i32, i32
  }
  func.func @transform_23(%arg0: i32) -> (i32, i32) {
    %c0_i32 = arith.constant 0 : i32
    %c0_i32_0 = arith.constant 0 : i32
    %c0_i32_1 = arith.constant 0 : i32
    return %c0_i32, %c0_i32_0 : i32, i32
  }
  func.func @transform_24(%arg0: i32) -> (i32, i32, i32) {
    %c0_i32 = arith.constant 0 : i32
    %c0_i32_0 = arith.constant 0 : i32
    %c0_i32_1 = arith.constant 0 : i32
    return %arg0, %c0_i32, %c0_i32_0 : i32, i32, i32
  }
}

</mosaic_0001>

<bundles_post_ra>
// kernel: tpu_custom_call.1
= control target key start
LH: loop header
LB: loop body
LE: loop exit
PB: predicated region body
PF: predicated region fallthrough
CT: control target
= control target key end

     0   :  { %s7117_s0 = inlined_call_operand.vmem [shape: f32[2,8,32], index: 0, kind: input, shape index: {}]   ;;  %s7118_s1 = inlined_call_operand.vmem [shape: f32[2,8,32], index: 1, kind: input, shape index: {}]   ;;  %s7119_s2 = inlined_call_operand.vmem [shape: f32[2,8,8], index: 2, kind: input, shape index: {}]   ;;  %s7120_s3 = inlined_call_operand.hbm [shape: f32[2,8,8], index: 3, kind: input, shape index: {}]   ;;  %s7121_s4 = inlined_call_operand.hbm [shape: bf16[32,96], index: 4, kind: input, shape index: {}]   ;;  %s7122_s5 = inlined_call_operand.hbm [shape: f32[1,96], index: 5, kind: input, shape index: {}]   ;;  %s7123_s6 = inlined_call_operand.hbm [shape: bf16[32,32], index: 6, kind: input, shape index: {}]   ;;  %s7124_s7 = inlined_call_operand.hbm [shape: f32[1,32], index: 7, kind: input, shape index: {}]   ;;  %s7125_s8 = inlined_call_operand.hbm [shape: f32[1,32], index: 8, kind: input, shape index: {}]   ;;  %s7126_s9 = inlined_call_operand.hbm [shape: f32[1,32], index: 9, kind: input, shape index: {}]   ;;  %s7127_s10 = inlined_call_operand.vmem [shape: bf16[32,64], index: 10, kind: input, shape index: {}]   ;;  %s7128_s11 = inlined_call_operand.hbm [shape: f32[1,64], index: 11, kind: input, shape index: {}]   ;;  %s7129_s12 = inlined_call_operand.hbm [shape: bf16[32,32], index: 12, kind: input, shape index: {}]   ;;  %s7130_s13 = inlined_call_operand.hbm [shape: f32[1,32], index: 13, kind: input, shape index: {}]   ;;  %s7131_s14 = inlined_call_operand.hbm [shape: bf16[32,32], index: 14, kind: input, shape index: {}]   ;;  %s7132_s15 = inlined_call_operand.hbm [shape: f32[1,32], index: 15, kind: input, shape index: {}]   ;;  %s7133_s16 = inlined_call_operand.hbm [shape: f32[1,32], index: 16, kind: input, shape index: {}]   ;;  %s7134_s17 = inlined_call_operand.hbm [shape: f32[1,32], index: 17, kind: input, shape index: {}]   ;;  %s7135_s18 = inlined_call_operand.hbm [shape: bf16[32,64], index: 18, kind: input, shape index: {}]   ;;  %s7136_s19 = inlined_call_operand.vmem [shape: f32[1,64], index: 19, kind: input, shape index: {}]   ;;  %s7137_s20 = inlined_call_operand.vmem [shape: bf16[64,32], index: 20, kind: input, shape index: {}]   ;;  %s7138_s21 = inlined_call_operand.vmem [shape: f32[1,32], index: 21, kind: input, shape index: {}]   ;;  %s7139_s22 = inlined_call_operand.vmem [shape: f32[1,32], index: 22, kind: input, shape index: {}]   ;;  %s7140_s23 = inlined_call_operand.vmem [shape: f32[1,32], index: 23, kind: input, shape index: {}]   ;;  %s7141_s24 = inlined_call_operand.hbm [shape: f32[2,8,32], index: 24, kind: output, shape index: {}]  }
   0x1   :  { %7145 = sst [smem:[#allocation36_spill]] %s7117_s0 }
   0x2   :  { %7146 = sst [smem:[#allocation37_spill]] %s7118_s1 }
   0x3   :  { %7147 = sst [smem:[#allocation38_spill]] %s7119_s2 }
   0x4   :  { %7148 = sst [smem:[#allocation39_spill]] %s7120_s3 }
   0x5   :  { %7149 = sst [smem:[#allocation40_spill]] %s7121_s4 }
   0x6   :  { %7150 = sst [smem:[#allocation41_spill]] %s7122_s5 }
   0x7   :  { %7151 = sst [smem:[#allocation42_spill]] %s7123_s6 }
   0x8   :  { %7152 = sst [smem:[#allocation43_spill]] %s7124_s7 }
   0x9   :  { %7153 = sst [smem:[#allocation44_spill]] %s7125_s8 }
   0xa   :  { %7154 = sst [smem:[#allocation45_spill]] %s7141_s24 }
   0xb   :  { %29 = vsyncpa [#allocation3], 0 }
   0xc   :  { %30 = vsyncpa [#allocation6], 0 }
   0xd   :  { %31 = vsyncpa [#allocation9], 0 }
   0xe   :  { %32 = vsyncpa [#allocation12], 0 }
   0xf   :  { %33 = vsyncpa [#allocation15], 0 }
  0x10   :  { %34 = vsyncpa [#allocation18], 0 }
  0x11   :  { %35 = vsyncpa [#allocation21], 0 }
  0x12   :  { %36 = vsyncpa [#allocation24], 0 }
  0x13   :  { %37 = vsyncpa [#allocation4], 0  ;;  %s5980_s5 = smov [#allocation5]  }
  0x14   :  { %s61_s26 = sshll.u32 %s5980_s5, 4  ;;  %s62_s26 = int_to_ptr.vmem [resolvable:$true] %s61_s26 }
  0x15   :  { %s5650_s27 = scalar_lea.vmem %s62_s26, 256  ;;  %p5655_p1 = scmp.lt.s32.totalorder %s62_s26, %s62_s26 }
  0x16   :  { %p5651_p0 = scmp.ne.s32.totalorder %s62_s26, %s5650_s27  ;;  %p5656_p2 = scmp.lt.s32.totalorder %s5650_s27, %s5650_s27 }
  0x18   :  { %p5657_p3 = por %p5656_p2, %p5655_p1 }
  0x1a   :  { %p5658_p4 = pnand %p5657_p3, %p5651_p0 }
  0x1c   :  { %5661 = shalt.err (!%p5658_p4)
}
  0x1d   :  { %s5981_s28 = smov 64   ;;  %s5982_s6 = smov 4  }
  0x1e   :  { %s7155_s0 = sld [smem:[#allocation40_spill]]  ;;  %s5983_s7 = smov [#allocation8]  }
  0x1f   :  { %s83_s30 = sshll.u32 %s5983_s7, 4  ;;  %s5984_s3 = smov [#allocation11]   ;;  %s84_s30 = int_to_ptr.vmem [resolvable:$true] %s83_s30 }
  0x20   :  { %s106_s25 = sshll.u32 %s5984_s3, 4  ;;  %s5670_s8 = scalar_lea.vmem %s84_s30, 256  ;;  %s107_s25 = int_to_ptr.vmem [resolvable:$true] %s106_s25 }
  0x21   :  { %p5671_p5 = scmp.ne.s32.totalorder %s84_s30, %s5670_s8  ;;  %p5675_p6 = scmp.lt.s32.totalorder %s84_s30, %s84_s30 }
  0x22   :  { %p5676_p7 = scmp.lt.s32.totalorder %s5670_s8, %s5670_s8 }
  0x24   :  { %67 = dma.hbm_to_vmem [thread:$0]  %s7155_s0, 256, %s62_s26, [#allocation6], %s5981_s28, %s5981_s28, %s5982_s6  }
  0x25   :  { %p5677_p8 = por %p5676_p7, %p5675_p6 }
  0x27   :  { %p5678_p9 = pnand %p5677_p8, %p5671_p5 }
  0x29   :  { %5681 = shalt.err (!%p5678_p9)
}
  0x2a   :  { %s7156_s5 = sld [smem:[#allocation42_spill]]  ;;  %s5690_s26 = scalar_lea.vmem %s107_s25, 16 }
  0x2b   :  { %p5691_p10 = scmp.ne.s32.totalorder %s107_s25, %s5690_s26  ;;  %s5694_s27 = scalar_lea.vmem %s107_s25, 32 }
  0x2c   :  { %p5695_p11 = scmp.lt.s32.totalorder %s107_s25, %s107_s25  ;;  %p5696_p12 = scmp.lt.s32.totalorder %s5694_s27, %s5690_s26 }
  0x2e   :  { %p5697_p13 = por %p5696_p12, %p5695_p11 }
  0x30   :  { %89 = dma.hbm_to_vmem [thread:$0]  %s7156_s5, 256, %s84_s30, [#allocation9], %s5981_s28, %s5981_s28, %s5982_s6  }
  0x31   :  { %p5698_p0 = pnand %p5697_p13, %p5691_p10 }
  0x33   :  { %5701 = shalt.err (!%p5698_p0)
}
  0x34   :  { %s7157_s0 = sld [smem:[#allocation44_spill]]  ;;  %s5985_s7 = smov [#allocation14]  }
  0x35   :  { %s128_s3 = sshll.u32 %s5985_s7, 4  ;;  %s5986_s8 = smov [#allocation17]   ;;  %s129_s3 = int_to_ptr.vmem [resolvable:$true] %s128_s3 }
  0x36   :  { %s150_s24 = sshll.u32 %s5986_s8, 4  ;;  %s5710_s4 = scalar_lea.vmem %s129_s3, 16  ;;  %s151_s24 = int_to_ptr.vmem [resolvable:$true] %s150_s24 }
  0x37   :  { %p5711_p1 = scmp.ne.s32.totalorder %s129_s3, %s5710_s4  ;;  %s5714_s30 = scalar_lea.vmem %s129_s3, 32 }
  0x38   :  { %p5715_p2 = scmp.lt.s32.totalorder %s129_s3, %s129_s3  ;;  %p5716_p3 = scmp.lt.s32.totalorder %s5714_s30, %s5710_s4 }
  0x3a   :  { %109 = dma.hbm_to_vmem [thread:$0]  %s7157_s0, 16, %s107_s25, [#allocation12]  }
  0x3b   :  { %p5717_p4 = por %p5716_p3, %p5715_p2 }
  0x3d   :  { %p5718_p5 = pnand %p5717_p4, %p5711_p1 }
  0x3f   :  { %5721 = shalt.err (!%p5718_p5)
}
  0x40   :  { %131 = dma.hbm_to_vmem [thread:$0]  %s7128_s11, 16, %s129_s3, [#allocation15]  }
  0x41   :  { %s5730_s26 = scalar_lea.vmem %s151_s24, 16  ;;  %s5734_s25 = scalar_lea.vmem %s151_s24, 32 }
  0x42   :  { %p5731_p6 = scmp.ne.s32.totalorder %s151_s24, %s5730_s26  ;;  %p5735_p7 = scmp.lt.s32.totalorder %s151_s24, %s151_s24 }
  0x43   :  { %p5736_p8 = scmp.lt.s32.totalorder %s5734_s25, %s5730_s26 }
  0x45   :  { %p5737_p9 = por %p5736_p8, %p5735_p7 }
  0x47   :  { %p5738_p10 = pnand %p5737_p9, %p5731_p6 }
  0x49   :  { %5741 = shalt.err (!%p5738_p10)
}
  0x4a   :  { %153 = dma.hbm_to_vmem [thread:$0]  %s7130_s13, 16, %s151_s24, [#allocation18]  }
  0x4b   :  { %s5987_s29 = smov [#allocation20]   ;;  %s5988_s7 = smov [#allocation23]  }
  0x4c   :  { %s172_s0 = sshll.u32 %s5987_s29, 4  ;;  %s192_s8 = sshll.u32 %s5988_s7, 4  ;;  %s173_s0 = int_to_ptr.vmem [resolvable:$true] %s172_s0  ;;  %s193_s8 = int_to_ptr.vmem [resolvable:$true] %s192_s8 }
  0x4d   :  { %s5750_s4 = scalar_lea.vmem %s173_s0, 16  ;;  %s5754_s11 = scalar_lea.vmem %s173_s0, 32 }
  0x4e   :  { %p5751_p11 = scmp.ne.s32.totalorder %s173_s0, %s5750_s4  ;;  %p5755_p12 = scmp.lt.s32.totalorder %s173_s0, %s173_s0 }
  0x4f   :  { %p5756_p13 = scmp.lt.s32.totalorder %s5754_s11, %s5750_s4 }
  0x51   :  { %p5757_p0 = por %p5756_p13, %p5755_p12 }
  0x53   :  { %p5758_p1 = pnand %p5757_p0, %p5751_p11 }
  0x55   :  { %5761 = shalt.err (!%p5758_p1)
}
  0x56   :  { %175 = dma.hbm_to_vmem [thread:$0]  %s7132_s15, 16, %s173_s0, [#allocation21]  }
  0x57   :  { %s5770_s1 = scalar_lea.vmem %s193_s8, 16  ;;  %s5774_s13 = scalar_lea.vmem %s193_s8, 32 }
  0x58   :  { %p5771_p2 = scmp.ne.s32.totalorder %s193_s8, %s5770_s1  ;;  %p5775_p3 = scmp.lt.s32.totalorder %s193_s8, %s193_s8 }
  0x59   :  { %p5776_p4 = scmp.lt.s32.totalorder %s5774_s13, %s5770_s1 }
  0x5b   :  { %p5777_p5 = por %p5776_p4, %p5775_p3 }
  0x5d   :  { %p5778_p6 = pnand %p5777_p5, %p5771_p2 }
  0x5f   :  { %5781 = shalt.err (!%p5778_p6)
}
  0x60   :  { %195 = dma.hbm_to_vmem [thread:$0]  %s7134_s17, 16, %s193_s8, [#allocation24]  }
  0x61   :  { %s5989_s26 = smov [#allocation2]  }
  0x62   :  { %s49_s25 = sshll.u32 %s5989_s26, 4  ;;  %s50_s25 = int_to_ptr.vmem [resolvable:$true] %s49_s25 }
  0x63   :  { %s5790_s27 = scalar_lea.vmem %s50_s25, 256  ;;  %p5795_p8 = scmp.lt.s32.totalorder %s50_s25, %s50_s25 }
  0x64   :  { %p5791_p7 = scmp.ne.s32.totalorder %s50_s25, %s5790_s27  ;;  %p5796_p9 = scmp.lt.s32.totalorder %s5790_s27, %s5790_s27 }
  0x66   :  { %p5797_p10 = por %p5796_p9, %p5795_p8 }
  0x68   :  { %p5798_p11 = pnand %p5797_p10, %p5791_p7 }
  0x6a   :  { %5801 = shalt.err (!%p5798_p11)
}
  0x6b   :  { %s5990_s15 = smov 128   ;;  %s5991_s2 = smov 8  }
  0x6c   :  { %s7158_s7 = sld [smem:[#allocation39_spill]]  ;;  %s5992_s17 = smov [#allocation7]  }
  0x6d   :  { %s74_s8 = sshll.u32 %s5992_s17, 4  ;;  %s5993_s4 = smov [#allocation10]   ;;  %s75_s8 = int_to_ptr.vmem [resolvable:$true] %s74_s8 }
  0x6e   :  { %s96_s11 = sshll.u32 %s5993_s4, 4  ;;  %s5810_s3 = scalar_lea.vmem %s75_s8, 16  ;;  %s97_s11 = int_to_ptr.vmem [resolvable:$true] %s96_s11 }
  0x6f   :  { %p5811_p12 = scmp.ne.s32.totalorder %s75_s8, %s5810_s3  ;;  %s5814_s30 = scalar_lea.vmem %s75_s8, 32 }
  0x70   :  { %p5815_p13 = scmp.lt.s32.totalorder %s75_s8, %s75_s8  ;;  %p5816_p0 = scmp.lt.s32.totalorder %s5814_s30, %s5810_s3 }
  0x72   :  { %55 = dma.hbm_to_vmem [thread:$0]  %s7158_s7, 256, %s50_s25, [#allocation3], %s5990_s15, %s5990_s15, %s5991_s2  }
  0x73   :  { %p5817_p1 = por %p5816_p0, %p5815_p13 }
  0x75   :  { %p5818_p2 = pnand %p5817_p1, %p5811_p12 }
  0x77   :  { %5821 = shalt.err (!%p5818_p2)
}
  0x78   :  { %s7159_s24 = sld [smem:[#allocation41_spill]]  ;;  %s5830_s5 = scalar_lea.vmem %s97_s11, 16 }
  0x79   :  { %p5831_p3 = scmp.ne.s32.totalorder %s97_s11, %s5830_s5  ;;  %s5834_s26 = scalar_lea.vmem %s97_s11, 32 }
  0x7a   :  { %p5835_p4 = scmp.lt.s32.totalorder %s97_s11, %s97_s11  ;;  %p5836_p5 = scmp.lt.s32.totalorder %s5834_s26, %s5830_s5 }
  0x7c   :  { %p5837_p6 = por %p5836_p5, %p5835_p4 }
  0x7e   :  { %77 = dma.hbm_to_vmem [thread:$0]  %s7159_s24, 16, %s75_s8, [#allocation6]  }
  0x7f   :  { %p5838_p7 = pnand %p5837_p6, %p5831_p3 }
  0x81   :  { %5841 = shalt.err (!%p5838_p7)
}
  0x82   :  { %s7160_s29 = sld [smem:[#allocation43_spill]]  ;;  %s5994_s0 = smov [#allocation13]  }
  0x83   :  { %s116_s7 = sshll.u32 %s5994_s0, 4  ;;  %s5995_s17 = smov [#allocation16]   ;;  %s117_s7 = int_to_ptr.vmem [resolvable:$true] %s116_s7 }
  0x84   :  { %s137_s4 = sshll.u32 %s5995_s17, 4  ;;  %s5850_s3 = scalar_lea.vmem %s117_s7, 16  ;;  %s138_s4 = int_to_ptr.vmem [resolvable:$true] %s137_s4 }
  0x85   :  { %p5851_p8 = scmp.ne.s32.totalorder %s117_s7, %s5850_s3  ;;  %s5854_s8 = scalar_lea.vmem %s117_s7, 32 }
  0x86   :  { %p5855_p9 = scmp.lt.s32.totalorder %s117_s7, %s117_s7  ;;  %p5856_p10 = scmp.lt.s32.totalorder %s5854_s8, %s5850_s3 }
  0x88   :  { %99 = dma.hbm_to_vmem [thread:$0]  %s7160_s29, 16, %s97_s11, [#allocation9]  }
  0x89   :  { %p5857_p11 = por %p5856_p10, %p5855_p9 }
  0x8b   :  { %p5858_p12 = pnand %p5857_p11, %p5851_p8 }
  0x8d   :  { %5861 = shalt.err (!%p5858_p12)
}
  0x8e   :  { %119 = dma.hbm_to_vmem [thread:$0]  %s7126_s9, 16, %s117_s7, [#allocation12]  }
  0x8f   :  { %s5870_s13 = scalar_lea.vmem %s138_s4, 256  ;;  %p5875_p0 = scmp.lt.s32.totalorder %s138_s4, %s138_s4 }
  0x90   :  { %p5871_p13 = scmp.ne.s32.totalorder %s138_s4, %s5870_s13  ;;  %p5876_p1 = scmp.lt.s32.totalorder %s5870_s13, %s5870_s13 }
  0x92   :  { %p5877_p2 = por %p5876_p1, %p5875_p0 }
  0x94   :  { %p5878_p3 = pnand %p5877_p2, %p5871_p13 }
  0x96   :  { %5881 = shalt.err (!%p5878_p3)
}
  0x97   :  { %143 = dma.hbm_to_vmem [thread:$0]  %s7129_s12, 256, %s138_s4, [#allocation15], %s5981_s28, %s5981_s28, %s5982_s6  }
  0x98   :  { %s5996_s5 = smov [#allocation19]   ;;  %s5997_s25 = smov [#allocation22]  }
  0x99   :  { %s159_s26 = sshll.u32 %s5996_s5, 4  ;;  %s182_s27 = sshll.u32 %s5997_s25, 4  ;;  %s160_s26 = int_to_ptr.vmem [resolvable:$true] %s159_s26  ;;  %s183_s27 = int_to_ptr.vmem [resolvable:$true] %s182_s27 }
  0x9a   :  { %s5890_s9 = scalar_lea.vmem %s160_s26, 256  ;;  %p5895_p5 = scmp.lt.s32.totalorder %s160_s26, %s160_s26 }
  0x9b   :  { %p5891_p4 = scmp.ne.s32.totalorder %s160_s26, %s5890_s9  ;;  %p5896_p6 = scmp.lt.s32.totalorder %s5890_s9, %s5890_s9 }
  0x9d   :  { %p5897_p7 = por %p5896_p6, %p5895_p5 }
  0x9f   :  { %p5898_p8 = pnand %p5897_p7, %p5891_p4 }
  0xa1   :  { %5901 = shalt.err (!%p5898_p8)
}
  0xa2   :  { %165 = dma.hbm_to_vmem [thread:$0]  %s7131_s14, 256, %s160_s26, [#allocation18], %s5981_s28, %s5981_s28, %s5982_s6  }
  0xa3   :  { %s5910_s12 = scalar_lea.vmem %s183_s27, 16  ;;  %s5914_s7 = scalar_lea.vmem %s183_s27, 32 }
  0xa4   :  { %p5911_p9 = scmp.ne.s32.totalorder %s183_s27, %s5910_s12  ;;  %p5915_p10 = scmp.lt.s32.totalorder %s183_s27, %s183_s27 }
  0xa5   :  { %p5916_p11 = scmp.lt.s32.totalorder %s5914_s7, %s5910_s12 }
  0xa7   :  { %p5917_p12 = por %p5916_p11, %p5915_p10 }
  0xa9   :  { %p5918_p13 = pnand %p5917_p12, %p5911_p9 }
  0xab   :  { %5921 = shalt.err (!%p5918_p13)
}
  0xac   :  { %185 = dma.hbm_to_vmem [thread:$0]  %s7133_s16, 16, %s183_s27, [#allocation21]  }
  0xad   :  { %s5998_s3 = smov [#allocation25]  }
  0xae   :  { %s201_s8 = sshll.u32 %s5998_s3, 4  ;;  %s202_s8 = int_to_ptr.vmem [resolvable:$true] %s201_s8 }
  0xaf   :  { %s5930_s30 = scalar_lea.vmem %s202_s8, 256  ;;  %p5935_p1 = scmp.lt.s32.totalorder %s202_s8, %s202_s8 }
  0xb0   :  { %p5931_p0 = scmp.ne.s32.totalorder %s202_s8, %s5930_s30  ;;  %p5936_p2 = scmp.lt.s32.totalorder %s5930_s30, %s5930_s30 }
  0xb2   :  { %p5937_p3 = por %p5936_p2, %p5935_p1 }
  0xb4   :  { %p5938_p4 = pnand %p5937_p3, %p5931_p0 }
  0xb6   :  { %5941 = shalt.err (!%p5938_p4)
}
  0xb7   :  { %207 = dma.hbm_to_vmem [thread:$0]  %s7135_s18, 256, %s202_s8, [#allocation24], %s5981_s28, %s5981_s28, %s5982_s6  }
  0xb8   :  { %5962 = dma.done.wait [#allocation3], 256  }
  0xb9   :  { %5963 = vsyncadd [#allocation3], 4294967040 }
  0xba   :  { %5964 = dma.done.wait [#allocation6], 272  }
  0xbb   :  { %5965 = vsyncadd [#allocation6], 4294967024 }
  0xbc   :  { %5966 = dma.done.wait [#allocation9], 272  }
  0xbd   :  { %5967 = vsyncadd [#allocation9], 4294967024 }
  0xbe   :  { %5968 = dma.done.wait [#allocation12], 32  }
  0xbf   :  { %5969 = vsyncadd [#allocation12], 4294967264 }
  0xc0   :  { %5970 = dma.done.wait [#allocation15], 272  }
  0xc1   :  { %5971 = vsyncadd [#allocation15], 4294967024 }
  0xc2   :  { %5972 = dma.done.wait [#allocation18], 272  }
  0xc3   :  { %5973 = vsyncadd [#allocation18], 4294967024 }
  0xc4   :  { %5974 = dma.done.wait [#allocation21], 32  }
  0xc5   :  { %5975 = vsyncadd [#allocation21], 4294967264 }
  0xc6   :  { %5976 = dma.done.wait [#allocation24], 272  }
  0xc7   :  { %5977 = vsyncadd [#allocation24], 4294967024  ;;  %v5999_v0 = vmov 0.0   ;;  %vm6000_vm0 = vmmov 0   ;;  %v5548_v1 = vld [vmem:[#allocation5 + $0x8] sm:$0xff]   ;;  %v5549_v2 = vld [vmem:[#allocation5] sm:$0xff]   ;;  %v366_v21 = vlaneseq }
  0xc8   :  { %5236 = vmatprep.subr.bf16.mxu1 %v5999_v0  ;;  %5240 = vmatprep.mubr.msk.bf16.mxu1 %vm6000_vm0, %v5999_v0  ;;  %s7161_s6 = sld [smem:[#allocation37_spill]]  ;;  %vm296_vm1 = vcmask 261120   ;;  %v5049_v6 = vld [vmem:[#allocation7] ss:$0 sm:$0xff]  ;;  %s6001_s24 = smov 104   ;;  %vm1249_vm2 = vcmask 64512  }
  0xc9   :  { %5250 = vmatprep.subr.bf16.mxu0 %v5999_v0  ;;  %5252 = vmatprep.mubr.msk.bf16.mxu0 %vm6000_vm0, %v5999_v0  ;;  %s6002_s5 = smov 120   ;;  %s6003_s26 = smov 112   ;;  %v6005_v19 = vmov 1983009808   ;;  %v367_v23 = vshrl.u32 %v366_v21, 7  ;;  %vm1733_vm3 = vcmask 1043456  }
  0xca   :  { %5237 = vmatpush3.bf16.msra.mxu1 %v5548_v1  ;;  %s6004_s25 = smov 96   ;;  %v364_v20 = vunpack.c.l.s4 %v6005_v19  ;;  %v6006_v24 = vmov 1934713408   ;;  %s7162_s29 = sld [smem:[#allocation38_spill]]  ;;  %vm2397_vm4 = vcmask 130048   ;;  %vm2400_vm5 = vcmask 195584  }
  0xcb   :  { %5238 = vmatprep.subr.bf16.mxu1 %v5999_v0  ;;  %v396_v25 = vunpack.c.l.s4 %v6006_v24  ;;  %s6008_s7 = smov 24   ;;  %s7163_s11 = sld [smem:[#allocation36_spill]]  ;;  %vm4932_vm6 = vcmask 523264  }
  0xcc   :  { %v365_v22 = vunpack.c.0.s8 %v364_v20  ;;  %s6009_s3 = smov [#allocation26]  }
  0xcd   :  { %v397_v31 = vunpack.c.0.s8 %v396_v25  ;;  %s5030_s8 = sshll.u32 %s6009_s3, 4  ;;  %s5031_s8 = int_to_ptr.vmem [resolvable:$true] %s5030_s8 }
  0xce   :  { %v264_v3 = vld [vmem:[%s7161_s6] sm:$0xff]  ;;  %v265_v4 = vld [vmem:[%s7161_s6 + $0x8] sm:$0xff]  ;;  %5239 = vmatpush3.bf16.msra.mxu1 %v5549_v2  ;;  %v6255_v27 = vsub.s32 %v365_v22, %v367_v23  ;;  %s5942_s30 = scalar_lea.vmem %s5031_s8, 256  ;;  %p5947_p6 = scmp.lt.s32.totalorder %s5031_s8, %s5031_s8 }
  0xcf   :  { %v272_v5 = vpack.c.bf16 %v265_v4, %v264_v3  ;;  %5244 = vmatprep.subr.bf16.mxu1 %v5999_v0  ;;  %v6266_v36 = vsub.s32 %v397_v31, %v367_v23  ;;  %p5943_p5 = scmp.ne.s32.totalorder %s5031_s8, %s5942_s30  ;;  %p5948_p7 = scmp.lt.s32.totalorder %s5942_s30, %s5942_s30 }
  0xd1   :  { %5241 = vmatmul.mubr.msk.bf16.vlgmr.msra.gmra.mxu1 %vm296_vm1, %v272_v5  ;;  %p5949_p8 = por %p5948_p7, %p5947_p6 }
  0xd2   :  { %5246 = vmatprep.mubr.msk.bf16.mxu1 %vm6000_vm0, %v5999_v0 }
  0xd3   :  { %p5950_p9 = pnand %p5949_p8, %p5943_p5 }
 0x191   :  { %v334_v7 = vpop.f32.mrf.mxu1 }
 0x192   :  { %v335_v8 = vadd.f32 %v5049_v6, %v334_v7 }
 0x193   :  { %v5242_v9 = vpop.f32.mrf.mxu1 }
 0x194   :  { %355 = vrot.lane.b32.xlu1 %v335_v8, %s6001_s24  ;;  %343 = vrot.lane.b32.xlu0 %v335_v8, %s6002_s5 }
 0x195   :  { %v337_v10 = vpop.f32.mrf.mxu1 }
 0x196   :  { %v6217_v11 = vadd.f32 %v5049_v6, %v337_v10 }
 0x197   :  { %v5243_v12 = vpop.f32.mrf.mxu1 }
 0x198   :  { %349 = vrot.lane.b32.xlu0 %v335_v8, %s6003_s26  ;;  %345 = vrot.lane.b32.xlu1 %v6217_v11, %s6002_s5 }
 0x19c   :  { %351 = vrot.lane.b32.xlu0 %v6217_v11, %s6003_s26  ;;  %357 = vrot.lane.b32.xlu1 %v6217_v11, %s6001_s24 }
 0x1a0   :  { %641 = vrot.lane.b32.xlu0 %v335_v8, %s6004_s25 }
 0x206   :  { %v6227_v13 = vpop.permute.xlu0 %343  ;;  %v6229_v14 = vpop.permute.xlu1 %355 }
 0x207   :  { %645 = vrot.lane.b32.xlu1 %v6227_v13, %s6004_s25  ;;  %v377_v28 = vcombine.low %v6227_v13, %v6229_v14  ;;  %v378_v30 = vcombine.high %v6227_v13, %v6229_v14 }
 0x209   :  { %v385_v33 = vrot.slane %v377_v28, %v6255_v27  ;;  %v392_v35 = vrot.slane %v378_v30, %v6255_v27 }
 0x20a   :  { %v6233_v15 = vpop.permute.xlu0 %349  ;;  %v6239_v16 = vpop.permute.xlu1 %345 }
 0x20b   :  { %649 = vrot.lane.b32.xlu0 %v6233_v15, %s6004_s25  ;;  %653 = vrot.lane.b32.xlu1 %v6229_v14, %s6004_s25  ;;  %v361_v26 = vcombine.low %v335_v8, %v6233_v15  ;;  %v362_v29 = vcombine.high %v335_v8, %v6233_v15 }
 0x20d   :  { %v369_v32 = vrot.slane %v361_v26, %v6255_v27  ;;  %v376_v34 = vrot.slane %v362_v29, %v6255_v27 }
 0x20e   :  { %v6245_v17 = vpop.permute.xlu0 %351  ;;  %v6247_v18 = vpop.permute.xlu1 %357 }
 0x20f   :  { %643 = vrot.lane.b32.xlu0 %v6217_v11, %s6004_s25  ;;  %647 = vrot.lane.b32.xlu1 %v6239_v16, %s6004_s25  ;;  %v393_v37 = vcombine.low %v369_v32, %v385_v33  ;;  %v394_v38 = vcombine.high %v369_v32, %v385_v33  ;;  %v409_v39 = vcombine.low %v376_v34, %v392_v35 }
 0x210   :  { %v410_v40 = vcombine.high %v376_v34, %v392_v35  ;;  %v429_v41 = vcombine.low %v6217_v11, %v6245_v17  ;;  %v445_v42 = vcombine.low %v6239_v16, %v6247_v18  ;;  %v430_v45 = vcombine.high %v6217_v11, %v6245_v17 }
 0x211   :  { %v401_v43 = vrot.slane %v393_v37, %v6266_v36  ;;  %v408_v44 = vrot.slane %v394_v38, %v6266_v36  ;;  %v446_v46 = vcombine.high %v6239_v16, %v6247_v18  ;;  %v417_v47 = vrot.slane %v409_v39, %v6266_v36 }
 0x212   :  { %v424_v48 = vrot.slane %v410_v40, %v6266_v36  ;;  %v437_v49 = vrot.slane %v429_v41, %v6255_v27  ;;  %v453_v50 = vrot.slane %v445_v42, %v6255_v27  ;;  %v642_v51 = vpop.permute.xlu0 %641  ;;  %v444_v55 = vrot.slane %v430_v45, %v6255_v27 }
 0x213   :  { %651 = vrot.lane.b32.xlu0 %v6245_v17, %s6004_s25  ;;  %655 = vrot.lane.b32.xlu1 %v6247_v18, %s6004_s25  ;;  %v497_v53 = vcombine.low %v401_v43, %v408_v44  ;;  %v5053_v54 = vcombine.high %v401_v43, %v408_v44  ;;  %v460_v56 = vrot.slane %v446_v46, %v6255_v27 }
 0x214   :  { %v513_v57 = vcombine.low %v417_v47, %v424_v48  ;;  %v5054_v58 = vcombine.high %v417_v47, %v424_v48  ;;  %v461_v59 = vcombine.low %v437_v49, %v453_v50  ;;  %v462_v60 = vcombine.high %v437_v49, %v453_v50 }
 0x215   :  { %v6285_v4 = vrot.slane %v497_v53, %v6255_v27  ;;  %v6288_v5 = vrot.slane %v5053_v54, %v6255_v27  ;;  %v477_v6 = vcombine.low %v444_v55, %v460_v56  ;;  %v478_v7 = vcombine.high %v444_v55, %v460_v56 }
 0x216   :  { %v6295_v19 = vrot.slane %v513_v57, %v6255_v27  ;;  %v6298_v20 = vrot.slane %v5054_v58, %v6255_v27  ;;  %v6301_v21 = vrot.slane %v461_v59, %v6266_v36  ;;  %v6304_v22 = vrot.slane %v462_v60, %v6266_v36 }
 0x217   :  { %945 = vrot.lane.b32.xlu1 %v335_v8, %s5981_s28  ;;  %v6307_v30 = vrot.slane %v477_v6, %v6266_v36  ;;  %v6310_v31 = vrot.slane %v478_v7, %v6266_v36  ;;  %v529_v39 = vcombine.low %v6285_v4, %v6288_v5  ;;  %v530_v41 = vcombine.high %v6285_v4, %v6288_v5 }
 0x218   :  { %v565_v37 = vcombine.low %v6301_v21, %v6304_v22  ;;  %v545_v40 = vcombine.low %v6295_v19, %v6298_v20 }
 0x279   :  { %v646_v52 = vpop.permute.xlu1 %645 }
 0x27d   :  { %v650_v61 = vpop.permute.xlu0 %649  ;;  %v654_v62 = vpop.permute.xlu1 %653 }
 0x27e   :  { %v665_v63 = vcombine.low %v642_v51, %v650_v61  ;;  %v666_v1 = vcombine.high %v642_v51, %v650_v61  ;;  %v681_v2 = vcombine.low %v646_v52, %v654_v62  ;;  %v682_v3 = vcombine.high %v646_v52, %v654_v62 }
 0x280   :  { %v673_v8 = vrot.slane %v665_v63, %v6255_v27  ;;  %v680_v9 = vrot.slane %v666_v1, %v6255_v27  ;;  %v689_v10 = vrot.slane %v681_v2, %v6255_v27  ;;  %v696_v12 = vrot.slane %v682_v3, %v6255_v27 }
 0x281   :  { %v644_v23 = vpop.permute.xlu0 %643  ;;  %v648_v29 = vpop.permute.xlu1 %647 }
 0x282   :  { %v697_v24 = vcombine.low %v673_v8, %v689_v10  ;;  %v698_v25 = vcombine.high %v673_v8, %v689_v10  ;;  %v713_v26 = vcombine.low %v680_v9, %v696_v12  ;;  %v714_v28 = vcombine.high %v680_v9, %v696_v12 }
 0x284   :  { %v705_v32 = vrot.slane %v697_v24, %v6266_v36  ;;  %v712_v33 = vrot.slane %v698_v25, %v6266_v36  ;;  %v721_v34 = vrot.slane %v713_v26, %v6266_v36  ;;  %v728_v35 = vrot.slane %v714_v28, %v6266_v36 }
 0x285   :  { %v652_v38 = vpop.permute.xlu0 %651  ;;  %v656_v46 = vpop.permute.xlu1 %655  ;;  %v5055_v25 = vcombine.high %v6301_v21, %v6304_v22 }
 0x286   :  { %v801_v42 = vcombine.low %v705_v32, %v712_v33  ;;  %v5057_v43 = vcombine.high %v705_v32, %v712_v33  ;;  %v817_v44 = vcombine.low %v721_v34, %v728_v35  ;;  %v5058_v45 = vcombine.high %v721_v34, %v728_v35 }
 0x287   :  { %v733_v47 = vcombine.low %v644_v23, %v652_v38  ;;  %v734_v48 = vcombine.high %v644_v23, %v652_v38  ;;  %v749_v49 = vcombine.low %v648_v29, %v656_v46  ;;  %v750_v50 = vcombine.high %v648_v29, %v656_v46 }
 0x288   :  { %v808_v51 = vrot.slane %v801_v42, %v6255_v27  ;;  %v816_v52 = vrot.slane %v5057_v43, %v6255_v27  ;;  %v824_v53 = vrot.slane %v817_v44, %v6255_v27  ;;  %v832_v54 = vrot.slane %v5058_v45, %v6255_v27 }
 0x289   :  { %v741_v55 = vrot.slane %v733_v47, %v6255_v27  ;;  %v748_v56 = vrot.slane %v734_v48, %v6255_v27  ;;  %v757_v57 = vrot.slane %v749_v49, %v6255_v27  ;;  %v764_v58 = vrot.slane %v750_v50, %v6255_v27 }
 0x28a   :  { %v833_v59 = vcombine.low %v808_v51, %v816_v52  ;;  %v849_v60 = vcombine.low %v824_v53, %v832_v54  ;;  %v834_v61 = vcombine.high %v808_v51, %v816_v52  ;;  %v850_v62 = vcombine.high %v824_v53, %v832_v54 }
 0x28b   :  { %v765_v63 = vcombine.low %v741_v55, %v757_v57  ;;  %v766_v1 = vcombine.high %v741_v55, %v757_v57  ;;  %v781_v2 = vcombine.low %v748_v56, %v764_v58  ;;  %v782_v3 = vcombine.high %v748_v56, %v764_v58 }
 0x28c   :  { %v841_v6 = vrot.slane %v833_v59, %v6266_v36  ;;  %v857_v7 = vrot.slane %v849_v60, %v6266_v36  ;;  %v848_v8 = vrot.slane %v834_v61, %v6266_v36  ;;  %v864_v9 = vrot.slane %v850_v62, %v6266_v36 }
 0x28d   :  { %v773_v10 = vrot.slane %v765_v63, %v6266_v36  ;;  %v780_v12 = vrot.slane %v766_v1, %v6266_v36  ;;  %v789_v23 = vrot.slane %v781_v2, %v6266_v36  ;;  %v796_v24 = vrot.slane %v782_v3, %v6266_v36 }
 0x28e   :  { %v865_v26 = vcombine.low %v841_v6, %v857_v7  ;;  %v866_v28 = vcombine.high %v841_v6, %v857_v7  ;;  %v537_v29 = vrot.slane %v529_v39, %v6266_v36  ;;  %v553_v43 = vrot.slane %v545_v40, %v6266_v36 }
 0x28f   :  { %v869_v32 = vcombine.low %v773_v10, %v780_v12  ;;  %v5059_v33 = vcombine.high %v773_v10, %v780_v12  ;;  %v885_v34 = vcombine.low %v789_v23, %v796_v24  ;;  %v5060_v35 = vcombine.high %v789_v23, %v796_v24 }
 0x290   :  { %v937_v38 = vpack.c.bf16 %v865_v26, %v865_v26  ;;  %v938_v42 = vpack.c.bf16 %v866_v28, %v866_v28  ;;  %v867_v44 = vcombine.low %v848_v8, %v864_v9  ;;  %v581_v39 = vcombine.low %v6307_v30, %v6310_v31 }
 0x291   :  { %v876_v45 = vrot.slane %v869_v32, %v6255_v27  ;;  %v884_v46 = vrot.slane %v5059_v33, %v6255_v27  ;;  %v892_v47 = vrot.slane %v885_v34, %v6255_v27  ;;  %v900_v48 = vrot.slane %v5060_v35, %v6255_v27 }
 0x292   :  { %v1254_v49 = vsel %vm1249_vm2, %v937_v38, 0  ;;  %v1300_v50 = vsel %vm1249_vm2, %v938_v42, 0  ;;  %v868_v51 = vcombine.high %v848_v8, %v864_v9  ;;  %v5056_v40 = vcombine.high %v6307_v30, %v6310_v31 }
 0x293   :  { %5245 = vmatpush3.bf16.xpose.msra.mxu1 %v1254_v49  ;;  %5251 = vmatpush3.bf16.xpose.msra.mxu0 %v1300_v50  ;;  %v901_v52 = vcombine.low %v876_v45, %v884_v46  ;;  %v917_v53 = vcombine.low %v892_v47, %v900_v48  ;;  %v561_v54 = vcombine.low %v537_v29, %v553_v43 }
 0x294   :  { %v562_v55 = vcombine.high %v537_v29, %v553_v43  ;;  %5256 = vmatprep.subr.bf16.mxu1 %v5999_v0  ;;  %5262 = vmatprep.subr.bf16.mxu0 %v5999_v0  ;;  %v546_v56 = vcombine.high %v6295_v19, %v6298_v20  ;;  %v939_v57 = vpack.c.bf16 %v867_v44, %v867_v44 }
 0x295   :  { %v940_v58 = vpack.c.bf16 %v868_v51, %v868_v51  ;;  %v909_v59 = vrot.slane %v901_v52, %v6266_v36  ;;  %v925_v60 = vrot.slane %v917_v53, %v6266_v36  ;;  %v572_v30 = vrot.slane %v565_v37, %v6255_v27 }
 0x296   :  { %v580_v31 = vrot.slane %v5055_v25, %v6255_v27  ;;  %v588_v61 = vrot.slane %v581_v39, %v6255_v27  ;;  %v544_v19 = vrot.slane %v530_v41, %v6266_v36  ;;  %v596_v20 = vrot.slane %v5056_v40, %v6255_v27 }
 0x297   :  { %v633_v62 = vpack.c.bf16 %v561_v54, %v561_v54  ;;  %v634_v63 = vpack.c.bf16 %v562_v55, %v562_v55  ;;  %v560_v1 = vrot.slane %v546_v56, %v6266_v36  ;;  %v1346_v2 = vsel %vm1249_vm2, %v939_v57, 0  ;;  %v268_v55 = vld [vmem:[%s7162_s29] sm:$0xff] }
 0x298   :  { %v902_v3 = vcombine.high %v876_v45, %v884_v46  ;;  %v1392_v21 = vsel %vm1249_vm2, %v940_v58, 0  ;;  %v933_v22 = vcombine.low %v909_v59, %v925_v60  ;;  %v934_v37 = vcombine.high %v909_v59, %v925_v60 }
 0x299   :  { %v918_v6 = vcombine.high %v892_v47, %v900_v48  ;;  %v597_v4 = vcombine.low %v572_v30, %v580_v31  ;;  %v563_v5 = vcombine.low %v544_v19, %v560_v1  ;;  %v564_v41 = vcombine.high %v544_v19, %v560_v1 }
 0x29a   :  { %5247 = vmatmul.mubr.msk.bf16.vlgmr.msra.gmra.mxu1 %vm1249_vm2, %v633_v62  ;;  %5253 = vmatmul.mubr.msk.bf16.vlgmr.msra.gmra.mxu0 %vm1249_vm2, %v634_v63  ;;  %v613_v7 = vcombine.low %v588_v61, %v596_v20  ;;  %v941_v8 = vpack.c.bf16 %v933_v22, %v933_v22  ;;  %v942_v9 = vpack.c.bf16 %v934_v37, %v934_v37 }
 0x29b   :  { %5257 = vmatpush3.bf16.xpose.msra.mxu1 %v1346_v2  ;;  %5263 = vmatpush3.bf16.xpose.msra.mxu0 %v1392_v21  ;;  %v916_v10 = vrot.slane %v902_v3, %v6266_v36  ;;  %v932_v12 = vrot.slane %v918_v6, %v6266_v36  ;;  %v635_v23 = vpack.c.bf16 %v563_v5, %v563_v5 }
 0x29c   :  { %5258 = vmatprep.mubr.msk.bf16.mxu1 %vm6000_vm0, %v5999_v0  ;;  %5264 = vmatprep.mubr.msk.bf16.mxu0 %vm6000_vm0, %v5999_v0  ;;  %v636_v24 = vpack.c.bf16 %v564_v41, %v564_v41  ;;  %v605_v25 = vrot.slane %v597_v4, %v6266_v36  ;;  %v621_v26 = vrot.slane %v613_v7, %v6266_v36  ;;  %v1438_v28 = vsel %vm1249_vm2, %v941_v8, 0 }
 0x29d   :  { %5268 = vmatprep.subr.bf16.mxu1 %v5999_v0  ;;  %5274 = vmatprep.subr.bf16.mxu0 %v5999_v0  ;;  %v1484_v29 = vsel %vm1249_vm2, %v942_v9, 0  ;;  %v935_v32 = vcombine.low %v916_v10, %v932_v12  ;;  %v936_v33 = vcombine.high %v916_v10, %v932_v12  ;;  %v598_v34 = vcombine.high %v572_v30, %v580_v31 }
 0x29e   :  { %v629_v35 = vcombine.low %v605_v25, %v621_v26  ;;  %v630_v38 = vcombine.high %v605_v25, %v621_v26  ;;  %v614_v42 = vcombine.high %v588_v61, %v596_v20 }
 0x29f   :  { %v943_v43 = vpack.c.bf16 %v935_v32, %v935_v32  ;;  %v944_v44 = vpack.c.bf16 %v936_v33, %v936_v33  ;;  %v612_v47 = vrot.slane %v598_v34, %v6266_v36 }
 0x2a0   :  { %v637_v45 = vpack.c.bf16 %v629_v35, %v629_v35  ;;  %v638_v46 = vpack.c.bf16 %v630_v38, %v630_v38  ;;  %v628_v48 = vrot.slane %v614_v42, %v6266_v36 }
 0x2a1   :  { %v1530_v39 = vsel %vm1249_vm2, %v943_v43, 0  ;;  %v1576_v49 = vsel %vm1249_vm2, %v944_v44, 0 }
 0x2a2   :  { %5259 = vmatmul.mubr.msk.bf16.vlgmr.msra.gmra.mxu1 %vm1249_vm2, %v635_v23  ;;  %5265 = vmatmul.mubr.msk.bf16.vlgmr.msra.gmra.mxu0 %vm1249_vm2, %v636_v24  ;;  %v631_v50 = vcombine.low %v612_v47, %v628_v48  ;;  %v632_v51 = vcombine.high %v612_v47, %v628_v48  ;;  %v269_v23 = vld [vmem:[%s7162_s29 + $0x8] sm:$0xff] }
 0x2a3   :  { %5269 = vmatpush3.bf16.xpose.msra.mxu1 %v1438_v28  ;;  %5275 = vmatpush3.bf16.xpose.msra.mxu0 %v1484_v29 }
 0x2a4   :  { %5270 = vmatprep.mubr.msk.bf16.mxu1 %vm6000_vm0, %v5999_v0  ;;  %5276 = vmatprep.mubr.msk.bf16.mxu0 %vm6000_vm0, %v5999_v0  ;;  %v639_v40 = vpack.c.bf16 %v631_v50, %v631_v50  ;;  %v640_v52 = vpack.c.bf16 %v632_v51, %v632_v51 }
 0x2a5   :  { %5280 = vmatprep.subr.bf16.mxu1 %v5999_v0  ;;  %5286 = vmatprep.subr.bf16.mxu0 %v5999_v0 }
 0x2aa   :  { %5271 = vmatmul.mubr.msk.bf16.vlgmr.msra.gmra.mxu1 %vm1249_vm2, %v637_v45  ;;  %5277 = vmatmul.mubr.msk.bf16.vlgmr.msra.gmra.mxu0 %vm1249_vm2, %v638_v46 }
 0x2ab   :  { %5281 = vmatpush3.bf16.xpose.msra.mxu1 %v1530_v39  ;;  %5287 = vmatpush3.bf16.xpose.msra.mxu0 %v1576_v49 }
 0x2ac   :  { %5282 = vmatprep.mubr.msk.bf16.mxu1 %vm6000_vm0, %v5999_v0  ;;  %5288 = vmatprep.mubr.msk.bf16.mxu0 %vm6000_vm0, %v5999_v0 }
 0x2ad   :  { %5292 = vmatprep.subr.bf16.mxu1 %v5999_v0  ;;  %5298 = vmatprep.subr.bf16.mxu0 %v5999_v0 }
 0x2b2   :  { %5283 = vmatmul.mubr.msk.bf16.vlgmr.msra.gmra.mxu1 %vm1249_vm2, %v639_v40  ;;  %5289 = vmatmul.mubr.msk.bf16.vlgmr.msra.gmra.mxu0 %vm1249_vm2, %v640_v52 }
 0x2b3   :  { %5294 = vmatprep.mubr.msk.bf16.mxu1 %vm6000_vm0, %v5999_v0  ;;  %5300 = vmatprep.mubr.msk.bf16.mxu0 %vm6000_vm0, %v5999_v0 }
 0x35a   :  { %v1290_v53 = vpop.f32.mrf.mxu1  ;;  %v1336_v54 = vpop.f32.mrf.mxu0 }
 0x35b   :  { %v1618_v56 = vmul.f32 0.35355338, %v1290_v53  ;;  %v1619_v57 = vmul.f32 0.35355338, %v1336_v54 }
 0x35c   :  { %v5248_v58 = vpop.f32.mrf.mxu1  ;;  %v5254_v59 = vpop.f32.mrf.mxu0 }
 0x35d   :  { %v6417_v60 = vadd.f32 %v1619_v57, %v268_v55  ;;  %v6419_v30 = vadd.f32 %v1618_v56, %v268_v55  ;;  %v946_v57 = vpop.permute.xlu1 %945 }
 0x35e   :  { %v1293_v31 = vpop.f32.mrf.mxu1  ;;  %v1339_v61 = vpop.f32.mrf.mxu0 }
 0x35f   :  { %v1637_v19 = vsel %vm1249_vm2, %v6417_v60, -inf  ;;  %v1634_v20 = vsel %vm1249_vm2, %v6419_v30, -inf }
 0x360   :  { %1638 = vmax.xlane.f32.xlu1 %v1637_v19  ;;  %v5255_v62 = vpop.f32.mrf.mxu0  ;;  %1635 = vmax.xlane.f32.xlu0 %v1634_v20  ;;  %v5249_v63 = vpop.f32.mrf.mxu1 }
 0x362   :  { %v1382_v1 = vpop.f32.mrf.mxu1  ;;  %v1428_v2 = vpop.f32.mrf.mxu0 }
 0x363   :  { %v1620_v3 = vmul.f32 0.35355338, %v1382_v1  ;;  %v1621_v21 = vmul.f32 0.35355338, %v1428_v2 }
 0x364   :  { %v5260_v22 = vpop.f32.mrf.mxu1  ;;  %v5266_v37 = vpop.f32.mrf.mxu0 }
 0x365   :  { %v1628_v6 = vadd.f32 %v1620_v3, %v268_v55  ;;  %v1629_v7 = vadd.f32 %v1621_v21, %v268_v55 }
 0x366   :  { %v1385_v4 = vpop.f32.mrf.mxu1  ;;  %v1431_v5 = vpop.f32.mrf.mxu0 }
 0x367   :  { %v1640_v41 = vsel %vm1249_vm2, %v1628_v6, -inf  ;;  %v1643_v26 = vsel %vm1249_vm2, %v1629_v7, -inf }
 0x368   :  { %v5267_v8 = vpop.f32.mrf.mxu0  ;;  %1641 = vmax.xlane.f32.xlu0 %v1640_v41  ;;  %v5261_v9 = vpop.f32.mrf.mxu1 }
 0x36a   :  { %v1474_v10 = vpop.f32.mrf.mxu1  ;;  %v1520_v12 = vpop.f32.mrf.mxu0 }
 0x36b   :  { %v1622_v24 = vmul.f32 0.35355338, %v1474_v10  ;;  %v1623_v25 = vmul.f32 0.35355338, %v1520_v12 }
 0x36c   :  { %v5278_v28 = vpop.f32.mrf.mxu0  ;;  %1644 = vmax.xlane.f32.xlu0 %v1643_v26  ;;  %v5272_v29 = vpop.f32.mrf.mxu1 }
 0x36d   :  { %v1631_v32 = vadd.f32 %v1623_v25, %v269_v23  ;;  %v1630_v33 = vadd.f32 %v1622_v24, %v269_v23 }
 0x36e   :  { %v1477_v34 = vpop.f32.mrf.mxu1  ;;  %v1523_v35 = vpop.f32.mrf.mxu0 }
 0x36f   :  { %v1649_v38 = vsel %vm1249_vm2, %v1631_v32, -inf  ;;  %v1646_v42 = vsel %vm1249_vm2, %v1630_v33, -inf }
 0x370   :  { %v5279_v43 = vpop.f32.mrf.mxu0  ;;  %1650 = vmax.xlane.f32.xlu0 %v1649_v38  ;;  %1647 = vmax.xlane.f32.xlu1 %v1646_v42  ;;  %v5273_v44 = vpop.f32.mrf.mxu1 }
 0x372   :  { %v1566_v45 = vpop.f32.mrf.mxu1  ;;  %v1612_v46 = vpop.f32.mrf.mxu0 }
 0x373   :  { %v1624_v47 = vmul.f32 0.35355338, %v1566_v45  ;;  %v1625_v48 = vmul.f32 0.35355338, %v1612_v46 }
 0x374   :  { %v5284_v39 = vpop.f32.mrf.mxu1  ;;  %v5290_v49 = vpop.f32.mrf.mxu0 }
 0x375   :  { %v6432_v50 = vadd.f32 %v1625_v48, %v269_v23  ;;  %v6434_v51 = vadd.f32 %v1624_v47, %v269_v23 }
 0x376   :  { %v1569_v40 = vpop.f32.mrf.mxu1  ;;  %v1615_v52 = vpop.f32.mrf.mxu0 }
 0x377   :  { %v1655_v53 = vsel %vm1249_vm2, %v6432_v50, -inf  ;;  %v1652_v54 = vsel %vm1249_vm2, %v6434_v51, -inf }
 0x378   :  { %v5291_v55 = vpop.f32.mrf.mxu0  ;;  %1656 = vmax.xlane.f32.xlu0 %v1655_v53  ;;  %1653 = vmax.xlane.f32.xlu1 %v1652_v54  ;;  %v5285_v56 = vpop.f32.mrf.mxu1 }
 0x389   :  { %953 = vrot.lane.b32.xlu1 %v6233_v15, %s5981_s28 }
 0x38d   :  { %957 = vrot.lane.b32.xlu1 %v6229_v14, %s5981_s28 }
 0x38e   :  { %949 = vrot.lane.b32.xlu0 %v6227_v13, %s5981_s28 }
 0x391   :  { %947 = vrot.lane.b32.xlu1 %v6217_v11, %s5981_s28 }
 0x3e9   :  { %v1639_v58 = vpop.xlane.xlu1 %1638  ;;  %v1636_v59 = vpop.xlane.xlu0 %1635 }
 0x3ea   :  { %v1659_v31 = vsub.f32 %v6417_v60, %v1639_v58  ;;  %v1658_v61 = vsub.f32 %v6419_v30, %v1636_v59 }
 0x3ec   :  { %v1668_v19 = vmul.f32 1.442695, %v1659_v31  ;;  %v1666_v20 = vmul.f32 1.442695, %v1658_v61 }
 0x3ee   :  { %5564 = vpow2.f32 %v1668_v19 }
 0x3ef   :  { %5566 = vpow2.f32 %v1666_v20 }
 0x3f1   :  { %v1642_v15 = vpop.xlane.xlu0 %1641 }
 0x3f2   :  { %v1660_v62 = vsub.f32 %v1628_v6, %v1642_v15 }
 0x3f4   :  { %v1670_v14 = vmul.f32 1.442695, %v1660_v62 }
 0x3f5   :  { %v1645_v63 = vpop.xlane.xlu0 %1644 }
 0x3f6   :  { %5568 = vpow2.f32 %v1670_v14  ;;  %v1661_v13 = vsub.f32 %v1629_v7, %v1645_v63 }
 0x3f8   :  { %v1672_v1 = vmul.f32 1.442695, %v1661_v13 }
 0x3f9   :  { %v1651_v2 = vpop.xlane.xlu0 %1650  ;;  %v1648_v11 = vpop.xlane.xlu1 %1647 }
 0x3fa   :  { %5570 = vpow2.f32 %v1672_v1  ;;  %v1663_v3 = vsub.f32 %v1631_v32, %v1651_v2  ;;  %v1662_v21 = vsub.f32 %v1630_v33, %v1648_v11 }
 0x3fb   :  { %v6450_v22 = vpop.eup %5564 }
 0x3fc   :  { %v6452_v60 = vpop.eup %5566  ;;  %v1674_v30 = vmul.f32 1.442695, %v1662_v21  ;;  %v1685_v37 = vsel %vm1249_vm2, %v6450_v22, 0.0  ;;  %v1676_v4 = vmul.f32 1.442695, %v1663_v3 }
 0x3fd   :  { %1686 = vadd.xlane.f32.xlu0 %v1685_v37  ;;  %v1682_v6 = vsel %vm1249_vm2, %v6452_v60, 0.0 }
 0x3fe   :  { %1683 = vadd.xlane.f32.xlu1 %v1682_v6  ;;  %5572 = vpow2.f32 %v1674_v30 }
 0x3ff   :  { %5574 = vpow2.f32 %v1676_v4 }
 0x401   :  { %v6458_v5 = vpop.xlane.xlu1 %1653  ;;  %v6462_v7 = vpop.xlane.xlu0 %1656 }
 0x403   :  { %v6460_v41 = vpop.eup %5568 }
 0x404   :  { %v1688_v8 = vsel %vm1249_vm2, %v6460_v41, 0.0 }
 0x405   :  { %1689 = vadd.xlane.f32.xlu0 %v1688_v8  ;;  %v954_v9 = vpop.permute.xlu1 %953  ;;  %v950_v25 = vpop.permute.xlu0 %949 }
 0x406   :  { %v969_v12 = vcombine.low %v946_v57, %v954_v9  ;;  %v970_v23 = vcombine.high %v946_v57, %v954_v9 }
 0x407   :  { %v6466_v10 = vpop.eup %5570 }
 0x408   :  { %v1691_v24 = vsel %vm1249_vm2, %v6466_v10, 0.0  ;;  %v977_v33 = vrot.slane %v969_v12, %v6255_v27  ;;  %v984_v34 = vrot.slane %v970_v23, %v6255_v27 }
 0x409   :  { %1692 = vadd.xlane.f32.xlu1 %v1691_v24  ;;  %v958_v26 = vpop.permute.xlu1 %957 }
 0x40a   :  { %v985_v28 = vcombine.low %v950_v25, %v958_v26  ;;  %v986_v29 = vcombine.high %v950_v25, %v958_v26 }
 0x40b   :  { %v6470_v32 = vpop.eup %5572 }
 0x40c   :  { %v993_v35 = vrot.slane %v985_v28, %v6255_v27  ;;  %v1000_v38 = vrot.slane %v986_v29, %v6255_v27  ;;  %v1694_v42 = vsel %vm1249_vm2, %v6470_v32, 0.0  ;;  %v6478_v43 = vpop.eup %5574 }
 0x40d   :  { %1695 = vadd.xlane.f32.xlu0 %v1694_v42  ;;  %v1697_v52 = vsel %vm1249_vm2, %v6478_v43, 0.0 }
 0x40e   :  { %v1001_v44 = vcombine.low %v977_v33, %v993_v35  ;;  %v1002_v45 = vcombine.high %v977_v33, %v993_v35  ;;  %v1017_v46 = vcombine.low %v984_v34, %v1000_v38  ;;  %v1018_v47 = vcombine.high %v984_v34, %v1000_v38 }
 0x410   :  { %v1009_v48 = vrot.slane %v1001_v44, %v6266_v36  ;;  %v1016_v39 = vrot.slane %v1002_v45, %v6266_v36  ;;  %v1025_v49 = vrot.slane %v1017_v46, %v6266_v36  ;;  %v1032_v40 = vrot.slane %v1018_v47, %v6266_v36 }
 0x411   :  { %1698 = vadd.xlane.f32.xlu0 %v1697_v52 }
 0x412   :  { %v1105_v53 = vcombine.low %v1009_v48, %v1016_v39  ;;  %v5061_v54 = vcombine.high %v1009_v48, %v1016_v39  ;;  %v1121_v55 = vcombine.low %v1025_v49, %v1032_v40  ;;  %v5062_v56 = vcombine.high %v1025_v49, %v1032_v40 }
 0x414   :  { %v1112_v57 = vrot.slane %v1105_v53, %v6255_v27  ;;  %v1120_v58 = vrot.slane %v5061_v54, %v6255_v27  ;;  %v1128_v59 = vrot.slane %v1121_v55, %v6255_v27  ;;  %v1136_v31 = vrot.slane %v5062_v56, %v6255_v27 }
 0x416   :  { %v1137_v61 = vcombine.low %v1112_v57, %v1120_v58  ;;  %v1153_v19 = vcombine.low %v1128_v59, %v1136_v31  ;;  %v1138_v20 = vcombine.high %v1112_v57, %v1120_v58  ;;  %v1154_v15 = vcombine.high %v1128_v59, %v1136_v31 }
 0x418   :  { %v1145_v62 = vrot.slane %v1137_v61, %v6266_v36  ;;  %v1161_v14 = vrot.slane %v1153_v19, %v6266_v36  ;;  %v1152_v63 = vrot.slane %v1138_v20, %v6266_v36  ;;  %v1168_v13 = vrot.slane %v1154_v15, %v6266_v36 }
 0x41a   :  { %955 = vrot.lane.b32.xlu1 %v6245_v17, %s5981_s28  ;;  %v1169_v1 = vcombine.low %v1145_v62, %v1161_v14  ;;  %v1170_v2 = vcombine.high %v1145_v62, %v1161_v14  ;;  %v1171_v11 = vcombine.low %v1152_v63, %v1168_v13  ;;  %v1172_v3 = vcombine.high %v1152_v63, %v1168_v13 }
 0x41b   :  { %v1665_v17 = vsub.f32 %v6432_v50, %v6462_v7  ;;  %v948_v50 = vpop.permute.xlu1 %947 }
 0x41c   :  { %v1241_v21 = vpack.c.bf16 %v1169_v1, %v1169_v1  ;;  %v1242_v30 = vpack.c.bf16 %v1170_v2, %v1170_v2  ;;  %v1244_v29 = vpack.c.bf16 %v1172_v3, %v1172_v3  ;;  %v1243_v34 = vpack.c.bf16 %v1171_v11, %v1171_v11 }
 0x41d   :  { %v1680_v6 = vmul.f32 1.442695, %v1665_v17 }
 0x41e   :  { %959 = vrot.lane.b32.xlu1 %v6247_v18, %s5981_s28  ;;  %v1735_v37 = vsel %vm1733_vm3, %v1241_v21, 0  ;;  %v1781_v4 = vsel %vm1733_vm3, %v1242_v30, 0  ;;  %v1664_v18 = vsub.f32 %v6434_v51, %v6458_v5  ;;  %v1873_v45 = vsel %vm1733_vm3, %v1244_v29, 0 }
 0x41f   :  { %5293 = vmatpush3.bf16.msra.mxu1 %v1735_v37  ;;  %5299 = vmatpush3.bf16.msra.mxu0 %v1781_v4  ;;  %5576 = vpow2.f32 %v1680_v6  ;;  %v1827_v46 = vsel %vm1733_vm3, %v1243_v34, 0 }
 0x420   :  { %5304 = vmatprep.subr.bf16.mxu1 %v5999_v0  ;;  %5310 = vmatprep.subr.bf16.mxu0 %v5999_v0  ;;  %v1678_v8 = vmul.f32 1.442695, %v1664_v18 }
 0x422   :  { %5578 = vpow2.f32 %v1678_v8 }
 0x427   :  { %951 = vrot.lane.b32.xlu0 %v6239_v16, %s5981_s28  ;;  %s6007_s28 = smov 16  }
 0x42c   :  { %v6508_v9 = vpop.eup %5576 }
 0x42d   :  { %v1703_v12 = vsel %vm1249_vm2, %v6508_v9, 0.0 }
 0x42f   :  { %v6512_v23 = vpop.eup %5578 }
 0x430   :  { %v1700_v16 = vsel %vm1249_vm2, %v6512_v23, 0.0 }
 0x442   :  { %1704 = vadd.xlane.f32.xlu1 %v1703_v12 }
 0x446   :  { %1701 = vadd.xlane.f32.xlu0 %v1700_v16 }
 0x486   :  { %v1687_v7 = vpop.xlane.xlu0 %1686 }
 0x487   :  { %5580 = vrcp.f32 %v1687_v7  ;;  %v1684_v24 = vpop.xlane.xlu1 %1683 }
 0x488   :  { %5582 = vrcp.f32 %v1684_v24 }
 0x48e   :  { %v1690_v51 = vpop.xlane.xlu0 %1689 }
 0x48f   :  { %5584 = vrcp.f32 %v1690_v51 }
 0x492   :  { %v1693_v5 = vpop.xlane.xlu1 %1692 }
 0x493   :  { %5586 = vrcp.f32 %v1693_v5 }
 0x494   :  { %v5581_v25 = vpop.eup %5580 }
 0x495   :  { %v5583_v26 = vpop.eup %5582  ;;  %v1715_v28 = vmul.f32 %v5581_v25, %v6450_v22 }
 0x496   :  { %v1714_v33 = vmul.f32 %v5583_v26, %v6452_v60  ;;  %v1696_v35 = vpop.xlane.xlu0 %1695  ;;  %v956_v44 = vpop.permute.xlu1 %955 }
 0x497   :  { %v1723_v38 = vpack.c.bf16 %v1715_v28, %v1715_v28  ;;  %v1037_v60 = vcombine.low %v948_v50, %v956_v44  ;;  %v1038_v39 = vcombine.high %v948_v50, %v956_v44  ;;  %5588 = vrcp.f32 %v1696_v35 }
 0x498   :  { %v1722_v42 = vpack.c.bf16 %v1714_v33, %v1714_v33 }
 0x499   :  { %5301 = vmatmul.mubr.msk.bf16.vlgmr.msra.gmra.mxu0 %vm1249_vm2, %v1723_v38  ;;  %v1045_v56 = vrot.slane %v1037_v60, %v6255_v27  ;;  %v1052_v58 = vrot.slane %v1038_v39, %v6255_v27 }
 0x49a   :  { %5295 = vmatmul.mubr.msk.bf16.vlgmr.msra.gmra.mxu1 %vm1249_vm2, %v1722_v42  ;;  %5311 = vmatpush3.bf16.msra.mxu0 %v1873_v45  ;;  %v1699_v47 = vpop.xlane.xlu0 %1698  ;;  %v960_v49 = vpop.permute.xlu1 %959 }
 0x49b   :  { %5305 = vmatpush3.bf16.msra.mxu1 %v1827_v46  ;;  %5306 = vmatprep.mubr.msk.bf16.mxu1 %vm6000_vm0, %v5999_v0  ;;  %5590 = vrcp.f32 %v1699_v47 }
 0x49c   :  { %v5585_v22 = vpop.eup %5584  ;;  %5312 = vmatprep.mubr.msk.bf16.mxu0 %vm6000_vm0, %v5999_v0  ;;  %5316 = vmatprep.subr.bf16.mxu1 %v5999_v0 }
 0x49d   :  { %v1716_v48 = vmul.f32 %v5585_v22, %v6460_v41  ;;  %5322 = vmatprep.subr.bf16.mxu0 %v5999_v0 }
 0x49e   :  { %v952_v40 = vpop.permute.xlu0 %951 }
 0x49f   :  { %v1724_v52 = vpack.c.bf16 %v1716_v48, %v1716_v48  ;;  %v1053_v54 = vcombine.low %v952_v40, %v960_v49  ;;  %v1054_v55 = vcombine.high %v952_v40, %v960_v49 }
 0x4a0   :  { %v5587_v53 = vpop.eup %5586 }
 0x4a1   :  { %v1717_v57 = vmul.f32 %v5587_v53, %v6466_v10  ;;  %v1061_v59 = vrot.slane %v1053_v54, %v6255_v27  ;;  %v1068_v41 = vrot.slane %v1054_v55, %v6255_v27 }
 0x4a2   :  { %5307 = vmatmul.mubr.msk.bf16.vlgmr.msra.gmra.mxu1 %vm1249_vm2, %v1724_v52 }
 0x4a3   :  { %v1725_v31 = vpack.c.bf16 %v1717_v57, %v1717_v57  ;;  %5318 = vmatprep.mubr.msk.bf16.mxu1 %vm6000_vm0, %v5999_v0  ;;  %v1069_v61 = vcombine.low %v1045_v56, %v1061_v59  ;;  %v1070_v19 = vcombine.high %v1045_v56, %v1061_v59  ;;  %v1085_v20 = vcombine.low %v1052_v58, %v1068_v41 }
 0x4a4   :  { %v1086_v15 = vcombine.high %v1052_v58, %v1068_v41  ;;  %v5589_v8 = vpop.eup %5588 }
 0x4a5   :  { %5313 = vmatmul.mubr.msk.bf16.vlgmr.msra.gmra.mxu0 %vm1249_vm2, %v1725_v31  ;;  %v1077_v10 = vrot.slane %v1069_v61, %v6266_v36  ;;  %v1084_v62 = vrot.slane %v1070_v19, %v6266_v36  ;;  %v1093_v14 = vrot.slane %v1085_v20, %v6266_v36  ;;  %v1718_v33 = vmul.f32 %v5589_v8, %v6470_v32 }
 0x4a6   :  { %v1100_v63 = vrot.slane %v1086_v15, %v6266_v36  ;;  %5324 = vmatprep.mubr.msk.bf16.mxu0 %vm6000_vm0, %v5999_v0 }
 0x4a7   :  { %v1173_v13 = vcombine.low %v1077_v10, %v1084_v62  ;;  %v5063_v1 = vcombine.high %v1077_v10, %v1084_v62  ;;  %v1726_v45 = vpack.c.bf16 %v1718_v33, %v1718_v33 }
 0x4a8   :  { %v1189_v2 = vcombine.low %v1093_v14, %v1100_v63  ;;  %v5064_v11 = vcombine.high %v1093_v14, %v1100_v63  ;;  %v5591_v24 = vpop.eup %5590 }
 0x4a9   :  { %v1180_v3 = vrot.slane %v1173_v13, %v6255_v27  ;;  %v1188_v21 = vrot.slane %v5063_v1, %v6255_v27  ;;  %v1719_v34 = vmul.f32 %v5591_v24, %v6478_v43 }
 0x4aa   :  { %v1196_v30 = vrot.slane %v1189_v2, %v6255_v27  ;;  %v1204_v37 = vrot.slane %v5064_v11, %v6255_v27 }
 0x4ab   :  { %v1205_v4 = vcombine.low %v1180_v3, %v1188_v21  ;;  %v1206_v6 = vcombine.high %v1180_v3, %v1188_v21  ;;  %v1727_v46 = vpack.c.bf16 %v1719_v34, %v1719_v34 }
 0x4ac   :  { %v1221_v17 = vcombine.low %v1196_v30, %v1204_v37  ;;  %v1222_v18 = vcombine.high %v1196_v30, %v1204_v37 }
 0x4ad   :  { %v1213_v12 = vrot.slane %v1205_v4, %v6266_v36  ;;  %v1220_v50 = vrot.slane %v1206_v6, %v6266_v36 }
 0x4ae   :  { %v1229_v16 = vrot.slane %v1221_v17, %v6266_v36  ;;  %v1236_v7 = vrot.slane %v1222_v18, %v6266_v36 }
 0x4b0   :  { %v1237_v51 = vcombine.low %v1213_v12, %v1229_v16  ;;  %v1238_v5 = vcombine.high %v1213_v12, %v1229_v16  ;;  %v1239_v25 = vcombine.low %v1220_v50, %v1236_v7  ;;  %v1240_v26 = vcombine.high %v1220_v50, %v1236_v7 }
 0x4b2   :  { %v1245_v28 = vpack.c.bf16 %v1237_v51, %v1237_v51  ;;  %v1246_v29 = vpack.c.bf16 %v1238_v5, %v1238_v5  ;;  %v1247_v42 = vpack.c.bf16 %v1239_v25, %v1239_v25  ;;  %v1248_v44 = vpack.c.bf16 %v1240_v26, %v1240_v26 }
 0x4b4   :  { %v1919_v35 = vsel %vm1733_vm3, %v1245_v28, 0  ;;  %v1965_v38 = vsel %vm1733_vm3, %v1246_v29, 0  ;;  %v2011_v32 = vsel %vm1733_vm3, %v1247_v42, 0  ;;  %v2057_v43 = vsel %vm1733_vm3, %v1248_v44, 0 }
 0x4b5   :  { %5317 = vmatpush3.bf16.msra.mxu1 %v1919_v35  ;;  %5323 = vmatpush3.bf16.msra.mxu0 %v1965_v38 }
 0x4b6   :  { %5328 = vmatprep.subr.bf16.mxu1 %v5999_v0  ;;  %5334 = vmatprep.subr.bf16.mxu0 %v5999_v0 }
 0x4b8   :  { %5319 = vmatmul.mubr.msk.bf16.vlgmr.msra.gmra.mxu1 %vm1249_vm2, %v1726_v45  ;;  %5325 = vmatmul.mubr.msk.bf16.vlgmr.msra.gmra.mxu0 %vm1249_vm2, %v1727_v46 }
 0x4b9   :  { %5329 = vmatpush3.bf16.msra.mxu1 %v2011_v32  ;;  %5335 = vmatpush3.bf16.msra.mxu0 %v2057_v43 }
 0x4ba   :  { %5336 = vmatprep.mubr.msk.bf16.mxu0 %vm6000_vm0, %v5999_v0  ;;  %5330 = vmatprep.mubr.msk.bf16.mxu1 %vm6000_vm0, %v5999_v0 }
 0x4bb   :  { %5340 = vmatprep.subr.bf16.mxu1 %v5999_v0  ;;  %5348 = vmatprep.subr.bf16.mxu0 %v5999_v0 }
 0x4cb   :  { %v1705_v47 = vpop.xlane.xlu1 %1704 }
 0x4cc   :  { %5592 = vrcp.f32 %v1705_v47 }
 0x4cf   :  { %v1702_v22 = vpop.xlane.xlu0 %1701 }
 0x4d0   :  { %5594 = vrcp.f32 %v1702_v22 }
 0x4d9   :  { %v5593_v60 = vpop.eup %5592 }
 0x4da   :  { %v1721_v48 = vmul.f32 %v5593_v60, %v6508_v9 }
 0x4dc   :  { %v1729_v39 = vpack.c.bf16 %v1721_v48, %v1721_v48 }
 0x4dd   :  { %v5595_v49 = vpop.eup %5594 }
 0x4de   :  { %5337 = vmatmul.mubr.msk.bf16.vlgmr.msra.gmra.mxu0 %vm1249_vm2, %v1729_v39  ;;  %v1720_v40 = vmul.f32 %v5595_v49, %v6512_v23 }
 0x4df   :  { %5352 = vmatprep.mubr.msk.bf16.mxu0 %vm6000_vm0, %v5999_v0 }
 0x4e0   :  { %v1728_v52 = vpack.c.bf16 %v1720_v40, %v1720_v40 }
 0x4e2   :  { %5331 = vmatmul.mubr.msk.bf16.vlgmr.msra.gmra.mxu1 %vm1249_vm2, %v1728_v52 }
 0x4e3   :  { %5344 = vmatprep.mubr.msk.bf16.mxu1 %vm6000_vm0, %v5999_v0 }
 0x559   :  { %v1817_v53 = vpop.f32.mrf.mxu0 }
 0x55a   :  { %v1771_v54 = vpop.f32.mrf.mxu1 }
 0x55b   :  { %v5302_v55 = vpop.f32.mrf.mxu0 }
 0x55c   :  { %v5296_v56 = vpop.f32.mrf.mxu1 }
 0x55d   :  { %v1820_v9 = vpop.f32.mrf.mxu0 }
 0x55e   :  { %v1774_v57 = vpop.f32.mrf.mxu1 }
 0x55f   :  { %v5303_v58 = vpop.f32.mrf.mxu0 }
 0x560   :  { %v5297_v59 = vpop.f32.mrf.mxu1 }
 0x562   :  { %v1863_v41 = vpop.f32.mrf.mxu1 }
 0x563   :  { %v2099_v31 = vcombine.low %v1771_v54, %v1863_v41  ;;  %v2100_v23 = vcombine.high %v1771_v54, %v1863_v41 }
 0x564   :  { %v5308_v61 = vpop.f32.mrf.mxu1 }
 0x565   :  { %v1909_v19 = vpop.f32.mrf.mxu0  ;;  %v2107_v14 = vrot.slane %v2099_v31, %v6255_v27  ;;  %v2114_v63 = vrot.slane %v2100_v23, %v6255_v27 }
 0x566   :  { %v1866_v20 = vpop.f32.mrf.mxu1  ;;  %v2115_v15 = vcombine.low %v1817_v53, %v1909_v19  ;;  %v2116_v10 = vcombine.high %v1817_v53, %v1909_v19 }
 0x567   :  { %v5314_v62 = vpop.f32.mrf.mxu0 }
 0x568   :  { %v2123_v13 = vrot.slane %v2115_v15, %v6255_v27  ;;  %v2130_v1 = vrot.slane %v2116_v10, %v6255_v27  ;;  %v5309_v2 = vpop.f32.mrf.mxu1 }
 0x569   :  { %v1912_v11 = vpop.f32.mrf.mxu0 }
 0x56a   :  { %v2131_v3 = vcombine.low %v2107_v14, %v2123_v13  ;;  %v2132_v21 = vcombine.high %v2107_v14, %v2123_v13  ;;  %v2147_v30 = vcombine.low %v2114_v63, %v2130_v1  ;;  %v2148_v37 = vcombine.high %v2114_v63, %v2130_v1 }
 0x56b   :  { %v5315_v4 = vpop.f32.mrf.mxu0 }
 0x56c   :  { %v2139_v17 = vrot.slane %v2131_v3, %v6266_v36  ;;  %v2146_v6 = vrot.slane %v2132_v21, %v6266_v36  ;;  %v2155_v18 = vrot.slane %v2147_v30, %v6266_v36  ;;  %v2162_v8 = vrot.slane %v2148_v37, %v6266_v36  ;;  %v5550_v4 = vld [vmem:[#allocation8 + $0x8] sm:$0xff]  }
 0x56d   :  { %5341 = vmatpush3.bf16.msra.mxu1 %v5550_v4 }
 0x56e   :  { %v2235_v12 = vcombine.low %v2139_v17, %v2146_v6  ;;  %v5081_v16 = vcombine.high %v2139_v17, %v2146_v6  ;;  %v2251_v50 = vcombine.low %v2155_v18, %v2162_v8  ;;  %v5082_v7 = vcombine.high %v2155_v18, %v2162_v8  ;;  %5342 = vmatprep.subr.bf16.mxu1 %v5999_v0 }
 0x570   :  { %v2242_v24 = vrot.slane %v2235_v12, %v6255_v27  ;;  %v2250_v51 = vrot.slane %v5081_v16, %v6255_v27  ;;  %v2258_v5 = vrot.slane %v2251_v50, %v6255_v27  ;;  %v2266_v25 = vrot.slane %v5082_v7, %v6255_v27 }
 0x572   :  { %v2268_v26 = vcombine.high %v2242_v24, %v2250_v51  ;;  %v2284_v28 = vcombine.high %v2258_v5, %v2266_v25  ;;  %v2267_v29 = vcombine.low %v2242_v24, %v2250_v51  ;;  %v2283_v33 = vcombine.low %v2258_v5, %v2266_v25  ;;  %v5551_v24 = vld [vmem:[#allocation8] sm:$0xff]  }
 0x573   :  { %5343 = vmatpush3.bf16.msra.mxu1 %v5551_v24 }
 0x574   :  { %v6589_v34 = vrot.slane %v2268_v26, %v6266_v36  ;;  %v6592_v35 = vrot.slane %v2284_v28, %v6266_v36  ;;  %v6595_v38 = vrot.slane %v2267_v29, %v6266_v36  ;;  %v6598_v42 = vrot.slane %v2283_v33, %v6266_v36  ;;  %5356 = vmatprep.subr.bf16.mxu1 %v5999_v0 }
 0x576   :  { %v2301_v44 = vcombine.low %v6589_v34, %v6592_v35  ;;  %v2299_v45 = vcombine.low %v6595_v38, %v6598_v42  ;;  %v2300_v46 = vcombine.high %v6595_v38, %v6598_v42  ;;  %v2302_v32 = vcombine.high %v6589_v34, %v6592_v35  ;;  %v5085_v38 = vld [vmem:[#allocation10] ss:$0 sm:$0xff] }
 0x578   :  { %v1955_v43 = vpop.f32.mrf.mxu1  ;;  %v2001_v47 = vpop.f32.mrf.mxu0 }
 0x57a   :  { %v5320_v22 = vpop.f32.mrf.mxu1  ;;  %v5326_v60 = vpop.f32.mrf.mxu0 }
 0x57c   :  { %v1958_v48 = vpop.f32.mrf.mxu1  ;;  %v2004_v39 = vpop.f32.mrf.mxu0 }
 0x57e   :  { %v5321_v49 = vpop.f32.mrf.mxu1  ;;  %v5327_v40 = vpop.f32.mrf.mxu0 }
 0x59e   :  { %v2093_v52 = vpop.f32.mrf.mxu0 }
 0x59f   :  { %v2183_v54 = vcombine.low %v2001_v47, %v2093_v52  ;;  %v2184_v55 = vcombine.high %v2001_v47, %v2093_v52 }
 0x5a0   :  { %v5338_v53 = vpop.f32.mrf.mxu0 }
 0x5a1   :  { %v2191_v31 = vrot.slane %v2183_v54, %v6255_v27  ;;  %v2198_v23 = vrot.slane %v2184_v55, %v6255_v27 }
 0x5a2   :  { %v2096_v56 = vpop.f32.mrf.mxu0  ;;  %v2047_v9 = vpop.f32.mrf.mxu1 }
 0x5a3   :  { %v2167_v57 = vcombine.low %v1955_v43, %v2047_v9  ;;  %v2168_v58 = vcombine.high %v1955_v43, %v2047_v9 }
 0x5a4   :  { %v5339_v59 = vpop.f32.mrf.mxu0  ;;  %v5332_v41 = vpop.f32.mrf.mxu1 }
 0x5a5   :  { %v2175_v61 = vrot.slane %v2167_v57, %v6255_v27  ;;  %v2182_v19 = vrot.slane %v2168_v58, %v6255_v27  ;;  %v5640_v59 = vld [vmem:[%s7161_s6] sm:$0xff] }
 0x5a6   :  { %v2050_v20 = vpop.f32.mrf.mxu1 }
 0x5a7   :  { %v2199_v15 = vcombine.low %v2175_v61, %v2191_v31  ;;  %v2200_v10 = vcombine.high %v2175_v61, %v2191_v31  ;;  %v2215_v62 = vcombine.low %v2182_v19, %v2198_v23  ;;  %v2216_v14 = vcombine.high %v2182_v19, %v2198_v23  ;;  %v5641_v20 = vld [vmem:[%s7161_s6 + $0x8] sm:$0xff] }
 0x5a8   :  { %v5333_v63 = vpop.f32.mrf.mxu1 }
 0x5a9   :  { %v2207_v13 = vrot.slane %v2199_v15, %v6266_v36  ;;  %v2214_v1 = vrot.slane %v2200_v10, %v6266_v36  ;;  %v2223_v2 = vrot.slane %v2215_v62, %v6266_v36  ;;  %v2230_v11 = vrot.slane %v2216_v14, %v6266_v36  ;;  %v5552_v62 = vld [vmem:[%s7127_s10 + $0x8] sm:$0xff]   ;;  %v5553_v14 = vld [vmem:[%s7127_s10] sm:$0xff]  }
 0x5aa   :  { %5349 = vmatpush3.bf16.msra.mxu0 %v5552_v62  ;;  %v266_v63 = vld [vmem:[%s7163_s11] sm:$0xff] }
 0x5ab   :  { %v2303_v3 = vcombine.low %v2207_v13, %v2214_v1  ;;  %v5083_v21 = vcombine.high %v2207_v13, %v2214_v1  ;;  %v2319_v30 = vcombine.low %v2223_v2, %v2230_v11  ;;  %v5084_v37 = vcombine.high %v2223_v2, %v2230_v11  ;;  %v267_v13 = vld [vmem:[%s7163_s11 + $0x8] sm:$0xff]  ;;  %5350 = vmatprep.subr.bf16.mxu0 %v5999_v0 }
 0x5ac   :  { %v2518_v1 = vpack.c.bf16 %v267_v13, %v266_v63 }
 0x5ad   :  { %v2310_v17 = vrot.slane %v2303_v3, %v6255_v27  ;;  %v2318_v6 = vrot.slane %v5083_v21, %v6255_v27  ;;  %v2326_v18 = vrot.slane %v2319_v30, %v6255_v27  ;;  %v2334_v8 = vrot.slane %v5084_v37, %v6255_v27 }
 0x5ae   :  { %5351 = vmatpush3.bf16.msra.mxu0 %v5553_v14 }
 0x5af   :  { %v2336_v12 = vcombine.high %v2310_v17, %v2318_v6  ;;  %v2352_v16 = vcombine.high %v2326_v18, %v2334_v8  ;;  %v2335_v50 = vcombine.low %v2310_v17, %v2318_v6  ;;  %v2351_v7 = vcombine.low %v2326_v18, %v2334_v8  ;;  %5364 = vmatprep.subr.bf16.mxu0 %v5999_v0  ;;  %v5554_v8 = vld [vmem:[#allocation16 + $0x8] sm:$0xff]  }
 0x5b1   :  { %v2350_v51 = vrot.slane %v2336_v12, %v6266_v36  ;;  %v2366_v5 = vrot.slane %v2352_v16, %v6266_v36  ;;  %v2343_v25 = vrot.slane %v2335_v50, %v6266_v36  ;;  %v2359_v26 = vrot.slane %v2351_v7, %v6266_v36  ;;  %5353 = vmatmul.mubr.msk.bf16.vlgmr.msra.gmra.mxu0 %vm296_vm1, %v2518_v1  ;;  %v5555_v12 = vld [vmem:[#allocation16] sm:$0xff]   ;;  %v5091_v16 = vld [vmem:[#allocation14] ss:$0 sm:$0xff] }
 0x5b2   :  { %5366 = vmatprep.mubr.msk.bf16.mxu0 %vm6000_vm0, %v5999_v0 }
 0x5b3   :  { %v2369_v28 = vcombine.low %v2350_v51, %v2366_v5  ;;  %v2368_v29 = vcombine.high %v2343_v25, %v2359_v26  ;;  %v2367_v33 = vcombine.low %v2343_v25, %v2359_v26  ;;  %v2370_v22 = vcombine.high %v2350_v51, %v2366_v5 }
 0x5b5   :  { %v5523_v43 = vpack.i.bf16 %v2369_v28, %v2301_v44  ;;  %v5518_v47 = vpack.i.bf16 %v2368_v29, %v2300_v46  ;;  %v5528_v60 = vpack.i.bf16 %v2370_v22, %v2302_v32 }
 0x5b7   :  { %5524 = vrot.lane.b32.xlu1 %v5523_v43, %s6007_s28  ;;  %5519 = vrot.lane.b32.xlu0 %v5518_v47, %s5991_s2 }
 0x5bb   :  { %5529 = vrot.lane.b32.xlu0 %v5528_v60, %s6008_s7 }
 0x629   :  { %v5525_v48 = vpop.permute.xlu1 %5524  ;;  %v5520_v39 = vpop.permute.xlu0 %5519 }
 0x62a   :  { %v5522_v49 = vunpack.i.h.bf16 %v5520_v39  ;;  %v5521_v40 = vunpack.i.l.bf16 %v5520_v39  ;;  %v5527_v52 = vunpack.i.h.bf16 %v5525_v48  ;;  %v5526_v44 = vunpack.i.l.bf16 %v5525_v48  ;;  %v5089_v48 = vld [vmem:[#allocation11] ss:$0 sm:$0xff] }
 0x62c   :  { %v2395_v46 = vsel %vm1249_vm2, %v2299_v45, %v5521_v40  ;;  %v2396_v53 = vsel %vm1249_vm2, %v2367_v33, %v5522_v49 }
 0x62d   :  { %v5530_v34 = vpop.permute.xlu0 %5529  ;;  %v2398_v54 = vsel %vm2397_vm4, %v2395_v46, %v5526_v44  ;;  %v2399_v55 = vsel %vm2397_vm4, %v2396_v53, %v5527_v52  ;;  %v5090_v52 = vld [vmem:[#allocation13] ss:$0 sm:$0xff] }
 0x62e   :  { %v5532_v35 = vunpack.i.h.bf16 %v5530_v34  ;;  %v5531_v32 = vunpack.i.l.bf16 %v5530_v34 }
 0x630   :  { %v2401_v56 = vsel %vm2400_vm5, %v2398_v54, %v5531_v32  ;;  %v2402_v9 = vsel %vm2400_vm5, %v2399_v55, %v5532_v35 }
 0x631   :  { %v2403_v57 = vpack.c.bf16 %v2402_v9, %v2401_v56 }
 0x633   :  { %5345 = vmatmul.mubr.msk.bf16.vlgmr.msra.gmra.mxu1 %vm296_vm1, %v2403_v57 }
 0x634   :  { %5360 = vmatprep.mubr.msk.bf16.mxu1 %vm6000_vm0, %v5999_v0  ;;  %5357 = vmatpush3.bf16.msra.mxu1 %v5554_v8 }
 0x635   :  { %5358 = vmatprep.subr.bf16.mxu1 %v5999_v0 }
 0x638   :  { %5359 = vmatpush3.bf16.msra.mxu1 %v5555_v12 }
 0x639   :  { %5370 = vmatprep.subr.bf16.mxu1 %v5999_v0 }
 0x671   :  { %v2579_v50 = vpop.f32.mrf.mxu0 }
 0x672   :  { %v6673_v7 = vadd.f32 %v5091_v16, %v2579_v50 }
 0x673   :  { %v5354_v24 = vpop.f32.mrf.mxu0 }
 0x675   :  { %v2582_v51 = vpop.f32.mrf.mxu0 }
 0x676   :  { %v6679_v5 = vadd.f32 %v5091_v16, %v2582_v51 }
 0x677   :  { %v5355_v25 = vpop.f32.mrf.mxu0 }
 0x6f3   :  { %v2464_v42 = vpop.f32.mrf.mxu1 }
 0x6f4   :  { %v2465_v45 = vadd.f32 %v5085_v38, %v2464_v42 }
 0x6f5   :  { %v5346_v58 = vpop.f32.mrf.mxu1 }
 0x6f6   :  { %v2471_v41 = vadd.f32 %v5640_v59, %v2465_v45 }
 0x6f7   :  { %v2467_v31 = vpop.f32.mrf.mxu1 }
 0x6f8   :  { %v2468_v23 = vadd.f32 %v5085_v38, %v2467_v31  ;;  %v2475_v61 = vsel %vm296_vm1, %v2471_v41, 0.0 }
 0x6f9   :  { %2476 = vadd.xlane.f32.xlu1 %v2475_v61  ;;  %v5347_v19 = vpop.f32.mrf.mxu1 }
 0x6fa   :  { %v2472_v15 = vadd.f32 %v5641_v20, %v2468_v23 }
 0x6fc   :  { %v2478_v10 = vsel %vm296_vm1, %v2472_v15, 0.0 }
 0x6fd   :  { %2479 = vadd.xlane.f32.xlu0 %v2478_v10 }
 0x782   :  { %v2477_v2 = vpop.xlane.xlu1 %2476 }
 0x783   :  { %v2482_v11 = vmul.f32 0.03125, %v2477_v2 }
 0x785   :  { %v2484_v3 = vsub.f32 %v2471_v41, %v2482_v11 }
 0x786   :  { %v2480_v21 = vpop.xlane.xlu0 %2479 }
 0x787   :  { %v2483_v30 = vmul.f32 0.03125, %v2480_v21  ;;  %v2486_v37 = vmul.f32 %v2484_v3, %v2484_v3 }
 0x789   :  { %v2485_v4 = vsub.f32 %v2472_v15, %v2483_v30  ;;  %v2488_v17 = vsel %vm296_vm1, %v2486_v37, 0.0 }
 0x78a   :  { %2489 = vadd.xlane.f32.xlu0 %v2488_v17 }
 0x78b   :  { %v2487_v6 = vmul.f32 %v2485_v4, %v2485_v4 }
 0x78d   :  { %v2491_v18 = vsel %vm296_vm1, %v2487_v6, 0.0 }
 0x78e   :  { %2492 = vadd.xlane.f32.xlu1 %v2491_v18 }
 0x79f   :  { %2662 = vrot.lane.b32.xlu1 %v6673_v7, %s6003_s26 }
 0x7a0   :  { %2656 = vrot.lane.b32.xlu0 %v6673_v7, %s6002_s5 }
 0x7a3   :  { %2668 = vrot.lane.b32.xlu1 %v6673_v7, %s6001_s24 }
 0x813   :  { %v2490_v26 = vpop.xlane.xlu0 %2489 }
 0x814   :  { %v2494_v28 = vmul.f32 0.03125, %v2490_v26 }
 0x816   :  { %v2496_v29 = vadd.f32 1e-05, %v2494_v28  ;;  %v5095_v28 = vld [vmem:[#allocation17] ss:$0 sm:$0xff] }
 0x817   :  { %v2493_v33 = vpop.xlane.xlu1 %2492  ;;  %v2657_v54 = vpop.permute.xlu0 %2656 }
 0x818   :  { %5596 = vrsqrt.f32 %v2496_v29  ;;  %v2495_v43 = vmul.f32 0.03125, %v2493_v33 }
 0x81a   :  { %v2497_v47 = vadd.f32 1e-05, %v2495_v43 }
 0x81b   :  { %v6692_v35 = vpop.permute.xlu1 %2662 }
 0x81c   :  { %5598 = vrsqrt.f32 %v2497_v47  ;;  %v2674_v55 = vcombine.low %v6673_v7, %v6692_v35  ;;  %v2675_v56 = vcombine.high %v6673_v7, %v6692_v35 }
 0x81e   :  { %v2682_v38 = vrot.slane %v2674_v55, %v6255_v27  ;;  %v2689_v42 = vrot.slane %v2675_v56, %v6255_v27 }
 0x81f   :  { %v6694_v32 = vpop.permute.xlu1 %2668 }
 0x820   :  { %v2690_v9 = vcombine.low %v2657_v54, %v6694_v32  ;;  %v2691_v57 = vcombine.high %v2657_v54, %v6694_v32 }
 0x822   :  { %v2698_v45 = vrot.slane %v2690_v9, %v6255_v27  ;;  %v2705_v58 = vrot.slane %v2691_v57, %v6255_v27 }
 0x824   :  { %v2706_v59 = vcombine.low %v2682_v38, %v2698_v45  ;;  %v2707_v41 = vcombine.high %v2682_v38, %v2698_v45  ;;  %v2722_v31 = vcombine.low %v2689_v42, %v2705_v58  ;;  %v2723_v23 = vcombine.high %v2689_v42, %v2705_v58 }
 0x825   :  { %v5597_v22 = vpop.eup %5596 }
 0x826   :  { %v2500_v60 = vmul.f32 %v5597_v22, %v2484_v3  ;;  %v2714_v61 = vrot.slane %v2706_v59, %v6266_v36  ;;  %v2721_v19 = vrot.slane %v2707_v41, %v6266_v36  ;;  %v2730_v20 = vrot.slane %v2722_v31, %v6266_v36 }
 0x827   :  { %v2737_v15 = vrot.slane %v2723_v23, %v6266_v36 }
 0x828   :  { %v2508_v40 = vmul.f32 %v5089_v48, %v2500_v60  ;;  %v2810_v10 = vcombine.low %v2714_v61, %v2721_v19  ;;  %v5099_v62 = vcombine.high %v2714_v61, %v2721_v19 }
 0x829   :  { %v5599_v39 = vpop.eup %5598  ;;  %v2826_v14 = vcombine.low %v2730_v20, %v2737_v15  ;;  %v5100_v63 = vcombine.high %v2730_v20, %v2737_v15 }
 0x82a   :  { %v2501_v49 = vmul.f32 %v5599_v39, %v2485_v4  ;;  %v6683_v46 = vadd.f32 %v5090_v52, %v2508_v40  ;;  %v2817_v13 = vrot.slane %v2810_v10, %v6255_v27  ;;  %v2825_v1 = vrot.slane %v5099_v62, %v6255_v27 }
 0x82b   :  { %v2833_v2 = vrot.slane %v2826_v14, %v6255_v27  ;;  %v2841_v11 = vrot.slane %v5100_v63, %v6255_v27 }
 0x82c   :  { %v2509_v44 = vmul.f32 %v5089_v48, %v2501_v49  ;;  %v2842_v3 = vcombine.low %v2817_v13, %v2825_v1  ;;  %v2843_v6 = vcombine.high %v2817_v13, %v2825_v1 }
 0x82d   :  { %v2858_v21 = vcombine.low %v2833_v2, %v2841_v11  ;;  %v2859_v18 = vcombine.high %v2833_v2, %v2841_v11 }
 0x82e   :  { %v6685_v53 = vadd.f32 %v5090_v52, %v2509_v44  ;;  %v2850_v30 = vrot.slane %v2842_v3, %v6266_v36  ;;  %v2857_v16 = vrot.slane %v2843_v6, %v6266_v36 }
 0x82f   :  { %v2866_v37 = vrot.slane %v2858_v21, %v6266_v36  ;;  %v2873_v50 = vrot.slane %v2859_v18, %v6266_v36 }
 0x830   :  { %v2586_v34 = vpack.c.bf16 %v6685_v53, %v6683_v46 }
 0x831   :  { %v2874_v4 = vcombine.low %v2850_v30, %v2866_v37  ;;  %v2875_v17 = vcombine.high %v2850_v30, %v2866_v37  ;;  %v6720_v25 = vcombine.low %v2857_v16, %v2873_v50  ;;  %v6722_v26 = vcombine.high %v2857_v16, %v2873_v50 }
 0x832   :  { %5361 = vmatmul.mubr.msk.bf16.vlgmr.msra.gmra.mxu1 %vm296_vm1, %v2586_v34 }
 0x833   :  { %5372 = vmatprep.mubr.msk.bf16.mxu1 %vm6000_vm0, %v5999_v0  ;;  %v2946_v8 = vpack.c.bf16 %v2874_v4, %v2874_v4  ;;  %v2947_v12 = vpack.c.bf16 %v2875_v17, %v2875_v17  ;;  %v2948_v57 = vpack.c.bf16 %v6720_v25, %v6720_v25  ;;  %v2949_v50 = vpack.c.bf16 %v6722_v26, %v6722_v26 }
 0x835   :  { %v3562_v24 = vsel %vm1249_vm2, %v2946_v8, 0  ;;  %v3608_v51 = vsel %vm1249_vm2, %v2947_v12, 0 }
 0x836   :  { %5365 = vmatpush3.bf16.xpose.msra.mxu0 %v3562_v24  ;;  %5371 = vmatpush3.bf16.xpose.msra.mxu1 %v3608_v51 }
 0x837   :  { %5376 = vmatprep.subr.bf16.mxu0 %v5999_v0  ;;  %5382 = vmatprep.subr.bf16.mxu1 %v5999_v0 }
 0x8f2   :  { %v2647_v29 = vpop.f32.mrf.mxu1 }
 0x8f3   :  { %v2648_v33 = vadd.f32 %v5095_v28, %v2647_v29 }
 0x8f4   :  { %v5362_v43 = vpop.f32.mrf.mxu1 }
 0x8f5   :  { %3266 = vrot.lane.b32.xlu1 %v2648_v33, %s6003_s26  ;;  %3260 = vrot.lane.b32.xlu0 %v2648_v33, %s6002_s5 }
 0x8f6   :  { %v2650_v47 = vpop.f32.mrf.mxu1 }
 0x8f7   :  { %v6735_v60 = vadd.f32 %v5095_v28, %v2650_v47  ;;  %v3654_v28 = vsel %vm1249_vm2, %v2948_v57, 0 }
 0x8f8   :  { %v5363_v22 = vpop.f32.mrf.mxu1 }
 0x8f9   :  { %2658 = vrot.lane.b32.xlu1 %v6679_v5, %s6002_s5  ;;  %3272 = vrot.lane.b32.xlu0 %v2648_v33, %s6001_s24 }
 0x8fd   :  { %2670 = vrot.lane.b32.xlu1 %v6679_v5, %s6001_s24  ;;  %2664 = vrot.lane.b32.xlu0 %v6679_v5, %s6003_s26 }
 0x901   :  { %3268 = vrot.lane.b32.xlu1 %v6735_v60, %s6003_s26  ;;  %3262 = vrot.lane.b32.xlu0 %v6735_v60, %s6002_s5 }
 0x905   :  { %2958 = vrot.lane.b32.xlu1 %v2657_v54, %s6004_s25  ;;  %3274 = vrot.lane.b32.xlu0 %v6735_v60, %s6001_s24 }
 0x909   :  { %2962 = vrot.lane.b32.xlu1 %v6692_v35, %s6004_s25  ;;  %2954 = vrot.lane.b32.xlu0 %v6673_v7, %s6004_s25 }
 0x90d   :  { %2966 = vrot.lane.b32.xlu0 %v6694_v32, %s6004_s25 }
 0x967   :  { %v3267_v48 = vpop.permute.xlu1 %3266  ;;  %v3261_v39 = vpop.permute.xlu0 %3260 }
 0x968   :  { %v3278_v49 = vcombine.low %v2648_v33, %v3267_v48  ;;  %v3279_v40 = vcombine.high %v2648_v33, %v3267_v48 }
 0x96a   :  { %v3286_v55 = vrot.slane %v3278_v49, %v6255_v27  ;;  %v3293_v56 = vrot.slane %v3279_v40, %v6255_v27 }
 0x96b   :  { %v6750_v52 = vpop.permute.xlu1 %2658  ;;  %v3273_v44 = vpop.permute.xlu0 %3272 }
 0x96c   :  { %v3294_v34 = vcombine.low %v3261_v39, %v3273_v44  ;;  %v3295_v54 = vcombine.high %v3261_v39, %v3273_v44 }
 0x96e   :  { %v3302_v35 = vrot.slane %v3294_v34, %v6255_v27  ;;  %v3309_v7 = vrot.slane %v3295_v54, %v6255_v27 }
 0x96f   :  { %v6756_v9 = vpop.permute.xlu1 %2670  ;;  %v6758_v32 = vpop.permute.xlu0 %2664 }
 0x970   :  { %v3310_v38 = vcombine.low %v3286_v55, %v3302_v35  ;;  %v3311_v42 = vcombine.high %v3286_v55, %v3302_v35  ;;  %v3326_v45 = vcombine.low %v3293_v56, %v3309_v7  ;;  %v3327_v58 = vcombine.high %v3293_v56, %v3309_v7 }
 0x971   :  { %v2758_v59 = vcombine.low %v6750_v52, %v6756_v9  ;;  %v2759_v41 = vcombine.high %v6750_v52, %v6756_v9  ;;  %v2742_v31 = vcombine.low %v6679_v5, %v6758_v32  ;;  %v2743_v23 = vcombine.high %v6679_v5, %v6758_v32 }
 0x972   :  { %v3318_v61 = vrot.slane %v3310_v38, %v6266_v36  ;;  %v3325_v19 = vrot.slane %v3311_v42, %v6266_v36  ;;  %v3334_v20 = vrot.slane %v3326_v45, %v6266_v36  ;;  %v3341_v15 = vrot.slane %v3327_v58, %v6266_v36 }
 0x973   :  { %v2766_v10 = vrot.slane %v2758_v59, %v6255_v27  ;;  %v2773_v62 = vrot.slane %v2759_v41, %v6255_v27  ;;  %v2750_v14 = vrot.slane %v2742_v31, %v6255_v27  ;;  %v2757_v63 = vrot.slane %v2743_v23, %v6255_v27  ;;  %v3269_v13 = vpop.permute.xlu1 %3268  ;;  %v3263_v1 = vpop.permute.xlu0 %3262 }
 0x974   :  { %v3414_v2 = vcombine.low %v3318_v61, %v3325_v19  ;;  %v5107_v11 = vcombine.high %v3318_v61, %v3325_v19  ;;  %v3430_v3 = vcombine.low %v3334_v20, %v3341_v15  ;;  %v5108_v21 = vcombine.high %v3334_v20, %v3341_v15 }
 0x975   :  { %v2774_v30 = vcombine.low %v2750_v14, %v2766_v10  ;;  %v2775_v37 = vcombine.high %v2750_v14, %v2766_v10  ;;  %v2790_v8 = vcombine.low %v2757_v63, %v2773_v62  ;;  %v2791_v47 = vcombine.high %v2757_v63, %v2773_v62 }
 0x976   :  { %v3421_v4 = vrot.slane %v3414_v2, %v6255_v27  ;;  %v3429_v17 = vrot.slane %v5107_v11, %v6255_v27  ;;  %v3437_v6 = vrot.slane %v3430_v3, %v6255_v27  ;;  %v3445_v18 = vrot.slane %v5108_v21, %v6255_v27 }
 0x977   :  { %v2959_v12 = vpop.permute.xlu1 %2958  ;;  %v3275_v16 = vpop.permute.xlu0 %3274  ;;  %v6786_v33 = vrot.slane %v2774_v30, %v6266_v36  ;;  %v6789_v43 = vrot.slane %v2775_v37, %v6266_v36  ;;  %v3346_v22 = vcombine.low %v6735_v60, %v3269_v13  ;;  %v3347_v48 = vcombine.high %v6735_v60, %v3269_v13 }
 0x978   :  { %v3446_v24 = vcombine.low %v3421_v4, %v3429_v17  ;;  %v3447_v51 = vcombine.high %v3421_v4, %v3429_v17  ;;  %v3462_v25 = vcombine.low %v3437_v6, %v3445_v18  ;;  %v3463_v29 = vcombine.high %v3437_v6, %v3445_v18 }
 0x979   :  { %v3362_v39 = vcombine.low %v3263_v1, %v3275_v16  ;;  %v3363_v49 = vcombine.high %v3263_v1, %v3275_v16  ;;  %v6794_v26 = vrot.slane %v2790_v8, %v6266_v36  ;;  %v3354_v56 = vrot.slane %v3346_v22, %v6255_v27 }
 0x97a   :  { %v3454_v34 = vrot.slane %v3446_v24, %v6266_v36  ;;  %v3470_v54 = vrot.slane %v3462_v25, %v6266_v36  ;;  %v3461_v55 = vrot.slane %v3447_v51, %v6266_v36  ;;  %v3361_v35 = vrot.slane %v3347_v48, %v6255_v27 }
 0x97b   :  { %v2963_v40 = vpop.permute.xlu1 %2962  ;;  %v2955_v44 = vpop.permute.xlu0 %2954  ;;  %v3370_v7 = vrot.slane %v3362_v39, %v6255_v27  ;;  %v3377_v60 = vrot.slane %v3363_v49, %v6255_v27  ;;  %v3477_v45 = vrot.slane %v3463_v29, %v6266_v36  ;;  %v2805_v23 = vrot.slane %v2791_v47, %v6266_v36 }
 0x97c   :  { %v2978_v57 = vcombine.low %v2955_v44, %v2963_v40  ;;  %v3478_v38 = vcombine.low %v3454_v34, %v3470_v54  ;;  %v3479_v42 = vcombine.high %v3454_v34, %v3470_v54  ;;  %v2979_v61 = vcombine.high %v2955_v44, %v2963_v40 }
 0x97d   :  { %v3378_v58 = vcombine.low %v3354_v56, %v3370_v7  ;;  %v3379_v59 = vcombine.high %v3354_v56, %v3370_v7  ;;  %v3394_v41 = vcombine.low %v3361_v35, %v3377_v60  ;;  %v3395_v31 = vcombine.high %v3361_v35, %v3377_v60 }
 0x97e   :  { %v3550_v20 = vpack.c.bf16 %v3478_v38, %v3478_v38  ;;  %v3551_v15 = vpack.c.bf16 %v3479_v42, %v3479_v42  ;;  %v2878_v13 = vcombine.low %v6786_v33, %v6789_v43  ;;  %v3700_v11 = vsel %vm1249_vm2, %v2949_v50, 0 }
 0x97f   :  { %v2967_v19 = vpop.permute.xlu0 %2966  ;;  %v3386_v10 = vrot.slane %v3378_v58, %v6266_v36  ;;  %v3393_v62 = vrot.slane %v3379_v59, %v6266_v36  ;;  %v3402_v14 = vrot.slane %v3394_v41, %v6266_v36  ;;  %v3409_v63 = vrot.slane %v3395_v31, %v6266_v36 }
 0x980   :  { %v2994_v1 = vcombine.low %v2959_v12, %v2967_v19  ;;  %v2995_v2 = vcombine.high %v2959_v12, %v2967_v19  ;;  %5367 = vmatmul.mubr.msk.bf16.vlgmr.msra.gmra.mxu0 %vm1249_vm2, %v3550_v20  ;;  %5373 = vmatmul.mubr.msk.bf16.vlgmr.msra.gmra.mxu1 %vm1249_vm2, %v3551_v15  ;;  %v5101_v3 = vcombine.high %v6786_v33, %v6789_v43 }
 0x981   :  { %v3482_v21 = vcombine.low %v3386_v10, %v3393_v62  ;;  %v2986_v30 = vrot.slane %v2978_v57, %v6255_v27  ;;  %5377 = vmatpush3.bf16.xpose.msra.mxu0 %v3654_v28  ;;  %v3480_v37 = vcombine.low %v3461_v55, %v3477_v45  ;;  %v2993_v4 = vrot.slane %v2979_v61, %v6255_v27 }
 0x982   :  { %v3002_v17 = vrot.slane %v2994_v1, %v6255_v27  ;;  %v3009_v6 = vrot.slane %v2995_v2, %v6255_v27  ;;  %5383 = vmatpush3.bf16.xpose.msra.mxu1 %v3700_v11  ;;  %5378 = vmatprep.mubr.msk.bf16.mxu0 %vm6000_vm0, %v5999_v0  ;;  %v2894_v18 = vcombine.low %v6794_v26, %v2805_v23 }
 0x983   :  { %v5109_v8 = vcombine.high %v3386_v10, %v3393_v62  ;;  %v3498_v12 = vcombine.low %v3402_v14, %v3409_v63  ;;  %v5110_v16 = vcombine.high %v3402_v14, %v3409_v63  ;;  %5384 = vmatprep.mubr.msk.bf16.mxu1 %vm6000_vm0, %v5999_v0  ;;  %5388 = vmatprep.subr.bf16.mxu0 %v5999_v0 }
 0x984   :  { %v3010_v50 = vcombine.low %v2986_v30, %v3002_v17  ;;  %v3011_v24 = vcombine.high %v2986_v30, %v3002_v17  ;;  %v3026_v51 = vcombine.low %v2993_v4, %v3009_v6  ;;  %v3027_v25 = vcombine.high %v2993_v4, %v3009_v6  ;;  %5394 = vmatprep.subr.bf16.mxu1 %v5999_v0 }
 0x985   :  { %v5102_v28 = vcombine.high %v6794_v26, %v2805_v23  ;;  %v6828_v29 = vrot.slane %v3482_v21, %v6255_v27  ;;  %v3552_v33 = vpack.c.bf16 %v3480_v37, %v3480_v37  ;;  %v3481_v39 = vcombine.high %v3461_v55, %v3477_v45 }
 0x986   :  { %v3018_v43 = vrot.slane %v3010_v50, %v6266_v36  ;;  %v3025_v47 = vrot.slane %v3011_v24, %v6266_v36  ;;  %v3034_v22 = vrot.slane %v3026_v51, %v6266_v36  ;;  %v3041_v48 = vrot.slane %v3027_v25, %v6266_v36 }
 0x987   :  { %v2885_v49 = vrot.slane %v2878_v13, %v6255_v27  ;;  %v2893_v40 = vrot.slane %v5101_v3, %v6255_v27  ;;  %v2901_v26 = vrot.slane %v2894_v18, %v6255_v27  ;;  %v3497_v44 = vrot.slane %v5109_v8, %v6255_v27 }
 0x988   :  { %v3505_v34 = vrot.slane %v3498_v12, %v6255_v27  ;;  %v3513_v54 = vrot.slane %v5110_v16, %v6255_v27  ;;  %v3114_v56 = vcombine.low %v3018_v43, %v3025_v47  ;;  %5379 = vmatmul.mubr.msk.bf16.vlgmr.msra.gmra.mxu0 %vm1249_vm2, %v3552_v33  ;;  %v5103_v35 = vcombine.high %v3018_v43, %v3025_v47 }
 0x989   :  { %v3553_v7 = vpack.c.bf16 %v3481_v39, %v3481_v39  ;;  %v2909_v60 = vrot.slane %v5102_v28, %v6255_v27  ;;  %v2910_v55 = vcombine.low %v2885_v49, %v2893_v40  ;;  %5390 = vmatprep.mubr.msk.bf16.mxu0 %vm6000_vm0, %v5999_v0  ;;  %v3130_v57 = vcombine.low %v3034_v22, %v3041_v48 }
 0x98a   :  { %v5104_v38 = vcombine.high %v3034_v22, %v3041_v48  ;;  %v2911_v58 = vcombine.high %v2885_v49, %v2893_v40  ;;  %v3514_v59 = vcombine.low %v6828_v29, %v3497_v44  ;;  %v3530_v31 = vcombine.low %v3505_v34, %v3513_v54 }
 0x98b   :  { %5385 = vmatmul.mubr.msk.bf16.vlgmr.msra.gmra.mxu1 %vm1249_vm2, %v3553_v7  ;;  %v2918_v42 = vrot.slane %v2910_v55, %v6266_v36  ;;  %v2926_v45 = vcombine.low %v2901_v26, %v2909_v60  ;;  %v2927_v41 = vcombine.high %v2901_v26, %v2909_v60  ;;  %v3121_v23 = vrot.slane %v3114_v56, %v6255_v27 }
 0x98c   :  { %5396 = vmatprep.mubr.msk.bf16.mxu1 %vm6000_vm0, %v5999_v0  ;;  %v3129_v61 = vrot.slane %v5103_v35, %v6255_v27  ;;  %v3137_v20 = vrot.slane %v3130_v57, %v6255_v27  ;;  %v3145_v15 = vrot.slane %v5104_v38, %v6255_v27  ;;  %v2925_v10 = vrot.slane %v2911_v58, %v6266_v36  ;;  %v270_v58 = vld [vmem:[#allocation2] sm:$0xff] }
 0x98d   :  { %v2934_v19 = vrot.slane %v2926_v45, %v6266_v36  ;;  %v2941_v62 = vrot.slane %v2927_v41, %v6266_v36  ;;  %v3522_v13 = vrot.slane %v3514_v59, %v6266_v36  ;;  %v3538_v11 = vrot.slane %v3530_v31, %v6266_v36 }
 0x98e   :  { %v3147_v3 = vcombine.high %v3121_v23, %v3129_v61  ;;  %v3146_v37 = vcombine.low %v3121_v23, %v3129_v61  ;;  %v3163_v4 = vcombine.high %v3137_v20, %v3145_v15  ;;  %v3162_v18 = vcombine.low %v3137_v20, %v3145_v15 }
 0x98f   :  { %v2942_v14 = vcombine.low %v2918_v42, %v2934_v19  ;;  %v2943_v63 = vcombine.high %v2918_v42, %v2934_v19  ;;  %v2944_v21 = vcombine.low %v2925_v10, %v2941_v62  ;;  %v2945_v30 = vcombine.high %v2925_v10, %v2941_v62 }
 0x990   :  { %v3161_v8 = vrot.slane %v3147_v3, %v6266_v36  ;;  %v3515_v12 = vcombine.high %v6828_v29, %v3497_v44  ;;  %v3177_v16 = vrot.slane %v3163_v4, %v6266_v36  ;;  %v3531_v50 = vcombine.high %v3505_v34, %v3513_v54 }
 0x991   :  { %v2950_v1 = vpack.c.bf16 %v2942_v14, %v2942_v14  ;;  %v2951_v2 = vpack.c.bf16 %v2943_v63, %v2943_v63  ;;  %v3546_v24 = vcombine.low %v3522_v13, %v3538_v11  ;;  %v3547_v51 = vcombine.high %v3522_v13, %v3538_v11 }
 0x992   :  { %v6866_v25 = vcombine.low %v3161_v8, %v3177_v16  ;;  %v6868_v28 = vcombine.high %v3161_v8, %v3177_v16  ;;  %v2952_v33 = vpack.c.bf16 %v2944_v21, %v2944_v21  ;;  %v2953_v43 = vpack.c.bf16 %v2945_v30, %v2945_v30 }
 0x993   :  { %v3746_v17 = vsel %vm1249_vm2, %v2950_v1, 0  ;;  %v3792_v6 = vsel %vm1249_vm2, %v2951_v2, 0  ;;  %v3154_v47 = vrot.slane %v3146_v37, %v6266_v36  ;;  %v3170_v29 = vrot.slane %v3162_v18, %v6266_v36 }
 0x994   :  { %5389 = vmatpush3.bf16.xpose.msra.mxu0 %v3746_v17  ;;  %5395 = vmatpush3.bf16.xpose.msra.mxu1 %v3792_v6  ;;  %v3554_v22 = vpack.c.bf16 %v3546_v24, %v3546_v24  ;;  %v3555_v48 = vpack.c.bf16 %v3547_v51, %v3547_v51  ;;  %v3529_v39 = vrot.slane %v3515_v12, %v6266_v36  ;;  %v3838_v40 = vsel %vm1249_vm2, %v2952_v33, 0  ;;  %v271_v24 = vld [vmem:[#allocation2 + $0x8] sm:$0xff] }
 0x995   :  { %5400 = vmatprep.subr.bf16.mxu0 %v5999_v0  ;;  %5406 = vmatprep.subr.bf16.mxu1 %v5999_v0  ;;  %v3545_v49 = vrot.slane %v3531_v50, %v6266_v36  ;;  %v3884_v26 = vsel %vm1249_vm2, %v2953_v43, 0  ;;  %v3178_v44 = vcombine.low %v3154_v47, %v3170_v29  ;;  %v3179_v34 = vcombine.high %v3154_v47, %v3170_v29 }
 0x997   :  { %v3548_v54 = vcombine.low %v3529_v39, %v3545_v49  ;;  %v3549_v56 = vcombine.high %v3529_v39, %v3545_v49  ;;  %v3250_v35 = vpack.c.bf16 %v3178_v44, %v3178_v44  ;;  %v3251_v7 = vpack.c.bf16 %v3179_v34, %v3179_v34 }
 0x999   :  { %v3556_v60 = vpack.c.bf16 %v3548_v54, %v3548_v54  ;;  %v3557_v55 = vpack.c.bf16 %v3549_v56, %v3549_v56  ;;  %v4042_v57 = vsel %vm1733_vm3, %v3250_v35, 0  ;;  %v4088_v38 = vsel %vm1733_vm3, %v3251_v7, 0 }
 0x99b   :  { %5391 = vmatmul.mubr.msk.bf16.vlgmr.msra.gmra.mxu0 %vm1249_vm2, %v3554_v22  ;;  %5397 = vmatmul.mubr.msk.bf16.vlgmr.msra.gmra.mxu1 %vm1249_vm2, %v3555_v48 }
 0x99c   :  { %5401 = vmatpush3.bf16.xpose.msra.mxu0 %v3838_v40  ;;  %5407 = vmatpush3.bf16.xpose.msra.mxu1 %v3884_v26 }
 0x99d   :  { %5402 = vmatprep.mubr.msk.bf16.mxu0 %vm6000_vm0, %v5999_v0  ;;  %5408 = vmatprep.mubr.msk.bf16.mxu1 %vm6000_vm0, %v5999_v0 }
 0x99e   :  { %5412 = vmatprep.subr.bf16.mxu0 %v5999_v0  ;;  %5418 = vmatprep.subr.bf16.mxu1 %v5999_v0 }
 0x9a3   :  { %5403 = vmatmul.mubr.msk.bf16.vlgmr.msra.gmra.mxu0 %vm1249_vm2, %v3556_v60  ;;  %5409 = vmatmul.mubr.msk.bf16.vlgmr.msra.gmra.mxu1 %vm1249_vm2, %v3557_v55 }
 0x9a4   :  { %5413 = vmatpush3.bf16.msra.mxu0 %v4042_v57  ;;  %5419 = vmatpush3.bf16.msra.mxu1 %v4088_v38 }
 0x9a5   :  { %5414 = vmatprep.mubr.msk.bf16.mxu0 %vm6000_vm0, %v5999_v0  ;;  %5420 = vmatprep.mubr.msk.bf16.mxu1 %vm6000_vm0, %v5999_v0 }
 0x9a6   :  { %5424 = vmatprep.subr.bf16.mxu0 %v5999_v0  ;;  %5430 = vmatprep.subr.bf16.mxu1 %v5999_v0 }
 0xa40   :  { %v3598_v42 = vpop.f32.mrf.mxu0  ;;  %v3644_v45 = vpop.f32.mrf.mxu1 }
 0xa41   :  { %v3926_v59 = vmul.f32 0.35355338, %v3598_v42  ;;  %v3927_v41 = vmul.f32 0.35355338, %v3644_v45 }
 0xa42   :  { %v5368_v31 = vpop.f32.mrf.mxu0  ;;  %v5374_v23 = vpop.f32.mrf.mxu1 }
 0xa43   :  { %v6894_v61 = vadd.f32 %v3926_v59, %v270_v58  ;;  %v6896_v19 = vadd.f32 %v3927_v41, %v270_v58 }
 0xa44   :  { %v3601_v20 = vpop.f32.mrf.mxu0  ;;  %v3647_v15 = vpop.f32.mrf.mxu1 }
 0xa45   :  { %v3942_v10 = vsel %vm1249_vm2, %v6894_v61, -inf  ;;  %v3945_v62 = vsel %vm1249_vm2, %v6896_v19, -inf }
 0xa46   :  { %v5369_v14 = vpop.f32.mrf.mxu0  ;;  %3943 = vmax.xlane.f32.xlu1 %v3942_v10  ;;  %3946 = vmax.xlane.f32.xlu0 %v3945_v62  ;;  %v5375_v63 = vpop.f32.mrf.mxu1 }
 0xa48   :  { %v3690_v13 = vpop.f32.mrf.mxu0 }
 0xa49   :  { %v3928_v1 = vmul.f32 0.35355338, %v3690_v13 }
 0xa4a   :  { %v5380_v2 = vpop.f32.mrf.mxu0 }
 0xa4b   :  { %v3736_v11 = vpop.f32.mrf.mxu1  ;;  %v3936_v3 = vadd.f32 %v3928_v1, %v270_v58 }
 0xa4c   :  { %v3929_v21 = vmul.f32 0.35355338, %v3736_v11  ;;  %v3693_v30 = vpop.f32.mrf.mxu0 }
 0xa4d   :  { %v5386_v37 = vpop.f32.mrf.mxu1  ;;  %v3948_v4 = vsel %vm1249_vm2, %v3936_v3, -inf }
 0xa4e   :  { %v5381_v17 = vpop.f32.mrf.mxu0  ;;  %3949 = vmax.xlane.f32.xlu0 %v3948_v4  ;;  %v3937_v6 = vadd.f32 %v3929_v21, %v270_v58 }
 0xa4f   :  { %v3739_v18 = vpop.f32.mrf.mxu1 }
 0xa50   :  { %v3951_v8 = vsel %vm1249_vm2, %v3937_v6, -inf }
 0xa51   :  { %3952 = vmax.xlane.f32.xlu1 %v3951_v8  ;;  %v5387_v12 = vpop.f32.mrf.mxu1 }
 0xa5b   :  { %v3782_v16 = vpop.f32.mrf.mxu0  ;;  %v3828_v50 = vpop.f32.mrf.mxu1 }
 0xa5c   :  { %v3930_v51 = vmul.f32 0.35355338, %v3782_v16  ;;  %v3931_v33 = vmul.f32 0.35355338, %v3828_v50 }
 0xa5d   :  { %v5392_v43 = vpop.f32.mrf.mxu0  ;;  %v5398_v47 = vpop.f32.mrf.mxu1 }
 0xa5e   :  { %v3938_v29 = vadd.f32 %v3930_v51, %v271_v24  ;;  %v3939_v22 = vadd.f32 %v3931_v33, %v271_v24 }
 0xa5f   :  { %v3785_v48 = vpop.f32.mrf.mxu0  ;;  %v3831_v39 = vpop.f32.mrf.mxu1 }
 0xa60   :  { %v3954_v49 = vsel %vm1249_vm2, %v3938_v29, -inf  ;;  %v3957_v40 = vsel %vm1249_vm2, %v3939_v22, -inf }
 0xa61   :  { %v5393_v26 = vpop.f32.mrf.mxu0  ;;  %3955 = vmax.xlane.f32.xlu0 %v3954_v49  ;;  %3958 = vmax.xlane.f32.xlu1 %v3957_v40  ;;  %v5399_v44 = vpop.f32.mrf.mxu1 }
 0xa63   :  { %v3874_v34 = vpop.f32.mrf.mxu0  ;;  %v3920_v54 = vpop.f32.mrf.mxu1 }
 0xa64   :  { %v3932_v56 = vmul.f32 0.35355338, %v3874_v34  ;;  %v3933_v35 = vmul.f32 0.35355338, %v3920_v54 }
 0xa65   :  { %v5404_v7 = vpop.f32.mrf.mxu0  ;;  %v5410_v60 = vpop.f32.mrf.mxu1 }
 0xa66   :  { %v3940_v55 = vadd.f32 %v3932_v56, %v271_v24  ;;  %v3941_v57 = vadd.f32 %v3933_v35, %v271_v24 }
 0xa67   :  { %v3877_v38 = vpop.f32.mrf.mxu0  ;;  %v3923_v42 = vpop.f32.mrf.mxu1 }
 0xa68   :  { %v3960_v45 = vsel %vm1249_vm2, %v3940_v55, -inf  ;;  %v3963_v58 = vsel %vm1249_vm2, %v3941_v57, -inf  ;;  %v3253_v38 = vpack.c.bf16 %v6868_v28, %v6868_v28 }
 0xa69   :  { %v5405_v59 = vpop.f32.mrf.mxu0  ;;  %3961 = vmax.xlane.f32.xlu0 %v3960_v45  ;;  %3964 = vmax.xlane.f32.xlu1 %v3963_v58  ;;  %v5411_v41 = vpop.f32.mrf.mxu1 }
 0xa6a   :  { %v4180_v59 = vsel %vm1733_vm3, %v3253_v38, 0 }
 0xa7a   :  { %2960 = vrot.lane.b32.xlu1 %v6750_v52, %s6004_s25 }
 0xa7f   :  { %2956 = vrot.lane.b32.xlu0 %v6679_v5, %s6004_s25 }
 0xacf   :  { %v3944_v31 = vpop.xlane.xlu1 %3943  ;;  %v3947_v23 = vpop.xlane.xlu0 %3946 }
 0xad0   :  { %v3966_v20 = vsub.f32 %v6894_v61, %v3944_v31  ;;  %v3967_v15 = vsub.f32 %v6896_v19, %v3947_v23 }
 0xad2   :  { %v3974_v10 = vmul.f32 1.442695, %v3966_v20  ;;  %v3976_v62 = vmul.f32 1.442695, %v3967_v15 }
 0xad4   :  { %5600 = vpow2.f32 %v3974_v10 }
 0xad5   :  { %5602 = vpow2.f32 %v3976_v62 }
 0xad7   :  { %v3950_v14 = vpop.xlane.xlu0 %3949 }
 0xad8   :  { %v3968_v63 = vsub.f32 %v3936_v3, %v3950_v14 }
 0xada   :  { %v3978_v13 = vmul.f32 1.442695, %v3968_v63  ;;  %v3953_v1 = vpop.xlane.xlu1 %3952 }
 0xadb   :  { %v3969_v2 = vsub.f32 %v3937_v6, %v3953_v1 }
 0xadc   :  { %5604 = vpow2.f32 %v3978_v13 }
 0xadd   :  { %v3980_v52 = vmul.f32 1.442695, %v3969_v2 }
 0xadf   :  { %5606 = vpow2.f32 %v3980_v52 }
 0xae1   :  { %v5601_v11 = vpop.eup %5600 }
 0xae2   :  { %v5603_v5 = vpop.eup %5602  ;;  %v3990_v21 = vsel %vm1249_vm2, %v5601_v11, 0.0 }
 0xae3   :  { %3991 = vadd.xlane.f32.xlu0 %v3990_v21  ;;  %v3993_v61 = vsel %vm1249_vm2, %v5603_v5, 0.0 }
 0xae4   :  { %3994 = vadd.xlane.f32.xlu1 %v3993_v61 }
 0xae9   :  { %v6916_v19 = vpop.eup %5604 }
 0xaea   :  { %v3956_v30 = vpop.xlane.xlu0 %3955  ;;  %v3959_v37 = vpop.xlane.xlu1 %3958  ;;  %v3996_v3 = vsel %vm1249_vm2, %v6916_v19, 0.0 }
 0xaeb   :  { %v3970_v4 = vsub.f32 %v3938_v29, %v3956_v30  ;;  %v3971_v17 = vsub.f32 %v3939_v22, %v3959_v37  ;;  %3997 = vadd.xlane.f32.xlu1 %v3996_v3 }
 0xaec   :  { %v5607_v6 = vpop.eup %5606 }
 0xaed   :  { %v3982_v18 = vmul.f32 1.442695, %v3970_v4  ;;  %v3984_v8 = vmul.f32 1.442695, %v3971_v17  ;;  %v3999_v12 = vsel %vm1249_vm2, %v5607_v6, 0.0 }
 0xaee   :  { %4000 = vadd.xlane.f32.xlu0 %v3999_v12 }
 0xaef   :  { %5608 = vpow2.f32 %v3982_v18 }
 0xaf0   :  { %5610 = vpow2.f32 %v3984_v8 }
 0xaf2   :  { %v3965_v33 = vpop.xlane.xlu1 %3964  ;;  %v3962_v43 = vpop.xlane.xlu0 %3961 }
 0xaf3   :  { %v3973_v47 = vsub.f32 %v3941_v57, %v3965_v33  ;;  %v3972_v29 = vsub.f32 %v3940_v55, %v3962_v43  ;;  %v3252_v55 = vpack.c.bf16 %v6866_v25, %v6866_v25 }
 0xaf5   :  { %v3988_v22 = vmul.f32 1.442695, %v3973_v47  ;;  %v3986_v48 = vmul.f32 1.442695, %v3972_v29  ;;  %v4134_v58 = vsel %vm1733_vm3, %v3252_v55, 0 }
 0xaf6   :  { %v2961_v26 = vpop.permute.xlu1 %2960 }
 0xaf7   :  { %5612 = vpow2.f32 %v3988_v22 }
 0xaf8   :  { %5614 = vpow2.f32 %v3986_v48 }
 0xafc   :  { %v6921_v16 = vpop.eup %5608 }
 0xafd   :  { %v6923_v50 = vpop.eup %5610  ;;  %v4002_v24 = vsel %vm1249_vm2, %v6921_v16, 0.0 }
 0xafe   :  { %4003 = vadd.xlane.f32.xlu0 %v4002_v24  ;;  %v4005_v51 = vsel %vm1249_vm2, %v6923_v50, 0.0 }
 0xaff   :  { %4006 = vadd.xlane.f32.xlu1 %v4005_v51 }
 0xb04   :  { %v6933_v39 = vpop.eup %5612 }
 0xb05   :  { %v6935_v49 = vpop.eup %5614  ;;  %v4011_v40 = vsel %vm1249_vm2, %v6933_v39, 0.0 }
 0xb10   :  { %2964 = vrot.lane.b32.xlu1 %v6758_v32, %s6004_s25  ;;  %v4008_v32 = vsel %vm1249_vm2, %v6935_v49, 0.0 }
 0xb14   :  { %2968 = vrot.lane.b32.xlu0 %v6756_v9, %s6004_s25  ;;  %v2957_v9 = vpop.permute.xlu0 %2956 }
 0xb33   :  { %4012 = vadd.xlane.f32.xlu0 %v4011_v40 }
 0xb34   :  { %4009 = vadd.xlane.f32.xlu1 %v4008_v32 }
 0xb6c   :  { %v3992_v44 = vpop.xlane.xlu0 %3991 }
 0xb6d   :  { %5616 = vrcp.f32 %v3992_v44  ;;  %v3995_v34 = vpop.xlane.xlu1 %3994 }
 0xb6e   :  { %5618 = vrcp.f32 %v3995_v34 }
 0xb74   :  { %v3998_v54 = vpop.xlane.xlu1 %3997 }
 0xb75   :  { %5620 = vrcp.f32 %v3998_v54 }
 0xb77   :  { %v4001_v56 = vpop.xlane.xlu0 %4000 }
 0xb78   :  { %5622 = vrcp.f32 %v4001_v56 }
 0xb7a   :  { %v5617_v35 = vpop.eup %5616 }
 0xb7b   :  { %v5619_v7 = vpop.eup %5618  ;;  %v4022_v60 = vmul.f32 %v5617_v35, %v5601_v11 }
 0xb7c   :  { %v4023_v57 = vmul.f32 %v5619_v7, %v5603_v5 }
 0xb7d   :  { %v4030_v42 = vpack.c.bf16 %v4022_v60, %v4022_v60 }
 0xb7e   :  { %v4031_v45 = vpack.c.bf16 %v4023_v57, %v4023_v57 }
 0xb7f   :  { %5415 = vmatmul.mubr.msk.bf16.vlgmr.msra.gmra.mxu0 %vm1249_vm2, %v4030_v42 }
 0xb80   :  { %5421 = vmatmul.mubr.msk.bf16.vlgmr.msra.gmra.mxu1 %vm1249_vm2, %v4031_v45  ;;  %5425 = vmatpush3.bf16.msra.mxu0 %v4134_v58 }
 0xb81   :  { %5431 = vmatpush3.bf16.msra.mxu1 %v4180_v59  ;;  %5426 = vmatprep.mubr.msk.bf16.mxu0 %vm6000_vm0, %v5999_v0 }
 0xb82   :  { %v5621_v25 = vpop.eup %5620  ;;  %5432 = vmatprep.mubr.msk.bf16.mxu1 %vm6000_vm0, %v5999_v0  ;;  %5436 = vmatprep.subr.bf16.mxu0 %v5999_v0 }
 0xb83   :  { %v4024_v28 = vmul.f32 %v5621_v25, %v6916_v19  ;;  %5442 = vmatprep.subr.bf16.mxu1 %v5999_v0 }
 0xb85   :  { %v5623_v41 = vpop.eup %5622  ;;  %v4032_v31 = vpack.c.bf16 %v4024_v28, %v4024_v28 }
 0xb86   :  { %v4025_v23 = vmul.f32 %v5623_v41, %v5607_v6 }
 0xb87   :  { %v4004_v20 = vpop.xlane.xlu0 %4003  ;;  %5427 = vmatmul.mubr.msk.bf16.vlgmr.msra.gmra.mxu0 %vm1249_vm2, %v4032_v31 }
 0xb88   :  { %v4007_v15 = vpop.xlane.xlu1 %4006  ;;  %v4033_v10 = vpack.c.bf16 %v4025_v23, %v4025_v23  ;;  %5438 = vmatprep.mubr.msk.bf16.mxu0 %vm6000_vm0, %v5999_v0  ;;  %5624 = vrcp.f32 %v4004_v20 }
 0xb89   :  { %5626 = vrcp.f32 %v4007_v15 }
 0xb8a   :  { %5433 = vmatmul.mubr.msk.bf16.vlgmr.msra.gmra.mxu1 %vm1249_vm2, %v4033_v10 }
 0xb8b   :  { %v2969_v62 = vpop.permute.xlu0 %2968  ;;  %5444 = vmatprep.mubr.msk.bf16.mxu1 %vm6000_vm0, %v5999_v0 }
 0xb8c   :  { %v3062_v14 = vcombine.low %v2961_v26, %v2969_v62  ;;  %v3063_v63 = vcombine.high %v2961_v26, %v2969_v62  ;;  %v2965_v13 = vpop.permute.xlu1 %2964 }
 0xb8d   :  { %v3046_v1 = vcombine.low %v2957_v9, %v2965_v13  ;;  %v3047_v2 = vcombine.high %v2957_v9, %v2965_v13 }
 0xb8e   :  { %v3070_v52 = vrot.slane %v3062_v14, %v6255_v27  ;;  %v3077_v11 = vrot.slane %v3063_v63, %v6255_v27 }
 0xb8f   :  { %v3054_v5 = vrot.slane %v3046_v1, %v6255_v27  ;;  %v3061_v21 = vrot.slane %v3047_v2, %v6255_v27 }
 0xb91   :  { %v3078_v61 = vcombine.low %v3054_v5, %v3070_v52  ;;  %v3079_v19 = vcombine.high %v3054_v5, %v3070_v52  ;;  %v3094_v30 = vcombine.low %v3061_v21, %v3077_v11  ;;  %v3095_v37 = vcombine.high %v3061_v21, %v3077_v11 }
 0xb93   :  { %v3086_v3 = vrot.slane %v3078_v61, %v6266_v36  ;;  %v3093_v4 = vrot.slane %v3079_v19, %v6266_v36  ;;  %v3102_v17 = vrot.slane %v3094_v30, %v6266_v36  ;;  %v3109_v6 = vrot.slane %v3095_v37, %v6266_v36 }
 0xb95   :  { %v3182_v18 = vcombine.low %v3086_v3, %v3093_v4  ;;  %v5105_v8 = vcombine.high %v3086_v3, %v3093_v4  ;;  %v3198_v12 = vcombine.low %v3102_v17, %v3109_v6  ;;  %v5106_v24 = vcombine.high %v3102_v17, %v3109_v6  ;;  %v5625_v32 = vpop.eup %5624 }
 0xb96   :  { %v5627_v54 = vpop.eup %5626  ;;  %v4026_v38 = vmul.f32 %v5625_v32, %v6921_v16 }
 0xb97   :  { %v3189_v51 = vrot.slane %v3182_v18, %v6255_v27  ;;  %v3197_v33 = vrot.slane %v5105_v8, %v6255_v27  ;;  %v3205_v43 = vrot.slane %v3198_v12, %v6255_v27  ;;  %v3213_v47 = vrot.slane %v5106_v24, %v6255_v27 }
 0xb98   :  { %v4027_v42 = vmul.f32 %v5627_v54, %v6923_v50  ;;  %v4034_v28 = vpack.c.bf16 %v4026_v38, %v4026_v38 }
 0xb99   :  { %v3214_v29 = vcombine.low %v3189_v51, %v3197_v33  ;;  %v3230_v22 = vcombine.low %v3205_v43, %v3213_v47  ;;  %v3215_v48 = vcombine.high %v3189_v51, %v3197_v33  ;;  %v3231_v40 = vcombine.high %v3205_v43, %v3213_v47 }
 0xb9a   :  { %v4035_v41 = vpack.c.bf16 %v4027_v42, %v4027_v42 }
 0xb9b   :  { %v3222_v9 = vrot.slane %v3214_v29, %v6266_v36  ;;  %v3238_v26 = vrot.slane %v3230_v22, %v6266_v36  ;;  %v3229_v44 = vrot.slane %v3215_v48, %v6266_v36  ;;  %v3245_v34 = vrot.slane %v3231_v40, %v6266_v36 }
 0xb9d   :  { %v3246_v56 = vcombine.low %v3222_v9, %v3238_v26  ;;  %v3247_v35 = vcombine.high %v3222_v9, %v3238_v26  ;;  %v3248_v7 = vcombine.low %v3229_v44, %v3245_v34  ;;  %v3249_v60 = vcombine.high %v3229_v44, %v3245_v34 }
 0xb9f   :  { %v3254_v55 = vpack.c.bf16 %v3246_v56, %v3246_v56  ;;  %v3255_v57 = vpack.c.bf16 %v3247_v35, %v3247_v35  ;;  %v3256_v59 = vpack.c.bf16 %v3248_v7, %v3248_v7  ;;  %v3257_v25 = vpack.c.bf16 %v3249_v60, %v3249_v60 }
 0xba1   :  { %v4226_v45 = vsel %vm1733_vm3, %v3254_v55, 0  ;;  %v4272_v58 = vsel %vm1733_vm3, %v3255_v57, 0  ;;  %v4318_v16 = vsel %vm1733_vm3, %v3256_v59, 0  ;;  %v4364_v50 = vsel %vm1733_vm3, %v3257_v25, 0 }
 0xba2   :  { %5437 = vmatpush3.bf16.msra.mxu0 %v4226_v45  ;;  %5443 = vmatpush3.bf16.msra.mxu1 %v4272_v58 }
 0xba3   :  { %5448 = vmatprep.subr.bf16.mxu0 %v5999_v0  ;;  %5454 = vmatprep.subr.bf16.mxu1 %v5999_v0 }
 0xba5   :  { %5439 = vmatmul.mubr.msk.bf16.vlgmr.msra.gmra.mxu0 %vm1249_vm2, %v4034_v28  ;;  %5445 = vmatmul.mubr.msk.bf16.vlgmr.msra.gmra.mxu1 %vm1249_vm2, %v4035_v41 }
 0xba6   :  { %5449 = vmatpush3.bf16.msra.mxu0 %v4318_v16  ;;  %5455 = vmatpush3.bf16.msra.mxu1 %v4364_v50 }
 0xba7   :  { %5450 = vmatprep.mubr.msk.bf16.mxu0 %vm6000_vm0, %v5999_v0  ;;  %5456 = vmatprep.mubr.msk.bf16.mxu1 %vm6000_vm0, %v5999_v0 }
 0xba8   :  { %5460 = vmatprep.subr.bf16.mxu0 %v5999_v0  ;;  %5468 = vmatprep.subr.bf16.mxu1 %v5999_v0 }
 0xbbc   :  { %v4013_v31 = vpop.xlane.xlu0 %4012 }
 0xbbd   :  { %5628 = vrcp.f32 %v4013_v31  ;;  %v4010_v23 = vpop.xlane.xlu1 %4009 }
 0xbbe   :  { %5630 = vrcp.f32 %v4010_v23 }
 0xbca   :  { %v5629_v20 = vpop.eup %5628 }
 0xbcb   :  { %v5631_v15 = vpop.eup %5630  ;;  %v4029_v10 = vmul.f32 %v5629_v20, %v6933_v39 }
 0xbcc   :  { %v4028_v62 = vmul.f32 %v5631_v15, %v6935_v49 }
 0xbcd   :  { %v4037_v14 = vpack.c.bf16 %v4029_v10, %v4029_v10 }
 0xbce   :  { %v4036_v63 = vpack.c.bf16 %v4028_v62, %v4028_v62 }
 0xbcf   :  { %5457 = vmatmul.mubr.msk.bf16.vlgmr.msra.gmra.mxu1 %vm1249_vm2, %v4037_v14 }
 0xbd0   :  { %5451 = vmatmul.mubr.msk.bf16.vlgmr.msra.gmra.mxu0 %vm1249_vm2, %v4036_v63  ;;  %5472 = vmatprep.mubr.msk.bf16.mxu1 %vm6000_vm0, %v5999_v0 }
 0xbd1   :  { %5464 = vmatprep.mubr.msk.bf16.mxu0 %vm6000_vm0, %v5999_v0 }
 0xc3f   :  { %v4078_v13 = vpop.f32.mrf.mxu0 }
 0xc40   :  { %v4124_v1 = vpop.f32.mrf.mxu1 }
 0xc41   :  { %v5416_v2 = vpop.f32.mrf.mxu0 }
 0xc42   :  { %v5422_v52 = vpop.f32.mrf.mxu1 }
 0xc43   :  { %v4081_v11 = vpop.f32.mrf.mxu0 }
 0xc44   :  { %v4127_v39 = vpop.f32.mrf.mxu1 }
 0xc45   :  { %v5417_v5 = vpop.f32.mrf.mxu0 }
 0xc46   :  { %v5423_v49 = vpop.f32.mrf.mxu1 }
 0xc47   :  { %v4170_v21 = vpop.f32.mrf.mxu0 }
 0xc48   :  { %v4406_v61 = vcombine.low %v4078_v13, %v4170_v21  ;;  %v4407_v19 = vcombine.high %v4078_v13, %v4170_v21 }
 0xc49   :  { %v5428_v30 = vpop.f32.mrf.mxu0 }
 0xc4a   :  { %v4216_v37 = vpop.f32.mrf.mxu1  ;;  %v4414_v3 = vrot.slane %v4406_v61, %v6255_v27  ;;  %v4421_v4 = vrot.slane %v4407_v19, %v6255_v27 }
 0xc4b   :  { %v4422_v17 = vcombine.low %v4124_v1, %v4216_v37  ;;  %v4423_v6 = vcombine.high %v4124_v1, %v4216_v37  ;;  %v4173_v18 = vpop.f32.mrf.mxu0 }
 0xc4c   :  { %v5434_v8 = vpop.f32.mrf.mxu1 }
 0xc4d   :  { %v4430_v12 = vrot.slane %v4422_v17, %v6255_v27  ;;  %v4437_v24 = vrot.slane %v4423_v6, %v6255_v27  ;;  %v5429_v51 = vpop.f32.mrf.mxu0 }
 0xc4e   :  { %v4219_v33 = vpop.f32.mrf.mxu1 }
 0xc4f   :  { %v4438_v43 = vcombine.low %v4414_v3, %v4430_v12  ;;  %v4439_v47 = vcombine.high %v4414_v3, %v4430_v12  ;;  %v4454_v29 = vcombine.low %v4421_v4, %v4437_v24  ;;  %v4455_v22 = vcombine.high %v4421_v4, %v4437_v24 }
 0xc50   :  { %v5435_v48 = vpop.f32.mrf.mxu1 }
 0xc51   :  { %v4446_v40 = vrot.slane %v4438_v43, %v6266_v36  ;;  %v4453_v32 = vrot.slane %v4439_v47, %v6266_v36  ;;  %v4462_v9 = vrot.slane %v4454_v29, %v6266_v36  ;;  %v4469_v26 = vrot.slane %v4455_v22, %v6266_v36 }
 0xc53   :  { %v4542_v44 = vcombine.low %v4446_v40, %v4453_v32  ;;  %v5127_v34 = vcombine.high %v4446_v40, %v4453_v32  ;;  %v4558_v54 = vcombine.low %v4462_v9, %v4469_v26  ;;  %v5128_v56 = vcombine.high %v4462_v9, %v4469_v26  ;;  %v5556_v32 = vld [vmem:[#allocation19 + $0x8] sm:$0xff]  }
 0xc54   :  { %5461 = vmatpush3.bf16.msra.mxu0 %v5556_v32 }
 0xc55   :  { %v4549_v35 = vrot.slane %v4542_v44, %v6255_v27  ;;  %v4557_v7 = vrot.slane %v5127_v34, %v6255_v27  ;;  %v4565_v60 = vrot.slane %v4558_v54, %v6255_v27  ;;  %v4573_v55 = vrot.slane %v5128_v56, %v6255_v27  ;;  %5462 = vmatprep.subr.bf16.mxu0 %v5999_v0 }
 0xc57   :  { %v4575_v57 = vcombine.high %v4549_v35, %v4557_v7  ;;  %v4591_v38 = vcombine.high %v4565_v60, %v4573_v55  ;;  %v4574_v42 = vcombine.low %v4549_v35, %v4557_v7  ;;  %v4590_v45 = vcombine.low %v4565_v60, %v4573_v55 }
 0xc59   :  { %v7015_v58 = vrot.slane %v4575_v57, %v6266_v36  ;;  %v7018_v59 = vrot.slane %v4591_v38, %v6266_v36  ;;  %v7021_v25 = vrot.slane %v4574_v42, %v6266_v36  ;;  %v7024_v28 = vrot.slane %v4590_v45, %v6266_v36  ;;  %v5557_v42 = vld [vmem:[#allocation19] sm:$0xff]  }
 0xc5a   :  { %5463 = vmatpush3.bf16.msra.mxu0 %v5557_v42 }
 0xc5b   :  { %v4608_v41 = vcombine.low %v7015_v58, %v7018_v59  ;;  %v4606_v16 = vcombine.low %v7021_v25, %v7024_v28  ;;  %v4607_v50 = vcombine.high %v7021_v25, %v7024_v28  ;;  %v4609_v31 = vcombine.high %v7015_v58, %v7018_v59  ;;  %5476 = vmatprep.subr.bf16.mxu0 %v5999_v0  ;;  %v5131_v25 = vld [vmem:[#allocation20] ss:$0 sm:$0xff] }
 0xc65   :  { %v4262_v23 = vpop.f32.mrf.mxu0  ;;  %v4308_v20 = vpop.f32.mrf.mxu1 }
 0xc67   :  { %v5440_v15 = vpop.f32.mrf.mxu0  ;;  %v5446_v10 = vpop.f32.mrf.mxu1 }
 0xc69   :  { %v4265_v62 = vpop.f32.mrf.mxu0  ;;  %v4311_v14 = vpop.f32.mrf.mxu1 }
 0xc6b   :  { %v5441_v63 = vpop.f32.mrf.mxu0  ;;  %v5447_v13 = vpop.f32.mrf.mxu1 }
 0xc8f   :  { %v4400_v1 = vpop.f32.mrf.mxu1 }
 0xc90   :  { %v4354_v2 = vpop.f32.mrf.mxu0  ;;  %v4490_v52 = vcombine.low %v4308_v20, %v4400_v1  ;;  %v4491_v11 = vcombine.high %v4308_v20, %v4400_v1 }
 0xc91   :  { %v4474_v39 = vcombine.low %v4262_v23, %v4354_v2  ;;  %v4475_v5 = vcombine.high %v4262_v23, %v4354_v2  ;;  %v5458_v49 = vpop.f32.mrf.mxu1 }
 0xc92   :  { %v4498_v21 = vrot.slane %v4490_v52, %v6255_v27  ;;  %v4505_v61 = vrot.slane %v4491_v11, %v6255_v27  ;;  %v5452_v19 = vpop.f32.mrf.mxu0 }
 0xc93   :  { %v4482_v30 = vrot.slane %v4474_v39, %v6255_v27  ;;  %v4489_v37 = vrot.slane %v4475_v5, %v6255_v27  ;;  %v4403_v3 = vpop.f32.mrf.mxu1 }
 0xc94   :  { %v4357_v4 = vpop.f32.mrf.mxu0 }
 0xc95   :  { %v4506_v17 = vcombine.low %v4482_v30, %v4498_v21  ;;  %v4507_v6 = vcombine.high %v4482_v30, %v4498_v21  ;;  %v4522_v18 = vcombine.low %v4489_v37, %v4505_v61  ;;  %v4523_v8 = vcombine.high %v4489_v37, %v4505_v61  ;;  %v5459_v12 = vpop.f32.mrf.mxu1 }
 0xc96   :  { %v5453_v24 = vpop.f32.mrf.mxu0 }
 0xc97   :  { %v4514_v51 = vrot.slane %v4506_v17, %v6266_v36  ;;  %v4521_v33 = vrot.slane %v4507_v6, %v6266_v36  ;;  %v4530_v43 = vrot.slane %v4522_v18, %v6266_v36  ;;  %v4537_v47 = vrot.slane %v4523_v8, %v6266_v36 }
 0xc99   :  { %v4610_v29 = vcombine.low %v4514_v51, %v4521_v33  ;;  %v5129_v22 = vcombine.high %v4514_v51, %v4521_v33  ;;  %v4626_v48 = vcombine.low %v4530_v43, %v4537_v47  ;;  %v5130_v40 = vcombine.high %v4530_v43, %v4537_v47 }
 0xc9b   :  { %v4617_v9 = vrot.slane %v4610_v29, %v6255_v27  ;;  %v4625_v26 = vrot.slane %v5129_v22, %v6255_v27  ;;  %v4633_v44 = vrot.slane %v4626_v48, %v6255_v27  ;;  %v4641_v34 = vrot.slane %v5130_v40, %v6255_v27  ;;  %v5558_v29 = vld [vmem:[#allocation25 + $0x8] sm:$0xff]   ;;  %v5560_v22 = vld [vmem:[%s7137_s20 + $0x18] sm:$0xff]  }
 0xc9c   :  { %5469 = vmatpush3.bf16.msra.mxu1 %v5558_v29 }
 0xc9d   :  { %v4643_v54 = vcombine.high %v4617_v9, %v4625_v26  ;;  %v4659_v56 = vcombine.high %v4633_v44, %v4641_v34  ;;  %v4642_v35 = vcombine.low %v4617_v9, %v4625_v26  ;;  %v4658_v7 = vcombine.low %v4633_v44, %v4641_v34  ;;  %5470 = vmatprep.subr.bf16.mxu1 %v5999_v0 }
 0xc9f   :  { %v4657_v60 = vrot.slane %v4643_v54, %v6266_v36  ;;  %v4673_v55 = vrot.slane %v4659_v56, %v6266_v36  ;;  %v4650_v57 = vrot.slane %v4642_v35, %v6266_v36  ;;  %v4666_v38 = vrot.slane %v4658_v7, %v6266_v36  ;;  %v5135_v56 = vld [vmem:[#allocation22] ss:$0 sm:$0xff] }
 0xca1   :  { %v4676_v45 = vcombine.low %v4657_v60, %v4673_v55  ;;  %v4675_v23 = vcombine.high %v4650_v57, %v4666_v38  ;;  %v4674_v20 = vcombine.low %v4650_v57, %v4666_v38  ;;  %v4677_v10 = vcombine.high %v4657_v60, %v4673_v55  ;;  %v5136_v55 = vld [vmem:[#allocation23] ss:$0 sm:$0xff] }
 0xca3   :  { %v5538_v27 = vpack.i.bf16 %v4676_v45, %v4608_v41  ;;  %v5533_v15 = vpack.i.bf16 %v4675_v23, %v4607_v50  ;;  %v5543_v62 = vpack.i.bf16 %v4677_v10, %v4609_v31  ;;  %v5561_v23 = vld [vmem:[%s7137_s20 + $0x10] sm:$0xff]  }
 0xca5   :  { %5539 = vrot.lane.b32.xlu1 %v5538_v27, %s6007_s28  ;;  %5534 = vrot.lane.b32.xlu0 %v5533_v15, %s5991_s2  ;;  %v5563_v27 = vld [vmem:[%s7137_s20] sm:$0xff]  }
 0xca6   :  { %v5137_v15 = vld [vmem:[%s7136_s19] ss:$0 sm:$0xff] }
 0xca9   :  { %5544 = vrot.lane.b32.xlu1 %v5543_v62, %s6008_s7 }
 0xd17   :  { %v5540_v36 = vpop.permute.xlu1 %5539  ;;  %v5535_v14 = vpop.permute.xlu0 %5534 }
 0xd18   :  { %v5537_v63 = vunpack.i.h.bf16 %v5535_v14  ;;  %v5536_v13 = vunpack.i.l.bf16 %v5535_v14  ;;  %v5542_v1 = vunpack.i.h.bf16 %v5540_v36  ;;  %v5541_v2 = vunpack.i.l.bf16 %v5540_v36 }
 0xd1a   :  { %v4702_v41 = vsel %vm1249_vm2, %v4606_v16, %v5536_v13  ;;  %v4703_v50 = vsel %vm1249_vm2, %v4674_v20, %v5537_v63  ;;  %v5562_v20 = vld [vmem:[%s7137_s20 + $0x8] sm:$0xff]  }
 0xd1b   :  { %v5545_v52 = vpop.permute.xlu1 %5544  ;;  %v4704_v58 = vsel %vm2397_vm4, %v4702_v41, %v5541_v2  ;;  %v4705_v59 = vsel %vm2397_vm4, %v4703_v50, %v5542_v1 }
 0xd1c   :  { %v5547_v11 = vunpack.i.h.bf16 %v5545_v52  ;;  %v5546_v39 = vunpack.i.l.bf16 %v5545_v52 }
 0xd1e   :  { %v4706_v31 = vsel %vm2400_vm5, %v4704_v58, %v5546_v39  ;;  %v4707_v5 = vsel %vm2400_vm5, %v4705_v59, %v5547_v11 }
 0xd1f   :  { %v4708_v49 = vpack.c.bf16 %v4707_v5, %v4706_v31 }
 0xd21   :  { %5465 = vmatmul.mubr.msk.bf16.vlgmr.msra.gmra.mxu0 %vm296_vm1, %v4708_v49 }
 0xd22   :  { %5484 = vmatprep.mubr.msk.bf16.mxu0 %vm6000_vm0, %v5999_v0  ;;  %5477 = vmatpush3.bf16.msra.mxu0 %v5560_v22 }
 0xd23   :  { %5478 = vmatprep.subr.bf16.mxu0 %v5999_v0 }
 0xd26   :  { %5479 = vmatpush3.bf16.msra.mxu0 %v5561_v23 }
 0xd27   :  { %5480 = vmatprep.subr.bf16.mxu0 %v5999_v0 }
 0xd2a   :  { %5481 = vmatpush3.bf16.msra.mxu0 %v5562_v20 }
 0xd2b   :  { %5482 = vmatprep.subr.bf16.mxu0 %v5999_v0  ;;  %v5141_v0 = vld [vmem:[%s7138_s21] ss:$0 sm:$0xff] }
 0xd2e   :  { %5483 = vmatpush3.bf16.msra.mxu0 %v5563_v27 }
 0xde1   :  { %v4769_v28 = vpop.f32.mrf.mxu0 }
 0xde2   :  { %v4770_v16 = vadd.f32 %v5131_v25, %v4769_v28 }
 0xde3   :  { %v5466_v21 = vpop.f32.mrf.mxu0 }
 0xde4   :  { %v4776_v61 = vadd.f32 %v4770_v16, %v6683_v46 }
 0xde5   :  { %v4772_v19 = vpop.f32.mrf.mxu0 }
 0xde6   :  { %v4773_v30 = vadd.f32 %v5131_v25, %v4772_v19  ;;  %v4780_v37 = vsel %vm296_vm1, %v4776_v61, 0.0 }
 0xde7   :  { %4781 = vadd.xlane.f32.xlu0 %v4780_v37  ;;  %v5467_v3 = vpop.f32.mrf.mxu0 }
 0xde8   :  { %v4777_v4 = vadd.f32 %v4773_v30, %v6685_v53  ;;  %v5559_v53 = vld [vmem:[#allocation25] sm:$0xff]  }
 0xde9   :  { %5471 = vmatpush3.bf16.msra.mxu1 %v5559_v53 }
 0xdea   :  { %v4783_v17 = vsel %vm296_vm1, %v4777_v4, 0.0 }
 0xdeb   :  { %4784 = vadd.xlane.f32.xlu1 %v4783_v17 }
 0xe70   :  { %v4782_v6 = vpop.xlane.xlu0 %4781 }
 0xe71   :  { %v4786_v18 = vmul.f32 0.03125, %v4782_v6 }
 0xe73   :  { %v4788_v8 = vsub.f32 %v4776_v61, %v4786_v18 }
 0xe74   :  { %v4785_v12 = vpop.xlane.xlu1 %4784 }
 0xe75   :  { %v4787_v24 = vmul.f32 0.03125, %v4785_v12  ;;  %v4790_v51 = vmul.f32 %v4788_v8, %v4788_v8 }
 0xe77   :  { %v4789_v33 = vsub.f32 %v4777_v4, %v4787_v24  ;;  %v4792_v46 = vsel %vm296_vm1, %v4790_v51, 0.0 }
 0xe78   :  { %4793 = vadd.xlane.f32.xlu0 %v4792_v46  ;;  %v5147_v46 = vld [vmem:[%s7139_s22] ss:$0 sm:$0xff] }
 0xe79   :  { %v4791_v43 = vmul.f32 %v4789_v33, %v4789_v33 }
 0xe7b   :  { %v4795_v47 = vsel %vm296_vm1, %v4791_v43, 0.0 }
 0xe7c   :  { %4796 = vadd.xlane.f32.xlu0 %v4795_v47  ;;  %v5148_v47 = vld [vmem:[%s7140_s23] ss:$0 sm:$0xff] }
 0xf01   :  { %v4794_v48 = vpop.xlane.xlu0 %4793 }
 0xf02   :  { %v4798_v40 = vmul.f32 0.03125, %v4794_v48 }
 0xf04   :  { %v4800_v32 = vadd.f32 1e-05, %v4798_v40 }
 0xf05   :  { %v4797_v9 = vpop.xlane.xlu0 %4796 }
 0xf06   :  { %5632 = vrsqrt.f32 %v4800_v32  ;;  %v4799_v26 = vmul.f32 0.03125, %v4797_v9 }
 0xf08   :  { %v4801_v44 = vadd.f32 1e-05, %v4799_v26 }
 0xf0a   :  { %5634 = vrsqrt.f32 %v4801_v44 }
 0xf13   :  { %v5633_v34 = vpop.eup %5632 }
 0xf14   :  { %v4804_v54 = vmul.f32 %v5633_v34, %v4788_v8 }
 0xf16   :  { %v4812_v60 = vmul.f32 %v5135_v56, %v4804_v54 }
 0xf17   :  { %v5635_v35 = vpop.eup %5634 }
 0xf18   :  { %v4805_v7 = vmul.f32 %v5635_v35, %v4789_v33  ;;  %v4820_v38 = vadd.f32 %v5136_v55, %v4812_v60 }
 0xf1a   :  { %v4813_v57 = vmul.f32 %v5135_v56, %v4805_v7 }
 0xf1c   :  { %v4821_v42 = vadd.f32 %v5136_v55, %v4813_v57 }
 0xf1e   :  { %v4822_v45 = vpack.c.bf16 %v4821_v42, %v4820_v38 }
 0xf20   :  { %5473 = vmatmul.mubr.msk.bf16.vlgmr.msra.gmra.mxu1 %vm296_vm1, %v4822_v45 }
 0xfe0   :  { %v4883_v10 = vpop.f32.mrf.mxu1 }
 0xfe1   :  { %v4884_v36 = vadd.f32 %v5137_v15, %v4883_v10 }
 0xfe2   :  { %v5474_v62 = vpop.f32.mrf.mxu1 }
 0xfe3   :  { %v4890_v1 = vmax.f32 %v4884_v36, 0.0 }
 0xfe4   :  { %v4886_v14 = vpop.f32.mrf.mxu1 }
 0xfe5   :  { %v4887_v63 = vadd.f32 %v5137_v15, %v4886_v14 }
 0xfe6   :  { %v5475_v13 = vpop.f32.mrf.mxu1 }
 0xfe7   :  { %v4891_v2 = vmax.f32 %v4887_v63, 0.0 }
 0xfe9   :  { %v4892_v41 = vpack.c.bf16 %v4891_v2, %v4890_v1 }
 0xfeb   :  { %5485 = vmatmul.mubr.msk.bf16.vlgmr.msra.gmra.mxu0 %vm4932_vm6, %v4892_v41 }
0x10ab   :  { %v4970_v50 = vpop.f32.mrf.mxu0 }
0x10ac   :  { %v4971_v52 = vadd.f32 %v5141_v0, %v4970_v50 }
0x10ad   :  { %v5486_v11 = vpop.f32.mrf.mxu0 }
0x10ae   :  { %v4977_v39 = vadd.f32 %v4971_v52, %v4820_v38 }
0x10af   :  { %v4973_v58 = vpop.f32.mrf.mxu0 }
0x10b0   :  { %v4974_v59 = vadd.f32 %v5141_v0, %v4973_v58  ;;  %v4981_v31 = vsel %vm296_vm1, %v4977_v39, 0.0 }
0x10b1   :  { %4982 = vadd.xlane.f32.xlu1 %v4981_v31  ;;  %v5487_v5 = vpop.f32.mrf.mxu0 }
0x10b2   :  { %v4978_v49 = vadd.f32 %v4974_v59, %v4821_v42 }
0x10b4   :  { %v4984_v25 = vsel %vm296_vm1, %v4978_v49, 0.0 }
0x10b5   :  { %4985 = vadd.xlane.f32.xlu0 %v4984_v25 }
0x113a   :  { %v4983_v28 = vpop.xlane.xlu1 %4982 }
0x113b   :  { %v4987_v16 = vmul.f32 0.03125, %v4983_v28 }
0x113d   :  { %v4989_v21 = vsub.f32 %v4977_v39, %v4987_v16 }
0x113e   :  { %v4986_v61 = vpop.xlane.xlu0 %4985 }
0x113f   :  { %v4988_v19 = vmul.f32 0.03125, %v4986_v61  ;;  %v4991_v30 = vmul.f32 %v4989_v21, %v4989_v21 }
0x1141   :  { %v4990_v37 = vsub.f32 %v4978_v49, %v4988_v19  ;;  %v4993_v3 = vsel %vm296_vm1, %v4991_v30, 0.0 }
0x1142   :  { %4994 = vadd.xlane.f32.xlu1 %v4993_v3 }
0x1143   :  { %v4992_v4 = vmul.f32 %v4990_v37, %v4990_v37 }
0x1145   :  { %v4996_v17 = vsel %vm296_vm1, %v4992_v4, 0.0 }
0x1146   :  { %4997 = vadd.xlane.f32.xlu0 %v4996_v17 }
0x11cb   :  { %v4995_v6 = vpop.xlane.xlu1 %4994 }
0x11cc   :  { %v4999_v18 = vmul.f32 0.03125, %v4995_v6 }
0x11ce   :  { %v5001_v8 = vadd.f32 1e-05, %v4999_v18 }
0x11cf   :  { %v4998_v12 = vpop.xlane.xlu0 %4997 }
0x11d0   :  { %5636 = vrsqrt.f32 %v5001_v8  ;;  %v5000_v24 = vmul.f32 0.03125, %v4998_v12 }
0x11d2   :  { %v5002_v51 = vadd.f32 1e-05, %v5000_v24 }
0x11d4   :  { %5638 = vrsqrt.f32 %v5002_v51 }
0x11dd   :  { %v5637_v33 = vpop.eup %5636 }
0x11de   :  { %v5005_v43 = vmul.f32 %v5637_v33, %v4989_v21 }
0x11e0   :  { %v5013_v29 = vmul.f32 %v5147_v46, %v5005_v43 }
0x11e1   :  { %v5639_v53 = vpop.eup %5638 }
0x11e2   :  { %v5006_v22 = vmul.f32 %v5639_v53, %v4990_v37  ;;  %v5021_v48 = vadd.f32 %v5148_v47, %v5013_v29 }
0x11e4   :  { %v5014_v40 = vmul.f32 %v5147_v46, %v5006_v22  ;;  %5023 = vst.msk [vmem:[#allocation26] sm:$0xff] %vm296_vm1, %v5021_v48 }
0x11e6   :  { %v5022_v32 = vadd.f32 %v5148_v47, %v5014_v40 }
0x11e8   :  { %5024 = vst.msk [vmem:[#allocation26 + $0x8] sm:$0xff] %vm296_vm1, %v5022_v32 }
0x11e9   :  { %5953 = shalt.err (!%p5950_p9)
}
0x11ea   :  { %s7164_s14 = sld [smem:[#allocation45_spill]] }
0x11f0   :  { %5036 = dma.vmem_to_hbm [thread:$0]  %s5031_s8, 256, %s7164_s14, [#allocation4], %s5990_s15, %s5990_s15, %s5991_s2  }
0x11f1   :  { %5978 = dma.done.wait [#allocation4], 256  }
0x11f2   :  { %5979 = vsyncadd [#allocation4], 4294967040 }
0x11f3   :  { %5040 = vsyncpa [#allocation3], 1 }
0x11f4   :  { %5041 = vsyncpa [#allocation6], 1 }
0x11f5   :  { %5042 = vsyncpa [#allocation9], 1 }
0x11f6   :  { %5043 = vsyncpa [#allocation12], 1 }
0x11f7   :  { %5044 = vsyncpa [#allocation15], 1 }
0x11f8   :  { %5045 = vsyncpa [#allocation18], 1 }
0x11f9   :  { %5046 = vsyncpa [#allocation21], 1 }
0x11fa   :  { %5047 = vsyncpa [#allocation24], 1 }
0x11fb   :  { %5048 = vsyncpa [#allocation4], 1 }

</bundles_post_ra>
